<compile_context>
chip_gen: v7x
topology: tpu7x:2x2x1
jax: 0.10.0
libtpu: 0.0.40
codegen_flags: <defaults>
</compile_context>

<pallas_src>
import functools

import jax
import jax.numpy as jnp
from jax import lax
from jax.experimental import pallas as pl
from jax.experimental.pallas import tpu as pltpu


NEG_SLOPE = 0.2          # GATConv default LeakyReLU negative_slope
MASK_VALUE = -1e9        # additive mask for non-edges (pre-softmax)
MM_DTYPE = jnp.bfloat16  # MXU input dtype; accumulation stays f32
BN_EPS = 1e-5
LANE = 128


def _mm(a, b):
    """Matmul with bf16 MXU inputs and f32 accumulation."""
    return jnp.dot(a.astype(MM_DTYPE), b.astype(MM_DTYPE),
                   preferred_element_type=jnp.float32)


# ---------------------------------------------------------------------------
# Fused Pallas kernel: the whole GATLayer forward in one call
# ---------------------------------------------------------------------------

def _gat_layer_kernel(x_ref, adjb_ref, w_ref, vec_ref, o_ref,
                      *, heads, hidden, cin, cout):
    C = heads * hidden                      # lane-dense feature width (128)
    # Static row offsets into the packed bf16 weight slab.
    r_w1, r_w2, r_w3 = 0, cin, cin + C
    r_fold, r_res = cin + 2 * C, cin + 3 * C

    x = x_ref[...]                                   # (N, cin) f32
    adjb = adjb_ref[...].astype(jnp.float32)         # (N, N) additive mask (bf16 in HBM)
    vec = vec_ref[...]                               # (8, 128) folded scales/shifts
    s1, sh1 = vec[0:1, :], vec[1:2, :]               # BN1 scale, (b1*s1 + t1)
    s2, sh2 = vec[2:3, :], vec[3:4, :]
    sh3, bres = vec[4:5, :], vec[5:6, :]             # (b3*s3 + t3) padded, res bias

    col = lax.broadcasted_iota(jnp.int32, (1, C), 1)  # hoisted once

    def gat_conv(xin, w_aug, hid):
        # One MXU pass yields both h (cols 0:C) and the 2*heads attention
        # coefficients (cols C:C+2*heads) — logit matmul folded into w_aug.
        haug = _mm(xin, w_aug)                        # (N, C + 128) f32
        h = haug[:, :C]
        al = haug[:, C:C + 2 * heads]                 # (N, 2*heads)
        al_t = al.T                                   # (2*heads, N) small XLU transpose

        # Block-diagonal per-head feature matrix, built once per layer in bf16.
        h_bf = h.astype(MM_DTYPE)
        zero = jnp.zeros_like(h_bf)
        blocks = []
        for hd in range(heads):
            m = (col >= hd * hid) & (col < (hd + 1) * hid)
            blocks.append(jnp.where(m, h_bf, zero))
        hbd = jnp.concatenate(blocks, axis=0)         # (heads*N, C) bf16

        ps, rs = [], []
        for hd in range(heads):
            e = al[:, heads + hd:heads + hd + 1] + al_t[hd:hd + 1, :]   # (N, N)
            e = jnp.maximum(e, NEG_SLOPE * e)         # LeakyReLU(0.2) via max
            e = e + adjb                              # mask non-edges
            e = e - jnp.max(e, axis=-1, keepdims=True)
            p = jnp.exp(e)                            # f32 (v5e-safe), unnormalized
            rs.append(pl.reciprocal(jnp.sum(p, axis=-1, keepdims=True), approx=True))
            ps.append(p.astype(MM_DTYPE))
            # TODO(synk): GATConv attention dropout (p=0.7) skipped (eval mode).

        a_cat = jnp.concatenate(ps, axis=-1)          # (N, heads*N) bf16
        out = jnp.dot(a_cat, hbd, preferred_element_type=jnp.float32)  # (N, C)
        # Deferred softmax normalization: one combined per-head column scale.
        scale = rs[0]
        for hd in range(1, heads):
            scale = jnp.where(col < hd * hid, scale, rs[hd])
        return out * scale

    x_bf = x.astype(MM_DTYPE)                         # hoisted cast (res + layer 1)

    # Residual branch: nn.Linear(in_channels, out_channels), zero-padded to 128 lanes.
    res = jnp.dot(x_bf, w_ref[pl.ds(r_res, cin), pl.ds(0, C)],
                  preferred_element_type=jnp.float32) + bres

    # gat1 -> BN1(folded) -> ReLU   (dropout = identity in eval mode)
    h1 = jnp.maximum(gat_conv(x_bf, w_ref[pl.ds(r_w1, cin), :], hidden) * s1 + sh1, 0.0)
    # gat2 -> BN2 -> ReLU
    h2 = jnp.maximum(gat_conv(h1, w_ref[pl.ds(r_w2, C), :], hidden) * s2 + sh2, 0.0)
    # gat3 (concat=False): head-mean, BN3 scale and 1/heads folded into fold3.
    g3 = gat_conv(h2, w_ref[pl.ds(r_w3, C), :], cout)
    fold3 = w_ref[pl.ds(r_fold, C), pl.ds(0, C)]
    h3 = jnp.maximum(_mm(g3, fold3) + sh3, 0.0)
    # TODO(synk): feature dropout (p=0.7) between layers skipped (eval mode).

    o_ref[...] = (h3 + res).astype(o_ref.dtype)       # lane-dense (N, 128) store


def gat_layer_forward(x, adj_bias, wslab, vecs, *, heads, hidden, cout):
    n, cin = x.shape
    C = heads * hidden
    out = pl.pallas_call(
        functools.partial(_gat_layer_kernel, heads=heads, hidden=hidden,
                          cin=cin, cout=cout),
        out_shape=jax.ShapeDtypeStruct((n, C), jnp.float32),
        # Whole-array VMEM-resident blocks; exactly 4 input DMAs + 1 output DMA.
        in_specs=[pl.BlockSpec(memory_space=pltpu.MemorySpace.VMEM)] * 4,
        out_specs=pl.BlockSpec(memory_space=pltpu.MemorySpace.VMEM),
    )(x, adj_bias, wslab, vecs)
    return out[:, :cout]   # output slab is 128 lanes wide; slice valid cols on host


# ---------------------------------------------------------------------------
# Synthetic, deterministic logical parameters (PyG GATConv / BatchNorm1d / Linear)
# ---------------------------------------------------------------------------

def init_gat_params(key, cin, cout, hidden, heads):
    ks = jax.random.split(key, 16)

    def dense(k, fi, fo):
        return jax.random.normal(k, (fi, fo), jnp.float32) * (1.0 / jnp.sqrt(fi))

    def att_packed(k, hid):
        # Per-head src/dst attention vectors packed block-diagonally so that
        # h @ a_packed -> (N, 2*heads) = [alpha_src_h ..., alpha_dst_h ...].
        a = jax.random.normal(k, (2, heads, hid), jnp.float32) * (1.0 / jnp.sqrt(hid))
        packed = jnp.zeros((heads * hid, 2 * heads), jnp.float32)
        for hd in range(heads):
            packed = packed.at[hd * hid:(hd + 1) * hid, hd].set(a[0, hd])
            packed = packed.at[hd * hid:(hd + 1) * hid, heads + hd].set(a[1, hd])
        return packed

    def bn(k, c):
        k1, k2, k3, k4 = jax.random.split(k, 4)
        return dict(
            gamma=1.0 + 0.2 * jax.random.uniform(k1, (1, c), minval=-1.0, maxval=1.0),
            beta=0.1 * jax.random.normal(k2, (1, c)),
            mean=0.1 * jax.random.normal(k3, (1, c)),
            var=1.0 + 0.2 * jax.random.uniform(k4, (1, c), minval=-1.0, maxval=1.0))

    C = heads * hidden
    return {
        "w1": dense(ks[0], cin, C), "a1": att_packed(ks[1], hidden),
        "b1": 0.05 * jax.random.normal(ks[2], (1, C)), "bn1": bn(ks[3], C),
        "w2": dense(ks[4], C, C), "a2": att_packed(ks[5], hidden),
        "b2": 0.05 * jax.random.normal(ks[6], (1, C)), "bn2": bn(ks[7], C),
        "w3": dense(ks[8], C, heads * cout), "a3": att_packed(ks[9], cout),
        "b3": 0.05 * jax.random.normal(ks[10], (1, cout)), "bn3": bn(ks[11], cout),
        "wres": dense(ks[12], cin, cout),
        "bres": 0.05 * jax.random.normal(ks[13], (1, cout)),
    }


# ---------------------------------------------------------------------------
# Host-side packing: fold biases/BN, fuse logit weights, build 2 lane-dense slabs
# ---------------------------------------------------------------------------

def pack_params(p, *, heads, hidden, cin, cout):
    C = heads * hidden
    ncols = C + LANE

    def fold_bn(bn):
        s = bn["gamma"] / jnp.sqrt(bn["var"] + BN_EPS)
        return s, bn["beta"] - bn["mean"] * s

    def aug(w, a):
        fi, fo = w.shape
        out = jnp.zeros((fi, ncols), jnp.float32)
        out = out.at[:, :fo].set(w)
        out = out.at[:, C:C + 2 * heads].set(w @ a)   # fused attention-logit weights
        return out

    s1, t1 = fold_bn(p["bn1"])
    s2, t2 = fold_bn(p["bn2"])
    s3, t3 = fold_bn(p["bn3"])

    # Layer-3 fold matrix: head-mean (1/heads) and BN3 scale folded in.
    fold3 = jnp.zeros((C, ncols), jnp.float32)
    for hd in range(heads):
        fold3 = fold3.at[hd * cout:(hd + 1) * cout, :cout].set(
            jnp.diag(s3[0]) / heads)

    wres_p = jnp.zeros((cin, ncols), jnp.float32).at[:, :cout].set(p["wres"])

    wslab = jnp.concatenate(
        [aug(p["w1"], p["a1"]), aug(p["w2"], p["a2"]), aug(p["w3"], p["a3"]),
         fold3, wres_p], axis=0).astype(MM_DTYPE)     # (cin + 3C + cin, C+128) bf16

    vecs = jnp.zeros((8, C), jnp.float32)
    vecs = vecs.at[0].set(s1[0]).at[1].set((p["b1"] * s1 + t1)[0])
    vecs = vecs.at[2].set(s2[0]).at[3].set((p["b2"] * s2 + t2)[0])
    vecs = vecs.at[4, :cout].set((p["b3"] * s3 + t3)[0])
    vecs = vecs.at[5, :cout].set(p["bres"][0])
    return wslab, vecs


# ---------------------------------------------------------------------------
# Plain-JAX reference (standard per-head GATConv structure) for validation
# ---------------------------------------------------------------------------

def gat_layer_forward_ref(x, adjb, p, *, heads, hidden, cout):
    def bn_apply(h, bn):
        return (h - bn["mean"]) / jnp.sqrt(bn["var"] + BN_EPS) * bn["gamma"] + bn["beta"]

    def conv(xin, w, a, bias, concat):
        fo = w.shape[1]
        hid = fo // heads
        h = _mm(xin, w)
        al = _mm(xin, w @ a)          # fused logit weights (exact math; matches slab)
        outs = []
        for hd in range(heads):
            e = al[:, heads + hd][:, None] + al[:, hd][None, :]
            e = jnp.maximum(e, NEG_SLOPE * e) + adjb
            e = e - jnp.max(e, axis=-1, keepdims=True)
            pr = jnp.exp(e)
            o = _mm(pr, h[:, hd * hid:(hd + 1) * hid]) / jnp.sum(pr, -1, keepdims=True)
            outs.append(o)
        out = jnp.concatenate(outs, axis=-1) if concat else sum(outs) / heads
        return out + bias

    res = _mm(x, p["wres"]) + p["bres"]
    h = jnp.maximum(bn_apply(conv(x, p["w1"], p["a1"], p["b1"], True), p["bn1"]), 0.0)
    h = jnp.maximum(bn_apply(conv(h, p["w2"], p["a2"], p["b2"], True), p["bn2"]), 0.0)
    h = jnp.maximum(bn_apply(conv(h, p["w3"], p["a3"], p["b3"], False), p["bn3"]), 0.0)
    return h + res


# ---------------------------------------------------------------------------
# Driver
# ---------------------------------------------------------------------------

if __name__ == "__main__":
    NUM_NODES, NUM_EDGES = 128, 512
    IN_CH, OUT_CH, HIDDEN, HEADS = 32, 32, 64, 2

    key = jax.random.PRNGKey(0)
    kx, ksrc, kdst = jax.random.split(key, 3)
    x = jax.random.normal(kx, (NUM_NODES, IN_CH), jnp.float32)
    src = jax.random.randint(ksrc, (NUM_EDGES,), 0, NUM_NODES)
    dst = jax.random.randint(kdst, (NUM_EDGES,), 0, NUM_NODES)
    edge_index = jnp.stack([src, dst])   # PyG layout: [source, target], shape (2, E)

    # Dense adjacency (target-major) with self-loops (GATConv add_self_loops=True),
    # converted to an additive pre-softmax mask stored in bf16 (half the DMA bytes).
    adj = jnp.zeros((NUM_NODES, NUM_NODES), jnp.float32)
    adj = adj.at[edge_index[1], edge_index[0]].set(1.0)
    adj = jnp.maximum(adj, jnp.eye(NUM_NODES, dtype=jnp.float32))
    adj_bias = jnp.where(adj > 0, 0.0, MASK_VALUE).astype(jnp.bfloat16)

    params = init_gat_params(jax.random.PRNGKey(1), IN_CH, OUT_CH, HIDDEN, HEADS)
    wslab, vecs = pack_params(params, heads=HEADS, hidden=HIDDEN, cin=IN_CH, cout=OUT_CH)

    fwd = jax.jit(functools.partial(gat_layer_forward,
                                    heads=HEADS, hidden=HIDDEN, cout=OUT_CH))
    out = fwd(x, adj_bias, wslab, vecs)
    jax.block_until_ready(out)

    assert out.shape == (NUM_NODES, OUT_CH)
    assert bool(jnp.all(jnp.isfinite(out)))

    ref = gat_layer_forward_ref(x, adj_bias.astype(jnp.float32), params,
                                heads=HEADS, hidden=HIDDEN, cout=OUT_CH)
    max_err = float(jnp.max(jnp.abs(out - ref)))
    # bf16 MXU inputs + approx reciprocal vs f32 division in the reference.
    assert bool(jnp.allclose(out, ref, atol=3e-2, rtol=3e-2)), max_err

    print("KERNEL_OK")
</pallas_src>

<mosaic_0001>
module attributes {stable_mosaic.version = 11 : i64} {
  func.func @_gat_layer_kernel(%arg0: memref<128x32xf32, #tpu.memory_space<vmem>>, %arg1: memref<128x128xbf16, #tpu.memory_space<vmem>>, %arg2: memref<448x256xbf16, #tpu.memory_space<vmem>>, %arg3: memref<8x128xf32, #tpu.memory_space<vmem>>, %arg4: memref<128x128xf32, #tpu.memory_space<vmem>>) attributes {dimension_semantics = [], scalar_prefetch = 0 : i64, scratch_operands = 0 : i64, tpu.core_type = #tpu.core_type<tc>} {
    %c0 = arith.constant 0 : index
    %c0_0 = arith.constant 0 : index
    %0 = vector.load %arg0[%c0, %c0_0] : memref<128x32xf32, #tpu.memory_space<vmem>>, vector<128x32xf32>
    %c0_1 = arith.constant 0 : index
    %c0_2 = arith.constant 0 : index
    %1 = vector.load %arg1[%c0_1, %c0_2] : memref<128x128xbf16, #tpu.memory_space<vmem>>, vector<128x128xbf16>
    %2 = arith.extf %1 : vector<128x128xbf16> to vector<128x128xf32>
    %c0_3 = arith.constant 0 : index
    %c0_4 = arith.constant 0 : index
    %3 = vector.load %arg3[%c0_3, %c0_4] : memref<8x128xf32, #tpu.memory_space<vmem>>, vector<8x128xf32>
    %4 = vector.extract_strided_slice %3 {offsets = [0, 0], sizes = [1, 128], strides = [1, 1]} : vector<8x128xf32> to vector<1x128xf32>
    %5 = vector.extract_strided_slice %3 {offsets = [1, 0], sizes = [1, 128], strides = [1, 1]} : vector<8x128xf32> to vector<1x128xf32>
    %6 = vector.extract_strided_slice %3 {offsets = [2, 0], sizes = [1, 128], strides = [1, 1]} : vector<8x128xf32> to vector<1x128xf32>
    %7 = vector.extract_strided_slice %3 {offsets = [3, 0], sizes = [1, 128], strides = [1, 1]} : vector<8x128xf32> to vector<1x128xf32>
    %8 = vector.extract_strided_slice %3 {offsets = [4, 0], sizes = [1, 128], strides = [1, 1]} : vector<8x128xf32> to vector<1x128xf32>
    %9 = vector.extract_strided_slice %3 {offsets = [5, 0], sizes = [1, 128], strides = [1, 1]} : vector<8x128xf32> to vector<1x128xf32>
    %10 = tpu.iota {dimensions = array<i32: 1>} : vector<1x128xi32>
    %11 = arith.truncf %0 : vector<128x32xf32> to vector<128x32xbf16>
    %c416 = arith.constant 416 : index
    %c0_5 = arith.constant 0 : index
    %12 = vector.load %arg2[%c416, %c0_5] : memref<448x256xbf16, #tpu.memory_space<vmem>>, vector<32x128xbf16>
    %cst = arith.constant dense<0.000000e+00> : vector<128x128xf32>
    %13 = tpu.matmul %11, %12, %cst {dimension_numbers = #tpu.dot_dimension_numbers<[1], [0], [0], [1], [0, 0, 1, 1], [], []>} : vector<128x32xbf16>, vector<32x128xbf16>, vector<128x128xf32> -> vector<128x128xf32>
    %14 = vector.broadcast %9 : vector<1x128xf32> to vector<128x128xf32>
    %15 = arith.addf %13, %14 : vector<128x128xf32>
    %c0_6 = arith.constant 0 : index
    %c0_7 = arith.constant 0 : index
    %16 = vector.load %arg2[%c0_6, %c0_7] : memref<448x256xbf16, #tpu.memory_space<vmem>>, vector<32x256xbf16>
    %cst_8 = arith.constant dense<0.000000e+00> : vector<128x256xf32>
    %17 = tpu.matmul %11, %16, %cst_8 {dimension_numbers = #tpu.dot_dimension_numbers<[1], [0], [0], [1], [0, 0, 1, 1], [], []>} : vector<128x32xbf16>, vector<32x256xbf16>, vector<128x256xf32> -> vector<128x256xf32>
    %18 = vector.extract_strided_slice %17 {offsets = [0, 0], sizes = [128, 128], strides = [1, 1]} : vector<128x256xf32> to vector<128x128xf32>
    %19 = vector.extract_strided_slice %17 {offsets = [0, 128], sizes = [128, 4], strides = [1, 1]} : vector<128x256xf32> to vector<128x4xf32>
    %20 = tpu.transpose %19, [1, 0] : vector<128x4xf32> -> vector<4x128xf32>
    %21 = arith.truncf %18 : vector<128x128xf32> to vector<128x128xbf16>
    %cst_9 = arith.constant 0.000000e+00 : bf16
    %22 = vector.broadcast %cst_9 : bf16 to vector<128x128xbf16>
    %c0_i32 = arith.constant 0 : i32
    %23 = vector.broadcast %c0_i32 : i32 to vector<1x128xi32>
    %24 = arith.cmpi sge, %10, %23 : vector<1x128xi32>
    %c64_i32 = arith.constant 64 : i32
    %25 = vector.broadcast %c64_i32 : i32 to vector<1x128xi32>
    %26 = arith.cmpi slt, %10, %25 : vector<1x128xi32>
    %27 = arith.andi %24, %26 : vector<1x128xi1>
    %28 = vector.shape_cast %27 : vector<1x128xi1> to vector<1x128xi1>
    %29 = vector.broadcast %28 : vector<1x128xi1> to vector<128x128xi1>
    %30 = arith.select %29, %21, %22 : vector<128x128xi1>, vector<128x128xbf16>
    %c64_i32_10 = arith.constant 64 : i32
    %31 = vector.broadcast %c64_i32_10 : i32 to vector<1x128xi32>
    %32 = arith.cmpi sge, %10, %31 : vector<1x128xi32>
    %c128_i32 = arith.constant 128 : i32
    %33 = vector.broadcast %c128_i32 : i32 to vector<1x128xi32>
    %34 = arith.cmpi slt, %10, %33 : vector<1x128xi32>
    %35 = arith.andi %32, %34 : vector<1x128xi1>
    %36 = vector.shape_cast %35 : vector<1x128xi1> to vector<1x128xi1>
    %37 = vector.broadcast %36 : vector<1x128xi1> to vector<128x128xi1>
    %38 = arith.select %37, %21, %22 : vector<128x128xi1>, vector<128x128xbf16>
    %39 = tpu.concatenate %30, %38 in 0 : vector<128x128xbf16>, vector<128x128xbf16> -> vector<256x128xbf16>
    %40 = vector.extract_strided_slice %19 {offsets = [0, 2], sizes = [128, 1], strides = [1, 1]} : vector<128x4xf32> to vector<128x1xf32>
    %41 = vector.extract_strided_slice %20 {offsets = [0, 0], sizes = [1, 128], strides = [1, 1]} : vector<4x128xf32> to vector<1x128xf32>
    %42 = vector.broadcast %40 : vector<128x1xf32> to vector<128x128xf32>
    %43 = vector.broadcast %41 : vector<1x128xf32> to vector<128x128xf32>
    %44 = arith.addf %42, %43 : vector<128x128xf32>
    %cst_11 = arith.constant 2.000000e-01 : f32
    %45 = vector.broadcast %cst_11 : f32 to vector<128x128xf32>
    %46 = arith.mulf %45, %44 : vector<128x128xf32>
    %47 = arith.maximumf %44, %46 : vector<128x128xf32>
    %48 = arith.addf %47, %2 : vector<128x128xf32>
    %cst_12 = arith.constant dense<0xFF800000> : vector<128xf32>
    %49 = vector.multi_reduction <maximumf>, %48, %cst_12 [1] : vector<128x128xf32> to vector<128xf32>
    %50 = vector.shape_cast %49 : vector<128xf32> to vector<128x1xf32>
    %51 = vector.broadcast %50 : vector<128x1xf32> to vector<128x128xf32>
    %52 = arith.subf %48, %51 : vector<128x128xf32>
    %53 = math.exp %52 : vector<128x128xf32>
    %cst_13 = arith.constant dense<0.000000e+00> : vector<128xf32>
    %54 = vector.multi_reduction <add>, %53, %cst_13 [1] : vector<128x128xf32> to vector<128xf32>
    %55 = vector.shape_cast %54 : vector<128xf32> to vector<128x1xf32>
    %56 = tpu.reciprocal %55 {approx = true} : vector<128x1xf32> -> vector<128x1xf32>
    %57 = arith.truncf %53 : vector<128x128xf32> to vector<128x128xbf16>
    %58 = vector.extract_strided_slice %19 {offsets = [0, 3], sizes = [128, 1], strides = [1, 1]} : vector<128x4xf32> to vector<128x1xf32>
    %59 = vector.extract_strided_slice %20 {offsets = [1, 0], sizes = [1, 128], strides = [1, 1]} : vector<4x128xf32> to vector<1x128xf32>
    %60 = vector.broadcast %58 : vector<128x1xf32> to vector<128x128xf32>
    %61 = vector.broadcast %59 : vector<1x128xf32> to vector<128x128xf32>
    %62 = arith.addf %60, %61 : vector<128x128xf32>
    %cst_14 = arith.constant 2.000000e-01 : f32
    %63 = vector.broadcast %cst_14 : f32 to vector<128x128xf32>
    %64 = arith.mulf %63, %62 : vector<128x128xf32>
    %65 = arith.maximumf %62, %64 : vector<128x128xf32>
    %66 = arith.addf %65, %2 : vector<128x128xf32>
    %cst_15 = arith.constant dense<0xFF800000> : vector<128xf32>
    %67 = vector.multi_reduction <maximumf>, %66, %cst_15 [1] : vector<128x128xf32> to vector<128xf32>
    %68 = vector.shape_cast %67 : vector<128xf32> to vector<128x1xf32>
    %69 = vector.broadcast %68 : vector<128x1xf32> to vector<128x128xf32>
    %70 = arith.subf %66, %69 : vector<128x128xf32>
    %71 = math.exp %70 : vector<128x128xf32>
    %cst_16 = arith.constant dense<0.000000e+00> : vector<128xf32>
    %72 = vector.multi_reduction <add>, %71, %cst_16 [1] : vector<128x128xf32> to vector<128xf32>
    %73 = vector.shape_cast %72 : vector<128xf32> to vector<128x1xf32>
    %74 = tpu.reciprocal %73 {approx = true} : vector<128x1xf32> -> vector<128x1xf32>
    %75 = arith.truncf %71 : vector<128x128xf32> to vector<128x128xbf16>
    %76 = tpu.concatenate %57, %75 in 1 : vector<128x128xbf16>, vector<128x128xbf16> -> vector<128x256xbf16>
    %cst_17 = arith.constant dense<0.000000e+00> : vector<128x128xf32>
    %77 = tpu.matmul %76, %39, %cst_17 {dimension_numbers = #tpu.dot_dimension_numbers<[1], [0], [0], [1], [0, 0, 1, 1], [], []>} : vector<128x256xbf16>, vector<256x128xbf16>, vector<128x128xf32> -> vector<128x128xf32>
    %c64_i32_18 = arith.constant 64 : i32
    %78 = vector.broadcast %c64_i32_18 : i32 to vector<1x128xi32>
    %79 = arith.cmpi slt, %10, %78 : vector<1x128xi32>
    %80 = vector.shape_cast %79 : vector<1x128xi1> to vector<1x128xi1>
    %81 = vector.broadcast %80 : vector<1x128xi1> to vector<128x128xi1>
    %82 = vector.shape_cast %56 : vector<128x1xf32> to vector<128x1xf32>
    %83 = vector.broadcast %82 : vector<128x1xf32> to vector<128x128xf32>
    %84 = vector.shape_cast %74 : vector<128x1xf32> to vector<128x1xf32>
    %85 = vector.broadcast %84 : vector<128x1xf32> to vector<128x128xf32>
    %86 = arith.select %81, %83, %85 : vector<128x128xi1>, vector<128x128xf32>
    %87 = arith.mulf %77, %86 : vector<128x128xf32>
    %88 = vector.broadcast %4 : vector<1x128xf32> to vector<128x128xf32>
    %89 = arith.mulf %87, %88 : vector<128x128xf32>
    %90 = vector.broadcast %5 : vector<1x128xf32> to vector<128x128xf32>
    %91 = arith.addf %89, %90 : vector<128x128xf32>
    %cst_19 = arith.constant 0.000000e+00 : f32
    %92 = vector.broadcast %cst_19 : f32 to vector<128x128xf32>
    %93 = arith.maximumf %91, %92 : vector<128x128xf32>
    %c32 = arith.constant 32 : index
    %c0_20 = arith.constant 0 : index
    %94 = vector.load %arg2[%c32, %c0_20] : memref<448x256xbf16, #tpu.memory_space<vmem>>, vector<128x256xbf16>
    %95 = arith.truncf %93 : vector<128x128xf32> to vector<128x128xbf16>
    %cst_21 = arith.constant dense<0.000000e+00> : vector<128x256xf32>
    %96 = tpu.matmul %95, %94, %cst_21 {dimension_numbers = #tpu.dot_dimension_numbers<[1], [0], [0], [1], [0, 0, 1, 1], [], []>} : vector<128x128xbf16>, vector<128x256xbf16>, vector<128x256xf32> -> vector<128x256xf32>
    %97 = vector.extract_strided_slice %96 {offsets = [0, 0], sizes = [128, 128], strides = [1, 1]} : vector<128x256xf32> to vector<128x128xf32>
    %98 = vector.extract_strided_slice %96 {offsets = [0, 128], sizes = [128, 4], strides = [1, 1]} : vector<128x256xf32> to vector<128x4xf32>
    %99 = tpu.transpose %98, [1, 0] : vector<128x4xf32> -> vector<4x128xf32>
    %100 = arith.truncf %97 : vector<128x128xf32> to vector<128x128xbf16>
    %cst_22 = arith.constant 0.000000e+00 : bf16
    %101 = vector.broadcast %cst_22 : bf16 to vector<128x128xbf16>
    %c0_i32_23 = arith.constant 0 : i32
    %102 = vector.broadcast %c0_i32_23 : i32 to vector<1x128xi32>
    %103 = arith.cmpi sge, %10, %102 : vector<1x128xi32>
    %c64_i32_24 = arith.constant 64 : i32
    %104 = vector.broadcast %c64_i32_24 : i32 to vector<1x128xi32>
    %105 = arith.cmpi slt, %10, %104 : vector<1x128xi32>
    %106 = arith.andi %103, %105 : vector<1x128xi1>
    %107 = vector.shape_cast %106 : vector<1x128xi1> to vector<1x128xi1>
    %108 = vector.broadcast %107 : vector<1x128xi1> to vector<128x128xi1>
    %109 = arith.select %108, %100, %101 : vector<128x128xi1>, vector<128x128xbf16>
    %c64_i32_25 = arith.constant 64 : i32
    %110 = vector.broadcast %c64_i32_25 : i32 to vector<1x128xi32>
    %111 = arith.cmpi sge, %10, %110 : vector<1x128xi32>
    %c128_i32_26 = arith.constant 128 : i32
    %112 = vector.broadcast %c128_i32_26 : i32 to vector<1x128xi32>
    %113 = arith.cmpi slt, %10, %112 : vector<1x128xi32>
    %114 = arith.andi %111, %113 : vector<1x128xi1>
    %115 = vector.shape_cast %114 : vector<1x128xi1> to vector<1x128xi1>
    %116 = vector.broadcast %115 : vector<1x128xi1> to vector<128x128xi1>
    %117 = arith.select %116, %100, %101 : vector<128x128xi1>, vector<128x128xbf16>
    %118 = tpu.concatenate %109, %117 in 0 : vector<128x128xbf16>, vector<128x128xbf16> -> vector<256x128xbf16>
    %119 = vector.extract_strided_slice %98 {offsets = [0, 2], sizes = [128, 1], strides = [1, 1]} : vector<128x4xf32> to vector<128x1xf32>
    %120 = vector.extract_strided_slice %99 {offsets = [0, 0], sizes = [1, 128], strides = [1, 1]} : vector<4x128xf32> to vector<1x128xf32>
    %121 = vector.broadcast %119 : vector<128x1xf32> to vector<128x128xf32>
    %122 = vector.broadcast %120 : vector<1x128xf32> to vector<128x128xf32>
    %123 = arith.addf %121, %122 : vector<128x128xf32>
    %cst_27 = arith.constant 2.000000e-01 : f32
    %124 = vector.broadcast %cst_27 : f32 to vector<128x128xf32>
    %125 = arith.mulf %124, %123 : vector<128x128xf32>
    %126 = arith.maximumf %123, %125 : vector<128x128xf32>
    %127 = arith.addf %126, %2 : vector<128x128xf32>
    %cst_28 = arith.constant dense<0xFF800000> : vector<128xf32>
    %128 = vector.multi_reduction <maximumf>, %127, %cst_28 [1] : vector<128x128xf32> to vector<128xf32>
    %129 = vector.shape_cast %128 : vector<128xf32> to vector<128x1xf32>
    %130 = vector.broadcast %129 : vector<128x1xf32> to vector<128x128xf32>
    %131 = arith.subf %127, %130 : vector<128x128xf32>
    %132 = math.exp %131 : vector<128x128xf32>
    %cst_29 = arith.constant dense<0.000000e+00> : vector<128xf32>
    %133 = vector.multi_reduction <add>, %132, %cst_29 [1] : vector<128x128xf32> to vector<128xf32>
    %134 = vector.shape_cast %133 : vector<128xf32> to vector<128x1xf32>
    %135 = tpu.reciprocal %134 {approx = true} : vector<128x1xf32> -> vector<128x1xf32>
    %136 = arith.truncf %132 : vector<128x128xf32> to vector<128x128xbf16>
    %137 = vector.extract_strided_slice %98 {offsets = [0, 3], sizes = [128, 1], strides = [1, 1]} : vector<128x4xf32> to vector<128x1xf32>
    %138 = vector.extract_strided_slice %99 {offsets = [1, 0], sizes = [1, 128], strides = [1, 1]} : vector<4x128xf32> to vector<1x128xf32>
    %139 = vector.broadcast %137 : vector<128x1xf32> to vector<128x128xf32>
    %140 = vector.broadcast %138 : vector<1x128xf32> to vector<128x128xf32>
    %141 = arith.addf %139, %140 : vector<128x128xf32>
    %cst_30 = arith.constant 2.000000e-01 : f32
    %142 = vector.broadcast %cst_30 : f32 to vector<128x128xf32>
    %143 = arith.mulf %142, %141 : vector<128x128xf32>
    %144 = arith.maximumf %141, %143 : vector<128x128xf32>
    %145 = arith.addf %144, %2 : vector<128x128xf32>
    %cst_31 = arith.constant dense<0xFF800000> : vector<128xf32>
    %146 = vector.multi_reduction <maximumf>, %145, %cst_31 [1] : vector<128x128xf32> to vector<128xf32>
    %147 = vector.shape_cast %146 : vector<128xf32> to vector<128x1xf32>
    %148 = vector.broadcast %147 : vector<128x1xf32> to vector<128x128xf32>
    %149 = arith.subf %145, %148 : vector<128x128xf32>
    %150 = math.exp %149 : vector<128x128xf32>
    %cst_32 = arith.constant dense<0.000000e+00> : vector<128xf32>
    %151 = vector.multi_reduction <add>, %150, %cst_32 [1] : vector<128x128xf32> to vector<128xf32>
    %152 = vector.shape_cast %151 : vector<128xf32> to vector<128x1xf32>
    %153 = tpu.reciprocal %152 {approx = true} : vector<128x1xf32> -> vector<128x1xf32>
    %154 = arith.truncf %150 : vector<128x128xf32> to vector<128x128xbf16>
    %155 = tpu.concatenate %136, %154 in 1 : vector<128x128xbf16>, vector<128x128xbf16> -> vector<128x256xbf16>
    %cst_33 = arith.constant dense<0.000000e+00> : vector<128x128xf32>
    %156 = tpu.matmul %155, %118, %cst_33 {dimension_numbers = #tpu.dot_dimension_numbers<[1], [0], [0], [1], [0, 0, 1, 1], [], []>} : vector<128x256xbf16>, vector<256x128xbf16>, vector<128x128xf32> -> vector<128x128xf32>
    %c64_i32_34 = arith.constant 64 : i32
    %157 = vector.broadcast %c64_i32_34 : i32 to vector<1x128xi32>
    %158 = arith.cmpi slt, %10, %157 : vector<1x128xi32>
    %159 = vector.shape_cast %158 : vector<1x128xi1> to vector<1x128xi1>
    %160 = vector.broadcast %159 : vector<1x128xi1> to vector<128x128xi1>
    %161 = vector.shape_cast %135 : vector<128x1xf32> to vector<128x1xf32>
    %162 = vector.broadcast %161 : vector<128x1xf32> to vector<128x128xf32>
    %163 = vector.shape_cast %153 : vector<128x1xf32> to vector<128x1xf32>
    %164 = vector.broadcast %163 : vector<128x1xf32> to vector<128x128xf32>
    %165 = arith.select %160, %162, %164 : vector<128x128xi1>, vector<128x128xf32>
    %166 = arith.mulf %156, %165 : vector<128x128xf32>
    %167 = vector.broadcast %6 : vector<1x128xf32> to vector<128x128xf32>
    %168 = arith.mulf %166, %167 : vector<128x128xf32>
    %169 = vector.broadcast %7 : vector<1x128xf32> to vector<128x128xf32>
    %170 = arith.addf %168, %169 : vector<128x128xf32>
    %cst_35 = arith.constant 0.000000e+00 : f32
    %171 = vector.broadcast %cst_35 : f32 to vector<128x128xf32>
    %172 = arith.maximumf %170, %171 : vector<128x128xf32>
    %c160 = arith.constant 160 : index
    %c0_36 = arith.constant 0 : index
    %173 = vector.load %arg2[%c160, %c0_36] : memref<448x256xbf16, #tpu.memory_space<vmem>>, vector<128x256xbf16>
    %174 = arith.truncf %172 : vector<128x128xf32> to vector<128x128xbf16>
    %cst_37 = arith.constant dense<0.000000e+00> : vector<128x256xf32>
    %175 = tpu.matmul %174, %173, %cst_37 {dimension_numbers = #tpu.dot_dimension_numbers<[1], [0], [0], [1], [0, 0, 1, 1], [], []>} : vector<128x128xbf16>, vector<128x256xbf16>, vector<128x256xf32> -> vector<128x256xf32>
    %176 = vector.extract_strided_slice %175 {offsets = [0, 0], sizes = [128, 128], strides = [1, 1]} : vector<128x256xf32> to vector<128x128xf32>
    %177 = vector.extract_strided_slice %175 {offsets = [0, 128], sizes = [128, 4], strides = [1, 1]} : vector<128x256xf32> to vector<128x4xf32>
    %178 = tpu.transpose %177, [1, 0] : vector<128x4xf32> -> vector<4x128xf32>
    %179 = arith.truncf %176 : vector<128x128xf32> to vector<128x128xbf16>
    %cst_38 = arith.constant 0.000000e+00 : bf16
    %180 = vector.broadcast %cst_38 : bf16 to vector<128x128xbf16>
    %c0_i32_39 = arith.constant 0 : i32
    %181 = vector.broadcast %c0_i32_39 : i32 to vector<1x128xi32>
    %182 = arith.cmpi sge, %10, %181 : vector<1x128xi32>
    %c32_i32 = arith.constant 32 : i32
    %183 = vector.broadcast %c32_i32 : i32 to vector<1x128xi32>
    %184 = arith.cmpi slt, %10, %183 : vector<1x128xi32>
    %185 = arith.andi %182, %184 : vector<1x128xi1>
    %186 = vector.shape_cast %185 : vector<1x128xi1> to vector<1x128xi1>
    %187 = vector.broadcast %186 : vector<1x128xi1> to vector<128x128xi1>
    %188 = arith.select %187, %179, %180 : vector<128x128xi1>, vector<128x128xbf16>
    %c32_i32_40 = arith.constant 32 : i32
    %189 = vector.broadcast %c32_i32_40 : i32 to vector<1x128xi32>
    %190 = arith.cmpi sge, %10, %189 : vector<1x128xi32>
    %c64_i32_41 = arith.constant 64 : i32
    %191 = vector.broadcast %c64_i32_41 : i32 to vector<1x128xi32>
    %192 = arith.cmpi slt, %10, %191 : vector<1x128xi32>
    %193 = arith.andi %190, %192 : vector<1x128xi1>
    %194 = vector.shape_cast %193 : vector<1x128xi1> to vector<1x128xi1>
    %195 = vector.broadcast %194 : vector<1x128xi1> to vector<128x128xi1>
    %196 = arith.select %195, %179, %180 : vector<128x128xi1>, vector<128x128xbf16>
    %197 = tpu.concatenate %188, %196 in 0 : vector<128x128xbf16>, vector<128x128xbf16> -> vector<256x128xbf16>
    %198 = vector.extract_strided_slice %177 {offsets = [0, 2], sizes = [128, 1], strides = [1, 1]} : vector<128x4xf32> to vector<128x1xf32>
    %199 = vector.extract_strided_slice %178 {offsets = [0, 0], sizes = [1, 128], strides = [1, 1]} : vector<4x128xf32> to vector<1x128xf32>
    %200 = vector.broadcast %198 : vector<128x1xf32> to vector<128x128xf32>
    %201 = vector.broadcast %199 : vector<1x128xf32> to vector<128x128xf32>
    %202 = arith.addf %200, %201 : vector<128x128xf32>
    %cst_42 = arith.constant 2.000000e-01 : f32
    %203 = vector.broadcast %cst_42 : f32 to vector<128x128xf32>
    %204 = arith.mulf %203, %202 : vector<128x128xf32>
    %205 = arith.maximumf %202, %204 : vector<128x128xf32>
    %206 = arith.addf %205, %2 : vector<128x128xf32>
    %cst_43 = arith.constant dense<0xFF800000> : vector<128xf32>
    %207 = vector.multi_reduction <maximumf>, %206, %cst_43 [1] : vector<128x128xf32> to vector<128xf32>
    %208 = vector.shape_cast %207 : vector<128xf32> to vector<128x1xf32>
    %209 = vector.broadcast %208 : vector<128x1xf32> to vector<128x128xf32>
    %210 = arith.subf %206, %209 : vector<128x128xf32>
    %211 = math.exp %210 : vector<128x128xf32>
    %cst_44 = arith.constant dense<0.000000e+00> : vector<128xf32>
    %212 = vector.multi_reduction <add>, %211, %cst_44 [1] : vector<128x128xf32> to vector<128xf32>
    %213 = vector.shape_cast %212 : vector<128xf32> to vector<128x1xf32>
    %214 = tpu.reciprocal %213 {approx = true} : vector<128x1xf32> -> vector<128x1xf32>
    %215 = arith.truncf %211 : vector<128x128xf32> to vector<128x128xbf16>
    %216 = vector.extract_strided_slice %177 {offsets = [0, 3], sizes = [128, 1], strides = [1, 1]} : vector<128x4xf32> to vector<128x1xf32>
    %217 = vector.extract_strided_slice %178 {offsets = [1, 0], sizes = [1, 128], strides = [1, 1]} : vector<4x128xf32> to vector<1x128xf32>
    %218 = vector.broadcast %216 : vector<128x1xf32> to vector<128x128xf32>
    %219 = vector.broadcast %217 : vector<1x128xf32> to vector<128x128xf32>
    %220 = arith.addf %218, %219 : vector<128x128xf32>
    %cst_45 = arith.constant 2.000000e-01 : f32
    %221 = vector.broadcast %cst_45 : f32 to vector<128x128xf32>
    %222 = arith.mulf %221, %220 : vector<128x128xf32>
    %223 = arith.maximumf %220, %222 : vector<128x128xf32>
    %224 = arith.addf %223, %2 : vector<128x128xf32>
    %cst_46 = arith.constant dense<0xFF800000> : vector<128xf32>
    %225 = vector.multi_reduction <maximumf>, %224, %cst_46 [1] : vector<128x128xf32> to vector<128xf32>
    %226 = vector.shape_cast %225 : vector<128xf32> to vector<128x1xf32>
    %227 = vector.broadcast %226 : vector<128x1xf32> to vector<128x128xf32>
    %228 = arith.subf %224, %227 : vector<128x128xf32>
    %229 = math.exp %228 : vector<128x128xf32>
    %cst_47 = arith.constant dense<0.000000e+00> : vector<128xf32>
    %230 = vector.multi_reduction <add>, %229, %cst_47 [1] : vector<128x128xf32> to vector<128xf32>
    %231 = vector.shape_cast %230 : vector<128xf32> to vector<128x1xf32>
    %232 = tpu.reciprocal %231 {approx = true} : vector<128x1xf32> -> vector<128x1xf32>
    %233 = arith.truncf %229 : vector<128x128xf32> to vector<128x128xbf16>
    %234 = tpu.concatenate %215, %233 in 1 : vector<128x128xbf16>, vector<128x128xbf16> -> vector<128x256xbf16>
    %cst_48 = arith.constant dense<0.000000e+00> : vector<128x128xf32>
    %235 = tpu.matmul %234, %197, %cst_48 {dimension_numbers = #tpu.dot_dimension_numbers<[1], [0], [0], [1], [0, 0, 1, 1], [], []>} : vector<128x256xbf16>, vector<256x128xbf16>, vector<128x128xf32> -> vector<128x128xf32>
    %c32_i32_49 = arith.constant 32 : i32
    %236 = vector.broadcast %c32_i32_49 : i32 to vector<1x128xi32>
    %237 = arith.cmpi slt, %10, %236 : vector<1x128xi32>
    %238 = vector.shape_cast %237 : vector<1x128xi1> to vector<1x128xi1>
    %239 = vector.broadcast %238 : vector<1x128xi1> to vector<128x128xi1>
    %240 = vector.shape_cast %214 : vector<128x1xf32> to vector<128x1xf32>
    %241 = vector.broadcast %240 : vector<128x1xf32> to vector<128x128xf32>
    %242 = vector.shape_cast %232 : vector<128x1xf32> to vector<128x1xf32>
    %243 = vector.broadcast %242 : vector<128x1xf32> to vector<128x128xf32>
    %244 = arith.select %239, %241, %243 : vector<128x128xi1>, vector<128x128xf32>
    %245 = arith.mulf %235, %244 : vector<128x128xf32>
    %c288 = arith.constant 288 : index
    %c0_50 = arith.constant 0 : index
    %246 = vector.load %arg2[%c288, %c0_50] : memref<448x256xbf16, #tpu.memory_space<vmem>>, vector<128x128xbf16>
    %247 = arith.truncf %245 : vector<128x128xf32> to vector<128x128xbf16>
    %cst_51 = arith.constant dense<0.000000e+00> : vector<128x128xf32>
    %248 = tpu.matmul %247, %246, %cst_51 {dimension_numbers = #tpu.dot_dimension_numbers<[1], [0], [0], [1], [0, 0, 1, 1], [], []>} : vector<128x128xbf16>, vector<128x128xbf16>, vector<128x128xf32> -> vector<128x128xf32>
    %249 = vector.broadcast %8 : vector<1x128xf32> to vector<128x128xf32>
    %250 = arith.addf %248, %249 : vector<128x128xf32>
    %cst_52 = arith.constant 0.000000e+00 : f32
    %251 = vector.broadcast %cst_52 : f32 to vector<128x128xf32>
    %252 = arith.maximumf %250, %251 : vector<128x128xf32>
    %253 = arith.addf %252, %15 : vector<128x128xf32>
    %c0_53 = arith.constant 0 : index
    %c0_54 = arith.constant 0 : index
    %254 = vector.load %arg4[%c0_53, %c0_54] : memref<128x128xf32, #tpu.memory_space<vmem>>, vector<128x128xf32>
    tpu.vector_store %arg4[%c0_53, %c0_54], %253 {strides = array<i32>} : memref<128x128xf32, #tpu.memory_space<vmem>>, vector<128x128xf32>,
    return
  }
}

</mosaic_0001>

<bundles_post_ra>
// kernel: gat_layer_forward.1
= control target key start
LH: loop header
LB: loop body
LE: loop exit
PB: predicated region body
PF: predicated region fallthrough
CT: control target
= control target key end

     0   :  { %9 = vsyncpa [#allocation3], 0  ;;  %s4345_s15 = smov [#allocation2]   ;;  %s5892_s0 = inlined_call_operand.vmem [shape: f32[128,32], index: 0, kind: input, shape index: {}]   ;;  %s5893_s1 = inlined_call_operand.vmem [shape: bf16[128,128], index: 1, kind: input, shape index: {}]   ;;  %s5894_s2 = inlined_call_operand.hbm [shape: bf16[448,256], index: 2, kind: input, shape index: {}]   ;;  %s5895_s3 = inlined_call_operand.vmem [shape: f32[8,128], index: 3, kind: input, shape index: {}]   ;;  %s5896_s4 = inlined_call_operand.vmem [shape: f32[128,128], index: 4, kind: output, shape index: {}]  }
   0x1   :  { %s19_s16 = sshll.u32 %s4345_s15, 4  ;;  %s4321_s19 = scalar_lea.hbm %s5894_s2, 7168  ;;  %s20_s16 = int_to_ptr.vmem [resolvable:$true] %s19_s16 }
   0x2   :  { %p4322_p0 = scmp.ne.s32.totalorder %s5894_s2, %s4321_s19  ;;  %p4325_p1 = scmp.lt.u32.totalorder %s4321_s19, %s5894_s2 }
   0x4   :  { %p4327_p2 = pnand %p4325_p1, %p4322_p0 }
   0x6   :  { %4330 = shalt.err (!%p4327_p2)
}
   0x7   :  { %s4331_s24 = scalar_lea.vmem %s20_s16, 7168  ;;  %p4336_p4 = scmp.lt.s32.totalorder %s20_s16, %s20_s16 }
   0x8   :  { %p4332_p3 = scmp.ne.s32.totalorder %s20_s16, %s4331_s24  ;;  %p4337_p5 = scmp.lt.s32.totalorder %s4331_s24, %s4331_s24 }
   0xa   :  { %p4338_p6 = por %p4337_p5, %p4336_p4 }
   0xc   :  { %p4339_p7 = pnand %p4338_p6, %p4332_p3 }
   0xe   :  { %4342 = shalt.err (!%p4339_p7)
}
   0xf   :  { %s4346_s25 = smov 128   ;;  %s4347_s26 = smov 8  }
  0x10   :  { %25 = dma.hbm_to_vmem [thread:$0]  %s5894_s2, 7168, %s20_s16, [#allocation3], %s4346_s25, %s4346_s25, %s4347_s26  }
  0x11   :  { %4343 = dma.done.wait [#allocation3], 7168  }
  0x12   :  { %4344 = vsyncadd [#allocation3], 4294960128  ;;  %v5901_v0 = vmov 0   ;;  %v3871_v1 = vld [vmem:[#allocation2 + $0x4] ss:$8 sps:$4 sm:$0xff]   ;;  %vm113_vm0 = vcmask 261120   ;;  %v83_v32 = vlaneseq }
  0x13   :  { %291 = vmatprep.mubr.bf16.mxu1 %v5901_v0  ;;  %v3873_v2 = vld [vmem:[#allocation2] ss:$8 sps:$4 sm:$0xff]   ;;  %259 = vmatprep.subr.bf16.mxu1 %v3871_v1  ;;  %v3874_v3 = vld [vmem:[#allocation2 + $0x14] ss:$8 sps:$4 sm:$0xff]   ;;  %v3876_v5 = vld [vmem:[#allocation2 + $0x10] ss:$8 sps:$4 sm:$0xff]  }
  0x14   :  { %v34_v4 = vld [vmem:[%s5892_s0] sm:$0xff]  ;;  %260 = vmatpush1.bf16.msra.mxu1 %v3873_v2  ;;  %v35_v6 = vld [vmem:[%s5892_s0 + $0x8] sm:$0xff]  ;;  %v36_v9 = vld [vmem:[%s5892_s0 + $0x10] sm:$0xff]  ;;  %v5897_v31 = vmov 2   ;;  %v4463_v33 = vand.u32 127, %v83_v32  ;;  %v4467_v34 = vshrl.u32 %v83_v32, 7 }
  0x15   :  { %261 = vmatprep.subr.bf16.mxu1 %v3874_v3  ;;  %v85_v7 = vpack.c.bf16 %v35_v6, %v34_v4  ;;  %v3877_v8 = vld [vmem:[#allocation2 + $0x1a0] ss:$8 sps:$4 sm:$0xff]   ;;  %v37_v10 = vld [vmem:[%s5892_s0 + $0x18] sm:$0xff]  ;;  %v40_v15 = vld [vmem:[%s5892_s0 + $0x30] sm:$0xff]  ;;  %3806 = vset.pattern.permute.xlu1 %v5897_v31  ;;  %v5899_v51 = vmov 3  }
  0x16   :  { %3724 = vmatprep.subr.bf16.mxu0 %v3877_v8  ;;  %v86_v11 = vpack.c.bf16 %v37_v10, %v36_v9  ;;  %v38_v12 = vld [vmem:[%s5892_s0 + $0x20] sm:$0xff]  ;;  %v39_v13 = vld [vmem:[%s5892_s0 + $0x28] sm:$0xff]  ;;  %v41_v16 = vld [vmem:[%s5892_s0 + $0x38] sm:$0xff]  ;;  %3807 = vset.pattern.permute.xlu0 %v5897_v31  ;;  %vm413_vm1 = vcmp.lt.s32.totalorder %v4463_v33, 64  ;;  %vm432_vm2 = vcmp.ge.s32.totalorder %v4463_v33, 64  ;;  %v4473_v35 = vsub.s32 0, %v4467_v34 }
  0x17   :  { %3728 = vmatprep.mubr.msk.bf16.mxu0 %vm113_vm0, %v85_v7  ;;  %3725 = vmatpush3.bf16.msra.mxu0 %v3877_v8  ;;  %v87_v14 = vpack.c.bf16 %v39_v13, %v38_v12  ;;  %v88_v17 = vpack.c.bf16 %v41_v16, %v40_v15  ;;  %v42_v18 = vld [vmem:[%s5892_s0 + $0x40] sm:$0xff]  ;;  %v43_v19 = vld [vmem:[%s5892_s0 + $0x48] sm:$0xff]  ;;  %v44_v21 = vld [vmem:[%s5892_s0 + $0x50] sm:$0xff]  ;;  %vm2477_vm7 = vcmp.ge.s32.totalorder %v4463_v33, 32  ;;  %vm2458_vm8 = vcmp.lt.s32.totalorder %v4463_v33, 32 }
  0x18   :  { %262 = vmatpush1.bf16.msra.mxu1 %v3876_v5  ;;  %v89_v20 = vpack.c.bf16 %v43_v19, %v42_v18  ;;  %v45_v22 = vld [vmem:[%s5892_s0 + $0x58] sm:$0xff]  ;;  %v46_v24 = vld [vmem:[%s5892_s0 + $0x60] sm:$0xff]  ;;  %v47_v25 = vld [vmem:[%s5892_s0 + $0x68] sm:$0xff] }
  0x19   :  { %v90_v23 = vpack.c.bf16 %v45_v22, %v44_v21  ;;  %v91_v26 = vpack.c.bf16 %v47_v25, %v46_v24  ;;  %v48_v27 = vld [vmem:[%s5892_s0 + $0x70] sm:$0xff]  ;;  %v49_v28 = vld [vmem:[%s5892_s0 + $0x78] sm:$0xff]  ;;  %vm417_vm3 = vmpackc.low %vm413_vm1, %vm413_vm1 }
  0x1a   :  { %v92_v29 = vpack.c.bf16 %v49_v28, %v48_v27  ;;  %v3878_v30 = vld [vmem:[#allocation2 + $0x1b0] ss:$8 sps:$4 sm:$0xff]   ;;  %vm437_vm4 = vmpackc.low %vm432_vm2, %vm432_vm2  ;;  %v418_v36 = vsel %vm417_vm3, 65537, %v5901_v0 }
  0x1b   :  { %3419 = vmatmul.mubr.msk.bf16.vlgmr.msra.gmra.mrb[0].mxu1 %vm113_vm0, %v85_v7  ;;  %3726 = vmatprep.subr.bf16.mxu0 %v3878_v30  ;;  %v438_v37 = vsel %vm437_vm4, 65537, %v5901_v0  ;;  %v422_v38 = vrot.slane %v418_v36, %v4473_v35  ;;  %vm2478_vm9 = vmand %vm2477_vm7, %vm413_vm1 }
  0x1c   :  { %301 = vmatprep.mubr.bf16.mxu1 %v5901_v0  ;;  %3727 = vmatpush3.bf16.msra.mxu0 %v3878_v30  ;;  %v442_v39 = vrot.slane %v438_v37, %v4473_v35  ;;  %vm2462_vm10 = vmpackc.low %vm2458_vm8, %vm2458_vm8 }
  0x1d   :  { %vm4482_vm5 = vcmp.ne.s16.totalorder %v422_v38, 0  ;;  %vm2481_vm11 = vmpackc.low %vm2478_vm9, %vm2478_vm9 }
  0x1e   :  { %vm4486_vm6 = vcmp.ne.s16.totalorder %v442_v39, 0 }
  0x1f   :  { %3729 = vmatmul.mubr.msk.bf16.vlgmr.msra.gmra.mrb[0].mxu0 %vm113_vm0, %v86_v11 }
  0x20   :  { %3732 = vmatprep.mubr.msk.bf16.mxu0 %vm113_vm0, %v87_v14 }
  0x23   :  { %3420 = vmatmul.mubr.msk.bf16.gmra.mrb[4].mxu1 %vm113_vm0, %v86_v11 }
  0x24   :  { %311 = vmatprep.mubr.bf16.mxu1 %v5901_v0 }
  0x27   :  { %3733 = vmatmul.mubr.msk.bf16.gmra.mrb[4].mxu0 %vm113_vm0, %v88_v17 }
  0x28   :  { %3736 = vmatprep.mubr.msk.bf16.mxu0 %vm113_vm0, %v89_v20 }
  0x2b   :  { %3421 = vmatmul.mubr.msk.bf16.gmra.mrb[8].mxu1 %vm113_vm0, %v87_v14 }
  0x2c   :  { %321 = vmatprep.mubr.bf16.mxu1 %v5901_v0 }
  0x2f   :  { %3737 = vmatmul.mubr.msk.bf16.gmra.mrb[8].mxu0 %vm113_vm0, %v90_v23 }
  0x30   :  { %3740 = vmatprep.mubr.msk.bf16.mxu0 %vm113_vm0, %v91_v26 }
  0x33   :  { %3422 = vmatmul.mubr.msk.bf16.gmra.mrb[12].mxu1 %vm113_vm0, %v88_v17 }
  0x34   :  { %331 = vmatprep.mubr.bf16.mxu1 %v5901_v0 }
  0x37   :  { %3741 = vmatmul.mubr.msk.bf16.gmra.mrb[12].mxu0 %vm113_vm0, %v92_v29 }
  0x3b   :  { %3423 = vmatmul.mubr.msk.bf16.gmra.mrb[16].mxu1 %vm113_vm0, %v89_v20 }
  0x3c   :  { %341 = vmatprep.mubr.bf16.mxu1 %v5901_v0 }
  0x43   :  { %3424 = vmatmul.mubr.msk.bf16.gmra.mrb[20].mxu1 %vm113_vm0, %v90_v23 }
  0x44   :  { %351 = vmatprep.mubr.bf16.mxu1 %v5901_v0 }
  0x4b   :  { %3425 = vmatmul.mubr.msk.bf16.gmra.mrb[24].mxu1 %vm113_vm0, %v91_v26 }
  0x4c   :  { %361 = vmatprep.mubr.bf16.mxu1 %v5901_v0 }
  0x53   :  { %3426 = vmatmul.mubr.msk.bf16.gmra.mrb[28].mxu1 %vm113_vm0, %v92_v29 }
  0x54   :  { %1327 = vmatprep.mubr.bf16.mxu1 %v5901_v0 }
  0xee   :  { %v293_v40 = vpop.f32.mrb[0].mxu1 }
  0xef   :  { %v4479_v41 = vpop.f32.mrb[1].mxu1 }
  0xf0   :  { %454 = vperm.xlu1 %3806, %v4479_v41   ;;  %v297_v42 = vpop.f32.mrb[2].mxu1 }
  0xf1   :  { %v404_v45 = vpack.c.bf16 %v297_v42, %v293_v40  ;;  %v4490_v46 = vpop.f32.mrb[3].mxu1 }
  0xf3   :  { %v424_v47 = vsel %vm4482_vm5, %v404_v45, 0  ;;  %3776 = vmatprep.subr.msk.bf16.mxu0 %vm4486_vm6, %v404_v45 }
  0xf4   :  { %459 = vperm.xlu1 %3806, %v4490_v46   ;;  %3517 = vmatpush3.bf16.msra.mxu0 %v424_v47 }
  0xf6   :  { %v303_v48 = vpop.f32.mrb[4].mxu1 }
  0xf7   :  { %v4497_v49 = vpop.f32.mrb[5].mxu1 }
  0xf8   :  { %464 = vperm.xlu0 %3807, %v4497_v49   ;;  %v307_v50 = vpop.f32.mrb[6].mxu1  ;;  %3808 = vset.pattern.permute.xlu1 %v5899_v51 }
  0xf9   :  { %v405_v52 = vpack.c.bf16 %v307_v50, %v303_v48  ;;  %v4501_v53 = vpop.f32.mrb[7].mxu1 }
  0xfa   :  { %749 = vperm.xlu1 %3808, %v4501_v53  }
  0xfb   :  { %v425_v54 = vsel %vm4482_vm5, %v405_v52, 0  ;;  %3777 = vmatprep.subr.msk.bf16.mxu0 %vm4486_vm6, %v405_v52 }
  0xfc   :  { %3519 = vmatpush3.bf16.msra.mxu0 %v425_v54 }
  0xfe   :  { %3809 = vset.pattern.permute.xlu1 %v5897_v31  ;;  %v313_v55 = vpop.f32.mrb[8].mxu1 }
  0xff   :  { %469 = vperm.xlu1 %3809, %v4501_v53   ;;  %v4510_v56 = vpop.f32.mrb[9].mxu1 }
 0x100   :  { %v317_v57 = vpop.f32.mrb[10].mxu1 }
 0x101   :  { %v406_v58 = vpack.c.bf16 %v317_v57, %v313_v55  ;;  %v4512_v59 = vpop.f32.mrb[11].mxu1 }
 0x103   :  { %v426_v60 = vsel %vm4482_vm5, %v406_v58, 0  ;;  %3810 = vset.pattern.permute.xlu1 %v5899_v51  ;;  %3778 = vmatprep.subr.msk.bf16.mxu0 %vm4486_vm6, %v406_v58  ;;  %v4596_v58 = vsub.s32 1, %v4467_v34 }
 0x104   :  { %753 = vperm.xlu1 %3810, %v4510_v56   ;;  %3521 = vmatpush3.bf16.msra.mxu0 %v426_v60 }
 0x106   :  { %v323_v61 = vpop.f32.mrb[12].mxu1 }
 0x107   :  { %v4520_v62 = vpop.f32.mrb[13].mxu1 }
 0x108   :  { %3811 = vset.pattern.permute.xlu1 %v5897_v31  ;;  %484 = vperm.xlu0 %3807, %v4520_v62   ;;  %v327_v63 = vpop.f32.mrb[14].mxu1 }
 0x109   :  { %474 = vperm.xlu1 %3811, %v4510_v56   ;;  %v407_v1 = vpack.c.bf16 %v327_v63, %v323_v61  ;;  %v4525_v2 = vpop.f32.mrb[15].mxu1  ;;  %v3468_v63 = vld [vmem:[%s5893_s1] sm:$0xff]  }
 0x10b   :  { %v427_v3 = vsel %vm4482_vm5, %v407_v1, 0  ;;  %3779 = vmatprep.subr.msk.bf16.mxu0 %vm4486_vm6, %v407_v1 }
 0x10c   :  { %3523 = vmatpush3.bf16.msra.mxu0 %v427_v3 }
 0x10d   :  { %479 = vperm.xlu1 %3811, %v4512_v59  }
 0x10e   :  { %v333_v4 = vpop.f32.mrb[16].mxu1 }
 0x10f   :  { %v4532_v5 = vpop.f32.mrb[17].mxu1 }
 0x110   :  { %494 = vperm.xlu0 %3807, %v4532_v5   ;;  %v337_v6 = vpop.f32.mrb[18].mxu1 }
 0x111   :  { %3812 = vset.pattern.permute.xlu1 %v5899_v51  ;;  %v408_v7 = vpack.c.bf16 %v337_v6, %v333_v4  ;;  %v339_v8 = vpop.f32.mrb[19].mxu1  ;;  %v4615_v6 = vunpack.c.h.bf16 %v3468_v63 }
 0x112   :  { %765 = vperm.xlu1 %3812, %v4525_v2  }
 0x113   :  { %v428_v9 = vsel %vm4482_vm5, %v408_v7, 0  ;;  %3780 = vmatprep.subr.msk.bf16.mxu0 %vm4486_vm6, %v408_v7  ;;  %v3499_v7 = vld [vmem:[%s5893_s1 + $0x8] sm:$0xff]  }
 0x114   :  { %499 = vperm.xlu0 %3807, %v339_v8   ;;  %3525 = vmatpush3.bf16.msra.mxu0 %v428_v9 }
 0x116   :  { %3813 = vset.pattern.permute.xlu1 %v5897_v31  ;;  %v343_v10 = vpop.f32.mrb[20].mxu1 }
 0x117   :  { %489 = vperm.xlu1 %3813, %v4525_v2   ;;  %v345_v11 = vpop.f32.mrb[21].mxu1 }
 0x118   :  { %504 = vperm.xlu0 %3807, %v345_v11   ;;  %v347_v12 = vpop.f32.mrb[22].mxu1 }
 0x119   :  { %v409_v13 = vpack.c.bf16 %v347_v12, %v343_v10  ;;  %v349_v14 = vpop.f32.mrb[23].mxu1 }
 0x11b   :  { %v429_v15 = vsel %vm4482_vm5, %v409_v13, 0  ;;  %3781 = vmatprep.subr.msk.bf16.mxu0 %vm4486_vm6, %v409_v13 }
 0x11c   :  { %509 = vperm.xlu0 %3807, %v349_v14   ;;  %3527 = vmatpush3.bf16.msra.mxu0 %v429_v15 }
 0x11e   :  { %v353_v16 = vpop.f32.mrb[24].mxu1 }
 0x11f   :  { %v355_v17 = vpop.f32.mrb[25].mxu1 }
 0x120   :  { %514 = vperm.xlu0 %3807, %v355_v17   ;;  %v357_v18 = vpop.f32.mrb[26].mxu1 }
 0x121   :  { %v410_v19 = vpack.c.bf16 %v357_v18, %v353_v16  ;;  %v359_v20 = vpop.f32.mrb[27].mxu1 }
 0x123   :  { %v430_v21 = vsel %vm4482_vm5, %v410_v19, 0  ;;  %3782 = vmatprep.subr.msk.bf16.mxu0 %vm4486_vm6, %v410_v19 }
 0x124   :  { %519 = vperm.xlu0 %3807, %v359_v20   ;;  %3529 = vmatpush3.bf16.msra.mxu0 %v430_v21 }
 0x126   :  { %v363_v22 = vpop.f32.mrb[28].mxu1 }
 0x127   :  { %v365_v23 = vpop.f32.mrb[29].mxu1 }
 0x128   :  { %524 = vperm.xlu0 %3807, %v365_v23   ;;  %v367_v24 = vpop.f32.mrb[30].mxu1 }
 0x129   :  { %v411_v25 = vpack.c.bf16 %v367_v24, %v363_v22  ;;  %v369_v26 = vpop.f32.mrb[31].mxu1 }
 0x12b   :  { %v431_v27 = vsel %vm4482_vm5, %v411_v25, 0  ;;  %3783 = vmatprep.subr.msk.bf16.mxu0 %vm4486_vm6, %v411_v25 }
 0x12c   :  { %529 = vperm.xlu0 %3807, %v369_v26   ;;  %3531 = vmatpush3.bf16.msra.mxu0 %v431_v27 }
 0x130   :  { %3814 = vset.pattern.permute.xlu0 %v5899_v51 }
 0x131   :  { %737 = vperm.xlu0 %3814, %v4479_v41  }
 0x135   :  { %741 = vperm.xlu0 %3814, %v4490_v46  }
 0x139   :  { %745 = vperm.xlu0 %3814, %v4497_v49  }
 0x13d   :  { %757 = vperm.xlu0 %3814, %v4512_v59  }
 0x140   :  { %372 = vxpose.xlu1.b32.start [1/16] (narrow) %v4479_v41, 8 }
 0x141   :  { %761 = vperm.xlu0 %3814, %v4520_v62  }
 0x144   :  { %373 = vxpose.xlu1.b32.cont [2/16] (narrow) %v4490_v46, 8 }
 0x145   :  { %769 = vperm.xlu0 %3814, %v4532_v5  }
 0x148   :  { %374 = vxpose.xlu1.b32.cont [3/16] (narrow) %v4497_v49, 8 }
 0x149   :  { %773 = vperm.xlu0 %3814, %v339_v8  }
 0x14c   :  { %375 = vxpose.xlu1.b32.cont [4/16] (narrow) %v4501_v53, 8 }
 0x14d   :  { %777 = vperm.xlu0 %3814, %v345_v11  }
 0x150   :  { %376 = vxpose.xlu1.b32.cont [5/16] (narrow) %v4510_v56, 8 }
 0x151   :  { %781 = vperm.xlu0 %3814, %v349_v14  }
 0x154   :  { %377 = vxpose.xlu1.b32.cont [6/16] (narrow) %v4512_v59, 8 }
 0x155   :  { %785 = vperm.xlu0 %3814, %v355_v17  }
 0x158   :  { %378 = vxpose.xlu1.b32.cont [7/16] (narrow) %v4520_v62, 8 }
 0x159   :  { %789 = vperm.xlu0 %3814, %v359_v20  }
 0x15c   :  { %379 = vxpose.xlu1.b32.cont [8/16] (narrow) %v4525_v2, 8 }
 0x15d   :  { %793 = vperm.xlu0 %3814, %v365_v23  }
 0x160   :  { %380 = vxpose.xlu1.b32.cont [9/16] (narrow) %v4532_v5, 8 }
 0x161   :  { %797 = vperm.xlu0 %3814, %v369_v26  }
 0x164   :  { %381 = vxpose.xlu1.b32.cont [10/16] (narrow) %v339_v8, 8 }
 0x168   :  { %382 = vxpose.xlu1.b32.cont [11/16] (narrow) %v345_v11, 8  ;;  %v4622_v11 = vunpack.c.l.bf16 %v3468_v63  ;;  %v4652_v63 = vunpack.c.l.bf16 %v3499_v7 }
 0x16c   :  { %383 = vxpose.xlu1.b32.cont [12/16] (narrow) %v349_v14, 8 }
 0x16f   :  { %v455_v30 = vpop.permute.xlu1 %454 }
 0x170   :  { %384 = vxpose.xlu1.b32.cont [13/16] (narrow) %v355_v17, 8  ;;  %v4624_v17 = vunpack.c.h.bf16 %v3499_v7 }
 0x173   :  { %v460_v37 = vpop.permute.xlu1 %459 }
 0x174   :  { %385 = vxpose.xlu1.b32.cont [14/16] (narrow) %v359_v20, 8 }
 0x177   :  { %v4571_v28 = vpop.permute.xlu0 %464 }
 0x178   :  { %386 = vxpose.xlu1.b32.cont [15/16] (narrow) %v365_v23, 8 }
 0x179   :  { %v750_v39 = vpop.permute.xlu1 %749 }
 0x17c   :  { %387 = vxpose.xlu1.b32.end [16/16] (narrow) %v369_v26, 8 }
 0x17e   :  { %v470_v41 = vpop.permute.xlu1 %469 }
 0x183   :  { %v754_v46 = vpop.permute.xlu1 %753 }
 0x187   :  { %v4573_v29 = vpop.permute.xlu0 %484 }
 0x188   :  { %v4589_v48 = vpop.permute.xlu1 %474 }
 0x18c   :  { %v480_v50 = vpop.permute.xlu1 %479 }
 0x18f   :  { %v4575_v32 = vpop.permute.xlu0 %494 }
 0x191   :  { %v766_v54 = vpop.permute.xlu1 %765 }
 0x193   :  { %v4577_v36 = vpop.permute.xlu0 %499 }
 0x196   :  { %v4593_v56 = vpop.permute.xlu1 %489 }
 0x197   :  { %v4579_v38 = vpop.permute.xlu0 %504 }
 0x19b   :  { %v4581_v40 = vpop.permute.xlu0 %509 }
 0x19f   :  { %v4583_v42 = vpop.permute.xlu0 %514 }
 0x1a3   :  { %v4585_v45 = vpop.permute.xlu0 %519 }
 0x1a7   :  { %v4587_v47 = vpop.permute.xlu0 %524 }
 0x1ab   :  { %v4591_v49 = vpop.permute.xlu0 %529 }
 0x1b0   :  { %v738_v52 = vpop.permute.xlu0 %737 }
 0x1b4   :  { %v742_v53 = vpop.permute.xlu0 %741 }
 0x1b8   :  { %v746_v55 = vpop.permute.xlu0 %745 }
 0x1bc   :  { %v758_v57 = vpop.permute.xlu0 %757 }
 0x1c0   :  { %v4598_v59 = vpop.permute.xlu0 %761  ;;  %v388_v60 = vpop.trf.xlu1 }
 0x1c1   :  { %v4601_v61 = vrot.slane %v388_v60, %v4473_v35  ;;  %v4604_v62 = vrot.slane %v388_v60, %v4596_v58 }
 0x1c3   :  { %v805_v1 = vadd.f32 %v4604_v62, %v742_v53  ;;  %v804_v2 = vadd.f32 %v4604_v62, %v738_v52  ;;  %v807_v3 = vadd.f32 %v4604_v62, %v750_v39  ;;  %v536_v4 = vadd.f32 %v4601_v61, %v455_v30 }
 0x1c4   :  { %v4613_v5 = vpop.permute.xlu0 %769  ;;  %v539_v8 = vadd.f32 %v4601_v61, %v470_v41  ;;  %v537_v9 = vadd.f32 %v4601_v61, %v460_v37  ;;  %v809_v20 = vadd.f32 %v4604_v62, %v758_v57  ;;  %v806_v21 = vadd.f32 %v4604_v62, %v746_v55  ;;  %v3500_v37 = vld [vmem:[%s5893_s1 + $0x10] sm:$0xff]  }
 0x1c5   :  { %v821_v10 = vmul.f32 0.2, %v805_v1  ;;  %v820_v12 = vmul.f32 0.2, %v804_v2  ;;  %v823_v13 = vmul.f32 0.2, %v807_v3  ;;  %v541_v41 = vadd.f32 %v4601_v61, %v480_v50 }
 0x1c6   :  { %v552_v14 = vmul.f32 0.2, %v536_v4  ;;  %v555_v18 = vmul.f32 0.2, %v539_v8  ;;  %v553_v19 = vmul.f32 0.2, %v537_v9  ;;  %v538_v57 = vadd.f32 %v4601_v61, %v4571_v28 }
 0x1c7   :  { %v837_v15 = vmax.f32 %v805_v1, %v821_v10  ;;  %v836_v16 = vmax.f32 %v804_v2, %v820_v12  ;;  %v839_v24 = vmax.f32 %v807_v3, %v823_v13  ;;  %v825_v39 = vmul.f32 0.2, %v809_v20  ;;  %v3501_v12 = vld [vmem:[%s5893_s1 + $0x18] sm:$0xff]  }
 0x1c8   :  { %v568_v25 = vmax.f32 %v536_v4, %v552_v14  ;;  %v774_v26 = vpop.permute.xlu0 %773  ;;  %v571_v27 = vmax.f32 %v539_v8, %v555_v18  ;;  %v569_v30 = vmax.f32 %v537_v9, %v553_v19  ;;  %v822_v55 = vmul.f32 0.2, %v806_v21 }
 0x1c9   :  { %v4629_v22 = vadd.f32 %v4615_v6, %v837_v15  ;;  %v4632_v23 = vadd.f32 %v4622_v11, %v836_v16  ;;  %v4641_v52 = vadd.f32 %v4624_v17, %v839_v24  ;;  %v4650_v60 = vunpack.c.h.bf16 %v3500_v37 }
 0x1ca   :  { %v4644_v53 = vadd.f32 %v4622_v11, %v568_v25  ;;  %v4657_v50 = vadd.f32 %v4624_v17, %v571_v27  ;;  %v841_v2 = vmax.f32 %v809_v20, %v825_v39  ;;  %v811_v3 = vadd.f32 %v4604_v62, %v766_v54 }
 0x1cb   :  { %870 = vmax.xlane.f32.xlu1 %v4629_v22  ;;  %868 = vmax.xlane.f32.xlu0 %v4632_v23  ;;  %v808_v4 = vadd.f32 %v4604_v62, %v754_v46  ;;  %v4662_v28 = vadd.f32 %v4615_v6, %v569_v30  ;;  %v838_v8 = vmax.f32 %v806_v21, %v822_v55  ;;  %v557_v9 = vmul.f32 0.2, %v541_v41 }
 0x1cc   :  { %v4654_v1 = vpop.permute.xlu0 %777  ;;  %v554_v10 = vmul.f32 0.2, %v538_v57  ;;  %v4667_v7 = vadd.f32 %v4650_v60, %v841_v2  ;;  %v827_v54 = vmul.f32 0.2, %v811_v3  ;;  %v543_v46 = vadd.f32 %v4601_v61, %v4593_v56 }
 0x1cd   :  { %v824_v13 = vmul.f32 0.2, %v808_v4  ;;  %v4675_v14 = vadd.f32 %v4652_v63, %v838_v8  ;;  %v573_v15 = vmax.f32 %v541_v41, %v557_v9  ;;  %v540_v18 = vadd.f32 %v4601_v61, %v4589_v48  ;;  %v3502_v9 = vld [vmem:[%s5893_s1 + $0x20] sm:$0xff]  }
 0x1ce   :  { %v570_v16 = vmax.f32 %v538_v57, %v554_v10  ;;  %v4681_v20 = vunpack.c.h.bf16 %v3501_v12  ;;  %v4683_v21 = vunpack.c.l.bf16 %v3500_v37  ;;  %v813_v24 = vadd.f32 %v4604_v62, %v774_v26 }
 0x1cf   :  { %874 = vmax.xlane.f32.xlu1 %v4641_v52  ;;  %600 = vmax.xlane.f32.xlu0 %v4644_v53  ;;  %v843_v56 = vmax.f32 %v811_v3, %v827_v54  ;;  %v840_v25 = vmax.f32 %v808_v4, %v824_v13  ;;  %v559_v27 = vmul.f32 0.2, %v543_v46  ;;  %v4687_v30 = vadd.f32 %v4650_v60, %v573_v15 }
 0x1d0   :  { %v782_v19 = vpop.permute.xlu0 %781  ;;  %v4690_v39 = vadd.f32 %v4652_v63, %v570_v16  ;;  %v556_v48 = vmul.f32 0.2, %v540_v18  ;;  %v810_v41 = vadd.f32 %v4604_v62, %v4598_v59  ;;  %v829_v37 = vmul.f32 0.2, %v813_v24 }
 0x1d1   :  { %v4697_v26 = vadd.f32 %v4681_v20, %v843_v56  ;;  %v4700_v57 = vadd.f32 %v4683_v21, %v840_v25  ;;  %v575_v2 = vmax.f32 %v543_v46, %v559_v27  ;;  %v545_v8 = vadd.f32 %v4601_v61, %v4577_v36 }
 0x1d2   :  { %v572_v3 = vmax.f32 %v540_v18, %v556_v48  ;;  %v826_v4 = vmul.f32 0.2, %v810_v41  ;;  %v542_v59 = vadd.f32 %v4601_v61, %v4573_v29  ;;  %v4711_v10 = vunpack.c.l.bf16 %v3501_v12 }
 0x1d3   :  { %606 = vmax.xlane.f32.xlu1 %v4657_v50  ;;  %602 = vmax.xlane.f32.xlu0 %v4662_v28  ;;  %v812_v54 = vadd.f32 %v4604_v62, %v4613_v5  ;;  %v815_v13 = vadd.f32 %v4604_v62, %v782_v19  ;;  %v4717_v36 = vadd.f32 %v4681_v20, %v575_v2  ;;  %v561_v16 = vmul.f32 0.2, %v545_v8 }
 0x1d4   :  { %v786_v55 = vpop.permute.xlu0 %785  ;;  %5924 = vst [vmem:[#allocation5_spill] sm:$0xff] %v4711_v10  ;;  %v845_v46 = vmax.f32 %v813_v24, %v829_v37  ;;  %v4720_v29 = vadd.f32 %v4683_v21, %v572_v3  ;;  %v842_v15 = vmax.f32 %v810_v41, %v826_v4  ;;  %v558_v18 = vmul.f32 0.2, %v542_v59 }
 0x1d5   :  { %v4722_v25 = vunpack.c.h.bf16 %v3502_v9  ;;  %v828_v5 = vmul.f32 0.2, %v812_v54  ;;  %v831_v12 = vmul.f32 0.2, %v815_v13  ;;  %v547_v24 = vadd.f32 %v4601_v61, %v4581_v40  ;;  %v3503_v40 = vld [vmem:[%s5893_s1 + $0x28] sm:$0xff]  }
 0x1d6   :  { %v4732_v27 = vadd.f32 %v4711_v10, %v842_v15  ;;  %v577_v48 = vmax.f32 %v545_v8, %v561_v16  ;;  %v574_v41 = vmax.f32 %v542_v59, %v558_v18  ;;  %v544_v37 = vadd.f32 %v4601_v61, %v4575_v32 }
 0x1d7   :  { %878 = vmax.xlane.f32.xlu1 %v4667_v7  ;;  %872 = vmax.xlane.f32.xlu0 %v4675_v14  ;;  %v4727_v19 = vadd.f32 %v4722_v25, %v845_v46  ;;  %v814_v2 = vadd.f32 %v4604_v62, %v4654_v1  ;;  %v847_v4 = vmax.f32 %v815_v13, %v831_v12  ;;  %v563_v15 = vmul.f32 0.2, %v547_v24 }
 0x1d8   :  { %v790_v56 = vpop.permute.xlu0 %789  ;;  %v844_v46 = vmax.f32 %v812_v54, %v828_v5  ;;  %v4745_v59 = vadd.f32 %v4722_v25, %v577_v48  ;;  %v4748_v32 = vadd.f32 %v4711_v10, %v574_v41  ;;  %v560_v16 = vmul.f32 0.2, %v544_v37 }
 0x1d9   :  { %v817_v8 = vadd.f32 %v4604_v62, %v790_v56  ;;  %v4750_v18 = vunpack.c.l.bf16 %v3502_v9  ;;  %v4754_v1 = vunpack.c.h.bf16 %v3503_v40  ;;  %v830_v13 = vmul.f32 0.2, %v814_v2 }
 0x1da   :  { %v579_v56 = vmax.f32 %v547_v24, %v563_v15  ;;  %v549_v5 = vadd.f32 %v4601_v61, %v4585_v45  ;;  %v576_v9 = vmax.f32 %v544_v37, %v560_v16  ;;  %v546_v41 = vadd.f32 %v4601_v61, %v4579_v38  ;;  %v3504_v45 = vld [vmem:[%s5893_s1 + $0x30] sm:$0xff]  }
 0x1db   :  { %610 = vmax.xlane.f32.xlu1 %v4687_v30  ;;  %604 = vmax.xlane.f32.xlu0 %v4690_v39  ;;  %5925 = vst [vmem:[#allocation6_spill] sm:$0xff] %v4750_v18  ;;  %v4757_v54 = vadd.f32 %v4750_v18, %v844_v46  ;;  %v833_v12 = vmul.f32 0.2, %v817_v8  ;;  %v4762_v48 = vadd.f32 %v4754_v1, %v847_v4  ;;  %v4779_v0 = vunpack.c.l.bf16 %v3503_v40 }
 0x1dc   :  { %v794_v3 = vpop.permute.xlu0 %793  ;;  %v816_v46 = vadd.f32 %v4604_v62, %v786_v55  ;;  %v4770_v24 = vadd.f32 %v4754_v1, %v579_v56  ;;  %v846_v4 = vmax.f32 %v814_v2, %v830_v13  ;;  %v565_v15 = vmul.f32 0.2, %v549_v5 }
 0x1dd   :  { %v4777_v38 = vadd.f32 %v4750_v18, %v576_v9  ;;  %v849_v16 = vmax.f32 %v817_v8, %v833_v12  ;;  %v562_v51 = vmul.f32 0.2, %v546_v41  ;;  %5926 = vst [vmem:[#allocation7_spill] sm:$0xff] %v4779_v0  ;;  %v4783_v55 = vunpack.c.h.bf16 %v3504_v45 }
 0x1de   :  { %v832_v56 = vmul.f32 0.2, %v816_v46  ;;  %v4786_v10 = vadd.f32 %v4779_v0, %v846_v4  ;;  %v548_v2 = vadd.f32 %v4601_v61, %v4583_v42  ;;  %v581_v13 = vmax.f32 %v549_v5, %v565_v15  ;;  %v3505_v4 = vld [vmem:[%s5893_s1 + $0x38] sm:$0xff]  }
 0x1df   :  { %882 = vmax.xlane.f32.xlu1 %v4697_v26  ;;  %876 = vmax.xlane.f32.xlu0 %v4700_v57  ;;  %v4793_v40 = vadd.f32 %v4783_v55, %v849_v16  ;;  %v578_v12 = vmax.f32 %v546_v41, %v562_v51  ;;  %v818_v9 = vadd.f32 %v4604_v62, %v794_v3  ;;  %v4807_v41 = vunpack.c.l.bf16 %v3504_v45 }
 0x1e0   :  { %v798_v31 = vpop.permute.xlu0 %797  ;;  %v4802_v42 = vadd.f32 %v4783_v55, %v581_v13  ;;  %v564_v51 = vmul.f32 0.2, %v548_v2 }
 0x1e1   :  { %v819_v37 = vadd.f32 %v4604_v62, %v798_v31  ;;  %v551_v31 = vadd.f32 %v4601_v61, %v4591_v49  ;;  %v848_v49 = vmax.f32 %v816_v46, %v832_v56  ;;  %v4805_v16 = vadd.f32 %v4779_v0, %v578_v12  ;;  %5927 = vst [vmem:[#allocation8_spill] sm:$0xff] %v4807_v41 }
 0x1e2   :  { %v4811_v62 = vunpack.c.h.bf16 %v3505_v4  ;;  %v550_v46 = vadd.f32 %v4601_v61, %v4587_v47  ;;  %v834_v15 = vmul.f32 0.2, %v818_v9  ;;  %v4831_v47 = vunpack.c.l.bf16 %v3505_v4 }
 0x1e3   :  { %614 = vmax.xlane.f32.xlu1 %v4717_v36  ;;  %608 = vmax.xlane.f32.xlu0 %v4720_v29  ;;  %v835_v8 = vmul.f32 0.2, %v819_v37  ;;  %v567_v18 = vmul.f32 0.2, %v551_v31  ;;  %v4814_v3 = vadd.f32 %v4807_v41, %v848_v49 }
 0x1e4   :  { %5928 = vst [vmem:[#allocation9_spill] sm:$0xff] %v4811_v62  ;;  %v850_v12 = vmax.f32 %v818_v9, %v834_v15  ;;  %v566_v49 = vmul.f32 0.2, %v550_v46  ;;  %5929 = vst [vmem:[#allocation10_spill] sm:$0xff] %v4831_v47 }
 0x1e5   :  { %v851_v5 = vmax.f32 %v819_v37, %v835_v8  ;;  %v583_v37 = vmax.f32 %v551_v31, %v567_v18  ;;  %v580_v8 = vmax.f32 %v548_v2, %v564_v51 }
 0x1e6   :  { %v4834_v61 = vadd.f32 %v4831_v47, %v850_v12  ;;  %v582_v18 = vmax.f32 %v550_v46, %v566_v49 }
 0x1e7   :  { %886 = vmax.xlane.f32.xlu1 %v4727_v19  ;;  %880 = vmax.xlane.f32.xlu0 %v4732_v27  ;;  %v4819_v56 = vadd.f32 %v4811_v62, %v851_v5  ;;  %v4824_v45 = vadd.f32 %v4811_v62, %v583_v37  ;;  %v4827_v13 = vadd.f32 %v4807_v41, %v580_v8 }
 0x1e8   :  { %v4838_v31 = vadd.f32 %v4831_v47, %v582_v18 }
 0x1eb   :  { %618 = vmax.xlane.f32.xlu1 %v4745_v59  ;;  %612 = vmax.xlane.f32.xlu0 %v4748_v32 }
 0x1ef   :  { %890 = vmax.xlane.f32.xlu1 %v4762_v48  ;;  %884 = vmax.xlane.f32.xlu0 %v4757_v54 }
 0x1f3   :  { %622 = vmax.xlane.f32.xlu1 %v4770_v24  ;;  %616 = vmax.xlane.f32.xlu0 %v4777_v38 }
 0x1f7   :  { %894 = vmax.xlane.f32.xlu1 %v4793_v40  ;;  %888 = vmax.xlane.f32.xlu0 %v4786_v10 }
 0x1fb   :  { %626 = vmax.xlane.f32.xlu1 %v4802_v42  ;;  %620 = vmax.xlane.f32.xlu0 %v4805_v16 }
 0x1ff   :  { %898 = vmax.xlane.f32.xlu1 %v4819_v56  ;;  %892 = vmax.xlane.f32.xlu0 %v4814_v3 }
 0x203   :  { %630 = vmax.xlane.f32.xlu1 %v4824_v45  ;;  %624 = vmax.xlane.f32.xlu0 %v4827_v13 }
 0x207   :  { %896 = vmax.xlane.f32.xlu0 %v4834_v61 }
 0x20b   :  { %628 = vmax.xlane.f32.xlu0 %v4838_v31 }
 0x258   :  { %v871_v2 = vpop.xlane.xlu1 %870  ;;  %v869_v9 = vpop.xlane.xlu0 %868 }
 0x259   :  { %v901_v5 = vsub.f32 %v4629_v22, %v871_v2  ;;  %v900_v51 = vsub.f32 %v4632_v23, %v869_v9 }
 0x25b   :  { %v918_v15 = vmul.f32 1.442695, %v901_v5  ;;  %v916_v4 = vmul.f32 1.442695, %v900_v51 }
 0x25c   :  { %v875_v37 = vpop.xlane.xlu1 %874  ;;  %v601_v8 = vpop.xlane.xlu0 %600 }
 0x25d   :  { %3935 = vpow2.f32 %v918_v15  ;;  %v632_v46 = vsub.f32 %v4644_v53, %v601_v8  ;;  %v903_v49 = vsub.f32 %v4641_v52, %v875_v37 }
 0x25e   :  { %3937 = vpow2.f32 %v916_v4 }
 0x25f   :  { %v648_v12 = vmul.f32 1.442695, %v632_v46  ;;  %v922_v22 = vmul.f32 1.442695, %v903_v49 }
 0x260   :  { %v607_v18 = vpop.xlane.xlu1 %606  ;;  %v603_v47 = vpop.xlane.xlu0 %602 }
 0x261   :  { %v633_v62 = vsub.f32 %v4662_v28, %v603_v47  ;;  %3939 = vpow2.f32 %v648_v12  ;;  %v635_v9 = vsub.f32 %v4657_v50, %v607_v18 }
 0x263   :  { %v650_v41 = vmul.f32 1.442695, %v633_v62  ;;  %v654_v37 = vmul.f32 1.442695, %v635_v9 }
 0x264   :  { %v879_v2 = vpop.xlane.xlu1 %878  ;;  %v873_v23 = vpop.xlane.xlu0 %872 }
 0x265   :  { %v902_v5 = vsub.f32 %v4675_v14, %v873_v23  ;;  %3941 = vpow2.f32 %v650_v41  ;;  %v905_v8 = vsub.f32 %v4667_v7, %v879_v2 }
 0x266   :  { %3943 = vpow2.f32 %v922_v22 }
 0x267   :  { %v3936_v51 = vpop.eup %3935  ;;  %v920_v53 = vmul.f32 1.442695, %v902_v5  ;;  %v926_v12 = vmul.f32 1.442695, %v905_v8 }
 0x268   :  { %v3938_v15 = vpop.eup %3937  ;;  %v611_v4 = vpop.xlane.xlu1 %610 }
 0x269   :  { %v605_v52 = vpop.xlane.xlu0 %604  ;;  %v996_v62 = vpack.c.bf16 %v3936_v51, %v3938_v15  ;;  %3945 = vpow2.f32 %v920_v53  ;;  %v637_v50 = vsub.f32 %v4687_v30, %v611_v4 }
 0x26a   :  { %v634_v28 = vsub.f32 %v4690_v39, %v605_v52  ;;  %3947 = vpow2.f32 %v654_v37 }
 0x26b   :  { %1036 = vmatprep.mubr.bf16.mxu0 %v996_v62  ;;  %v3940_v46 = vpop.eup %3939  ;;  %v658_v7 = vmul.f32 1.442695, %v637_v50 }
 0x26c   :  { %v652_v47 = vmul.f32 1.442695, %v634_v28  ;;  %v883_v14 = vpop.xlane.xlu1 %882  ;;  %680 = vadd.xlane.f32.xlu0 %v3940_v46 }
 0x26d   :  { %v877_v41 = vpop.xlane.xlu0 %876  ;;  %v907_v23 = vsub.f32 %v4697_v26, %v883_v14 }
 0x26e   :  { %v904_v49 = vsub.f32 %v4700_v57, %v877_v41  ;;  %3949 = vpow2.f32 %v652_v47 }
 0x26f   :  { %v3942_v22 = vpop.eup %3941  ;;  %3951 = vpow2.f32 %v926_v12  ;;  %v930_v37 = vmul.f32 1.442695, %v907_v23 }
 0x270   :  { %v924_v18 = vmul.f32 1.442695, %v904_v49  ;;  %v615_v2 = vpop.xlane.xlu1 %614  ;;  %948 = vadd.xlane.f32.xlu0 %v3938_v15  ;;  %682 = vadd.xlane.f32.xlu1 %v3942_v22  ;;  %v728_v9 = vpack.c.bf16 %v3942_v22, %v3940_v46  ;;  %v3944_v5 = vpop.eup %3943 }
 0x271   :  { %v609_v39 = vpop.xlane.xlu0 %608  ;;  %v639_v8 = vsub.f32 %v4717_v36, %v615_v2 }
 0x272   :  { %v636_v30 = vsub.f32 %v4720_v29, %v609_v39  ;;  %3953 = vpow2.f32 %v924_v18  ;;  %1037 = vmatmul.mubr.bf16.vlgmr.msra.gmra.mrb[16].mxu0 %v728_v9 }
 0x273   :  { %v3946_v4 = vpop.eup %3945  ;;  %3955 = vpow2.f32 %v658_v7  ;;  %v662_v14 = vmul.f32 1.442695, %v639_v8 }
 0x274   :  { %v656_v53 = vmul.f32 1.442695, %v636_v30  ;;  %v887_v57 = vpop.xlane.xlu1 %886  ;;  %950 = vadd.xlane.f32.xlu1 %v3936_v51  ;;  %v997_v26 = vpack.c.bf16 %v3944_v5, %v3946_v4  ;;  %v3948_v15 = vpop.eup %3947 }
 0x275   :  { %v881_v52 = vpop.xlane.xlu0 %880  ;;  %v909_v47 = vsub.f32 %v4727_v19, %v887_v57 }
 0x276   :  { %v906_v28 = vsub.f32 %v4732_v27, %v881_v52  ;;  %3957 = vpow2.f32 %v656_v53  ;;  %1044 = vmatprep.mubr.bf16.mxu0 %v997_v26 }
 0x277   :  { %3959 = vpow2.f32 %v930_v37  ;;  %v934_v49 = vmul.f32 1.442695, %v909_v47 }
 0x278   :  { %v928_v62 = vmul.f32 1.442695, %v906_v28  ;;  %v3950_v29 = vpop.eup %3949  ;;  %v619_v46 = vpop.xlane.xlu1 %618  ;;  %686 = vadd.xlane.f32.xlu1 %v3948_v15 }
 0x279   :  { %v613_v50 = vpop.xlane.xlu0 %612  ;;  %684 = vadd.xlane.f32.xlu0 %v3950_v29  ;;  %v729_v36 = vpack.c.bf16 %v3948_v15, %v3950_v29  ;;  %v3952_v51 = vpop.eup %3951  ;;  %v641_v19 = vsub.f32 %v4745_v59, %v619_v46 }
 0x27a   :  { %v638_v41 = vsub.f32 %v4748_v32, %v613_v50  ;;  %3961 = vpow2.f32 %v928_v62 }
 0x27b   :  { %1045 = vmatmul.mubr.bf16.gmra.mrb[20].mxu0 %v729_v36  ;;  %3963 = vpow2.f32 %v662_v14  ;;  %v666_v53 = vmul.f32 1.442695, %v641_v19 }
 0x27c   :  { %v660_v27 = vmul.f32 1.442695, %v638_v41  ;;  %v3954_v12 = vpop.eup %3953  ;;  %v891_v18 = vpop.xlane.xlu1 %890  ;;  %954 = vadd.xlane.f32.xlu1 %v3944_v5 }
 0x27d   :  { %v885_v22 = vpop.xlane.xlu0 %884  ;;  %952 = vadd.xlane.f32.xlu0 %v3946_v4  ;;  %v998_v2 = vpack.c.bf16 %v3952_v51, %v3954_v12  ;;  %v3956_v39 = vpop.eup %3955  ;;  %v911_v57 = vsub.f32 %v4762_v48, %v891_v18 }
 0x27e   :  { %v908_v7 = vsub.f32 %v4757_v54, %v885_v22  ;;  %3965 = vpow2.f32 %v660_v27 }
 0x27f   :  { %1052 = vmatprep.mubr.bf16.mxu0 %v998_v2  ;;  %3967 = vpow2.f32 %v934_v49  ;;  %v938_v26 = vmul.f32 1.442695, %v911_v57 }
 0x280   :  { %v932_v32 = vmul.f32 1.442695, %v908_v7  ;;  %v3958_v23 = vpop.eup %3957  ;;  %v623_v30 = vpop.xlane.xlu1 %622  ;;  %690 = vadd.xlane.f32.xlu1 %v3956_v39 }
 0x281   :  { %v617_v9 = vpop.xlane.xlu0 %616  ;;  %688 = vadd.xlane.f32.xlu0 %v3958_v23  ;;  %v730_v5 = vpack.c.bf16 %v3956_v39, %v3958_v23  ;;  %v3960_v4 = vpop.eup %3959  ;;  %v643_v37 = vsub.f32 %v4770_v24, %v623_v30 }
 0x282   :  { %v640_v59 = vsub.f32 %v4777_v38, %v617_v9  ;;  %3969 = vpow2.f32 %v932_v32 }
 0x283   :  { %1053 = vmatmul.mubr.bf16.gmra.mrb[24].mxu0 %v730_v5  ;;  %3971 = vpow2.f32 %v666_v53  ;;  %v670_v47 = vmul.f32 1.442695, %v643_v37 }
 0x284   :  { %v664_v54 = vmul.f32 1.442695, %v640_v59  ;;  %v3962_v52 = vpop.eup %3961  ;;  %v895_v8 = vpop.xlane.xlu1 %894  ;;  %958 = vadd.xlane.f32.xlu1 %v3952_v51 }
 0x285   :  { %v889_v28 = vpop.xlane.xlu0 %888  ;;  %956 = vadd.xlane.f32.xlu0 %v3954_v12  ;;  %v999_v15 = vpack.c.bf16 %v3960_v4, %v3962_v52  ;;  %v3964_v62 = vpop.eup %3963  ;;  %v913_v24 = vsub.f32 %v4793_v40, %v895_v8 }
 0x286   :  { %v910_v48 = vsub.f32 %v4786_v10, %v889_v28  ;;  %3973 = vpow2.f32 %v664_v54 }
 0x287   :  { %1060 = vmatprep.mubr.bf16.mxu0 %v999_v15  ;;  %3975 = vpow2.f32 %v938_v26  ;;  %v942_v49 = vmul.f32 1.442695, %v913_v24 }
 0x288   :  { %v936_v38 = vmul.f32 1.442695, %v910_v48  ;;  %v3966_v29 = vpop.eup %3965  ;;  %v627_v46 = vpop.xlane.xlu1 %626  ;;  %694 = vadd.xlane.f32.xlu1 %v3964_v62 }
 0x289   :  { %v621_v50 = vpop.xlane.xlu0 %620  ;;  %692 = vadd.xlane.f32.xlu0 %v3966_v29  ;;  %v731_v41 = vpack.c.bf16 %v3964_v62, %v3966_v29  ;;  %v3968_v36 = vpop.eup %3967  ;;  %v645_v18 = vsub.f32 %v4802_v42, %v627_v46  ;;  %v3884_v29 = vld [vmem:[#allocation2 + $0x34] ss:$8 sps:$4 sm:$0xff]  }
 0x28a   :  { %v642_v14 = vsub.f32 %v4805_v16, %v621_v50  ;;  %3977 = vpow2.f32 %v936_v38  ;;  %v3882_v38 = vld [vmem:[#allocation2 + $0x30] ss:$8 sps:$4 sm:$0xff]   ;;  %v4877_v50 = vld [vmem:[%s5895_s3] sm:$0xff] }
 0x28b   :  { %1061 = vmatmul.mubr.bf16.gmra.mrb[28].mxu0 %v731_v41  ;;  %3979 = vpow2.f32 %v670_v47  ;;  %v674_v32 = vmul.f32 1.442695, %v645_v18  ;;  %v99_v47 = vsub.s32 5, %v4467_v34 }
 0x28c   :  { %v668_v10 = vmul.f32 1.442695, %v642_v14  ;;  %v3970_v51 = vpop.eup %3969  ;;  %v899_v27 = vpop.xlane.xlu1 %898  ;;  %962 = vadd.xlane.f32.xlu1 %v3960_v4  ;;  %v3879_v4 = vld [vmem:[#allocation2 + $0x20] ss:$8 sps:$4 sm:$0xff]  }
 0x28d   :  { %v893_v12 = vpop.xlane.xlu0 %892  ;;  %960 = vadd.xlane.f32.xlu0 %v3962_v52  ;;  %v1000_v22 = vpack.c.bf16 %v3968_v36, %v3970_v51  ;;  %v3972_v19 = vpop.eup %3971  ;;  %v915_v2 = vsub.f32 %v4819_v56, %v899_v27  ;;  %v3881_v56 = vld [vmem:[#allocation2 + $0x24] ss:$8 sps:$4 sm:$0xff]   ;;  %v4880_v14 = vrot.slane %v4877_v50, %v99_v47 }
 0x28e   :  { %v912_v40 = vsub.f32 %v4814_v3, %v893_v12  ;;  %3981 = vpow2.f32 %v668_v10  ;;  %1295 = vmatprep.subr.bf16.mxu1 %v3881_v56  ;;  %v3730_v27 = vpop.f32.mrb[0].mxu0  ;;  %v3885_v12 = vld [vmem:[#allocation2 + $0x40] ss:$8 sps:$4 sm:$0xff]  }
 0x28f   :  { %1068 = vmatprep.mubr.bf16.mxu0 %v1000_v22  ;;  %3983 = vpow2.f32 %v942_v49  ;;  %v946_v57 = vmul.f32 1.442695, %v915_v2  ;;  %1296 = vmatpush1.bf16.msra.mxu1 %v3879_v4  ;;  %v3887_v49 = vld [vmem:[#allocation2 + $0x44] ss:$8 sps:$4 sm:$0xff]   ;;  %v4883_v18 = vadd.f32 %v3730_v27, %v4880_v14  ;;  %v3900_v27 = vld [vmem:[#allocation2 + $0x90] ss:$8 sps:$4 sm:$0xff]  }
 0x290   :  { %v940_v16 = vmul.f32 1.442695, %v912_v40  ;;  %v3974_v7 = vpop.eup %3973  ;;  %v631_v23 = vpop.xlane.xlu1 %630  ;;  %698 = vadd.xlane.f32.xlu1 %v3972_v19  ;;  %1297 = vmatprep.subr.bf16.mxu1 %v3884_v29 }
 0x291   :  { %v625_v39 = vpop.xlane.xlu0 %624  ;;  %696 = vadd.xlane.f32.xlu0 %v3974_v7  ;;  %v732_v30 = vpack.c.bf16 %v3972_v19, %v3974_v7  ;;  %v3976_v9 = vpop.eup %3975  ;;  %v647_v59 = vsub.f32 %v4824_v45, %v631_v23  ;;  %5930 = vst [vmem:[#allocation11_spill] sm:$0xff] %v4883_v18 }
 0x292   :  { %v644_v42 = vsub.f32 %v4827_v13, %v625_v39  ;;  %3985 = vpow2.f32 %v940_v16  ;;  %v172_v40 = vpop.f32.mrb[1].mxu0 }
 0x293   :  { %1069 = vmatmul.mubr.bf16.gmra.mrb[32].mxu0 %v732_v30  ;;  %3987 = vpow2.f32 %v674_v32  ;;  %v678_v28 = vmul.f32 1.442695, %v647_v59  ;;  %1298 = vmatpush1.bf16.msra.mxu1 %v3882_v38  ;;  %v4886_v19 = vadd.f32 %v172_v40, %v4880_v14  ;;  %v3731_v16 = vpop.f32.mrb[2].mxu0  ;;  %v3888_v30 = vld [vmem:[#allocation2 + $0x50] ss:$8 sps:$4 sm:$0xff]  }
 0x294   :  { %v672_v3 = vmul.f32 1.442695, %v644_v42  ;;  %v3978_v53 = vpop.eup %3977  ;;  %966 = vadd.xlane.f32.xlu1 %v3968_v36  ;;  %1299 = vmatprep.subr.bf16.mxu1 %v3887_v49  ;;  %v4889_v2 = vadd.f32 %v3731_v16, %v4880_v14  ;;  %v175_v32 = vpop.f32.mrb[3].mxu0  ;;  %v3896_v38 = vld [vmem:[#allocation2 + $0x74] ss:$8 sps:$4 sm:$0xff]  }
 0x295   :  { %v897_v5 = vpop.xlane.xlu0 %896  ;;  %964 = vadd.xlane.f32.xlu0 %v3970_v51  ;;  %v1001_v52 = vpack.c.bf16 %v3976_v9, %v3978_v53  ;;  %v3980_v37 = vpop.eup %3979  ;;  %5931 = vst [vmem:[#allocation12_spill] sm:$0xff] %v4886_v19  ;;  %v4892_v23 = vadd.f32 %v175_v32, %v4880_v14  ;;  %v5951_v19 = vld [vmem:[#allocation8_spill] sm:$0xff] }
 0x296   :  { %v914_v54 = vsub.f32 %v4834_v61, %v897_v5  ;;  %3989 = vpow2.f32 %v672_v3  ;;  %5932 = vst [vmem:[#allocation13_spill] sm:$0xff] %v4889_v2  ;;  %v3734_v42 = vpop.f32.mrb[4].mxu0  ;;  %v5950_v2 = vld [vmem:[#allocation6_spill] sm:$0xff] }
 0x297   :  { %1076 = vmatprep.mubr.bf16.mxu0 %v1001_v52  ;;  %3991 = vpow2.f32 %v946_v57  ;;  %1300 = vmatpush1.bf16.msra.mxu1 %v3885_v12  ;;  %5933 = vst [vmem:[#allocation14_spill] sm:$0xff] %v4892_v23  ;;  %v4895_v3 = vadd.f32 %v3734_v42, %v4880_v14  ;;  %v3891_v52 = vld [vmem:[#allocation2 + $0x60] ss:$8 sps:$4 sm:$0xff]   ;;  %v3902_v12 = vld [vmem:[#allocation2 + $0x94] ss:$8 sps:$4 sm:$0xff]  }
 0x298   :  { %v944_v13 = vmul.f32 1.442695, %v914_v54  ;;  %v3982_v8 = vpop.eup %3981  ;;  %702 = vadd.xlane.f32.xlu1 %v3980_v37 }
 0x299   :  { %v629_v26 = vpop.xlane.xlu0 %628  ;;  %700 = vadd.xlane.f32.xlu0 %v3982_v8  ;;  %v733_v48 = vpack.c.bf16 %v3980_v37, %v3982_v8  ;;  %v3984_v15 = vpop.eup %3983  ;;  %5934 = vst [vmem:[#allocation15_spill] sm:$0xff] %v4895_v3  ;;  %v3893_v37 = vld [vmem:[#allocation2 + $0x64] ss:$8 sps:$4 sm:$0xff]  }
 0x29a   :  { %3993 = vpow2.f32 %v944_v13  ;;  %v646_v45 = vsub.f32 %v4838_v31, %v629_v26 }
 0x29b   :  { %1077 = vmatmul.mubr.bf16.gmra.mrb[36].mxu0 %v733_v48  ;;  %3995 = vpow2.f32 %v678_v28 }
 0x29c   :  { %v676_v62 = vmul.f32 1.442695, %v646_v45  ;;  %v3986_v61 = vpop.eup %3985  ;;  %970 = vadd.xlane.f32.xlu1 %v3976_v9  ;;  %v3890_v9 = vld [vmem:[#allocation2 + $0x54] ss:$8 sps:$4 sm:$0xff]  }
 0x29d   :  { %968 = vadd.xlane.f32.xlu0 %v3978_v53  ;;  %v1002_v46 = vpack.c.bf16 %v3984_v15, %v3986_v61  ;;  %v3988_v31 = vpop.eup %3987  ;;  %v188_v53 = vpop.f32.mrb[5].mxu0  ;;  %1301 = vmatprep.subr.bf16.mxu1 %v3890_v9 }
 0x29e   :  { %3997 = vpow2.f32 %v676_v62  ;;  %v4898_v57 = vadd.f32 %v188_v53, %v4880_v14  ;;  %v3735_v59 = vpop.f32.mrb[6].mxu0  ;;  %1302 = vmatpush1.bf16.msra.mxu1 %v3888_v30 }
 0x29f   :  { %1084 = vmatprep.mubr.bf16.mxu0 %v1002_v46  ;;  %v4901_v5 = vadd.f32 %v3735_v59, %v4880_v14  ;;  %v191_v4 = vpop.f32.mrb[7].mxu0  ;;  %1303 = vmatprep.subr.bf16.mxu1 %v3893_v37  ;;  %v3899_v46 = vld [vmem:[#allocation2 + $0x84] ss:$8 sps:$4 sm:$0xff]  }
 0x2a0   :  { %v3990_v24 = vpop.eup %3989  ;;  %706 = vadd.xlane.f32.xlu1 %v3988_v31  ;;  %5935 = vst [vmem:[#allocation16_spill] sm:$0xff] %v4898_v57  ;;  %v4904_v56 = vadd.f32 %v191_v4, %v4880_v14  ;;  %v3738_v54 = vpop.f32.mrb[8].mxu0 }
 0x2a1   :  { %704 = vadd.xlane.f32.xlu0 %v3990_v24  ;;  %v734_v41 = vpack.c.bf16 %v3988_v31, %v3990_v24  ;;  %v3992_v36 = vpop.eup %3991  ;;  %5936 = vst [vmem:[#allocation17_spill] sm:$0xff] %v4901_v5  ;;  %v4907_v13 = vadd.f32 %v3738_v54, %v4880_v14  ;;  %v204_v8 = vpop.f32.mrb[9].mxu0 }
 0x2a2   :  { %5937 = vst [vmem:[#allocation18_spill] sm:$0xff] %v4904_v56  ;;  %v4910_v28 = vadd.f32 %v204_v8, %v4880_v14  ;;  %v3739_v26 = vpop.f32.mrb[10].mxu0  ;;  %1304 = vmatpush1.bf16.msra.mxu1 %v3891_v52 }
 0x2a3   :  { %1085 = vmatmul.mubr.bf16.gmra.mrb[40].mxu0 %v734_v41  ;;  %5938 = vst [vmem:[#allocation19_spill] sm:$0xff] %v4907_v13  ;;  %v4913_v45 = vadd.f32 %v3739_v26, %v4880_v14  ;;  %v207_v48 = vpop.f32.mrb[11].mxu0  ;;  %1305 = vmatprep.subr.bf16.mxu1 %v3896_v38  ;;  %v4936_v38 = vrot.slane %v4877_v50, %v4473_v35 }
 0x2a4   :  { %v3994_v10 = vpop.eup %3993  ;;  %974 = vadd.xlane.f32.xlu1 %v3984_v15  ;;  %5939 = vst [vmem:[#allocation20_spill] sm:$0xff] %v4910_v28  ;;  %v4916_v15 = vadd.f32 %v207_v48, %v4880_v14  ;;  %v3742_v62 = vpop.f32.mrb[12].mxu0 }
 0x2a5   :  { %v1003_v51 = vpack.c.bf16 %v3992_v36, %v3994_v10  ;;  %972 = vadd.xlane.f32.xlu0 %v3986_v61  ;;  %v3996_v22 = vpop.eup %3995  ;;  %5940 = vst [vmem:[#allocation21_spill] sm:$0xff] %v4913_v45  ;;  %v3894_v61 = vld [vmem:[#allocation2 + $0x70] ss:$8 sps:$4 sm:$0xff]   ;;  %v4919_v29 = vadd.f32 %v3742_v62, %v4880_v14  ;;  %v220_v47 = vpop.f32.mrb[13].mxu0 }
 0x2a6   :  { %5941 = vst [vmem:[#allocation22_spill] sm:$0xff] %v4916_v15  ;;  %v4922_v31 = vadd.f32 %v220_v47, %v4880_v14  ;;  %v3743_v24 = vpop.f32.mrb[14].mxu0  ;;  %1306 = vmatpush1.bf16.msra.mxu1 %v3894_v61 }
 0x2a7   :  { %1092 = vmatprep.mubr.bf16.mxu0 %v1003_v51  ;;  %5942 = vst [vmem:[#allocation23_spill] sm:$0xff] %v4919_v29  ;;  %v4925_v41 = vadd.f32 %v3743_v24, %v4880_v14  ;;  %1307 = vmatprep.subr.bf16.mxu1 %v3899_v46 }
 0x2a8   :  { %v3998_v7 = vpop.eup %3997  ;;  %710 = vadd.xlane.f32.xlu1 %v3996_v22  ;;  %5943 = vst [vmem:[#allocation24_spill] sm:$0xff] %v4922_v31 }
 0x2a9   :  { %v735_v39 = vpack.c.bf16 %v3996_v22, %v3998_v7  ;;  %708 = vadd.xlane.f32.xlu0 %v3998_v7  ;;  %5944 = vst [vmem:[#allocation25_spill] sm:$0xff] %v4925_v41 }
 0x2ab   :  { %1093 = vmatmul.mubr.bf16.gmra.mrb[44].mxu0 %v735_v39 }
 0x2ac   :  { %978 = vadd.xlane.f32.xlu1 %v3992_v36  ;;  %v223_v36 = vpop.f32.mrb[15].mxu0 }
 0x2ad   :  { %976 = vadd.xlane.f32.xlu0 %v3994_v10  ;;  %v3897_v10 = vld [vmem:[#allocation2 + $0x80] ss:$8 sps:$4 sm:$0xff]   ;;  %v4928_v51 = vadd.f32 %v223_v36, %v4880_v14 }
 0x2ae   :  { %1308 = vmatpush1.bf16.msra.mxu1 %v3897_v10 }
 0x2af   :  { %5945 = vst [vmem:[#allocation26_spill] sm:$0xff] %v4928_v51  ;;  %1309 = vmatprep.subr.bf16.mxu1 %v3902_v12  ;;  %v4944_v12 = vrot.slane %v4877_v50, %v4596_v58 }
 0x2b2   :  { %1310 = vmatpush1.bf16.msra.mxu1 %v3900_v27 }
 0x2f9   :  { %v681_v49 = vpop.xlane.xlu0 %680 }
 0x2fd   :  { %v683_v40 = vpop.xlane.xlu1 %682  ;;  %v949_v22 = vpop.xlane.xlu0 %948 }
 0x2fe   :  { %3999 = vrcp.f32 %v949_v22 }
 0x2ff   :  { %4001 = vrcp.f32 %v681_v49 }
 0x301   :  { %v951_v16 = vpop.xlane.xlu1 %950 }
 0x302   :  { %4003 = vrcp.f32 %v951_v16 }
 0x303   :  { %4005 = vrcp.f32 %v683_v40 }
 0x305   :  { %v687_v39 = vpop.xlane.xlu1 %686 }
 0x306   :  { %v685_v7 = vpop.xlane.xlu0 %684 }
 0x308   :  { %v4000_v37 = vpop.eup %3999 }
 0x309   :  { %v955_v42 = vpop.xlane.xlu1 %954  ;;  %v4002_v26 = vpop.eup %4001 }
 0x30a   :  { %v953_v32 = vpop.xlane.xlu0 %952  ;;  %v1103_v36 = vsel %vm413_vm1, %v4002_v26, %v4000_v37 }
 0x30b   :  { %4007 = vrcp.f32 %v953_v32 }
 0x30c   :  { %4009 = vrcp.f32 %v685_v7  ;;  %v4004_v61 = vpop.eup %4003 }
 0x30d   :  { %v691_v9 = vpop.xlane.xlu1 %690  ;;  %4011 = vrcp.f32 %v955_v42  ;;  %v4006_v27 = vpop.eup %4005 }
 0x30e   :  { %v689_v30 = vpop.xlane.xlu0 %688  ;;  %4013 = vrcp.f32 %v687_v39  ;;  %v1104_v22 = vsel %vm413_vm1, %v4006_v27, %v4004_v61 }
 0x311   :  { %v959_v59 = vpop.xlane.xlu1 %958 }
 0x312   :  { %v957_v53 = vpop.xlane.xlu0 %956 }
 0x313   :  { %4015 = vrcp.f32 %v957_v53 }
 0x314   :  { %4017 = vrcp.f32 %v689_v30 }
 0x315   :  { %v4930_v4 = vpop.xlane.xlu1 %694  ;;  %v4008_v32 = vpop.eup %4007  ;;  %4019 = vrcp.f32 %v959_v59 }
 0x316   :  { %v693_v14 = vpop.xlane.xlu0 %692  ;;  %v4010_v50 = vpop.eup %4009  ;;  %4021 = vrcp.f32 %v691_v9 }
 0x317   :  { %v1105_v30 = vsel %vm413_vm1, %v4010_v50, %v4008_v32 }
 0x319   :  { %v963_v52 = vpop.xlane.xlu1 %962 }
 0x31a   :  { %v961_v54 = vpop.xlane.xlu0 %960 }
 0x31b   :  { %4023 = vrcp.f32 %v961_v54 }
 0x31c   :  { %4025 = vrcp.f32 %v693_v14 }
 0x31d   :  { %v4938_v24 = vpop.xlane.xlu1 %698  ;;  %4027 = vrcp.f32 %v963_v52 }
 0x31e   :  { %v4932_v48 = vpop.xlane.xlu0 %696  ;;  %4029 = vrcp.f32 %v4930_v4 }
 0x321   :  { %v967_v26 = vpop.xlane.xlu1 %966 }
 0x322   :  { %v965_v39 = vpop.xlane.xlu0 %964 }
 0x323   :  { %4031 = vrcp.f32 %v965_v39 }
 0x324   :  { %4033 = vrcp.f32 %v4932_v48 }
 0x325   :  { %4035 = vrcp.f32 %v967_v26 }
 0x326   :  { %4037 = vrcp.f32 %v4938_v24 }
 0x345   :  { %v3532_v8 = vpop.f32.mrb[16].mxu0 }
 0x346   :  { %v3533_v62 = vpop.f32.mrb[17].mxu0 }
 0x347   :  { %v3534_v47 = vadd.f32 %v3533_v62, %v3532_v8  ;;  %v3535_v46 = vpop.f32.mrb[18].mxu0 }
 0x348   :  { %v3536_v10 = vpop.f32.mrb[19].mxu0 }
 0x349   :  { %v1119_v49 = vmul.f32 %v3534_v47, %v1103_v36  ;;  %v3537_v40 = vadd.f32 %v3536_v10, %v3535_v46  ;;  %v4012_v47 = vpop.eup %4011 }
 0x34a   :  { %v4014_v10 = vpop.eup %4013 }
 0x34b   :  { %v1139_v16 = vmul.f32 %v4936_v38, %v1119_v49  ;;  %v1120_v7 = vmul.f32 %v3537_v40, %v1104_v22  ;;  %v4954_v22 = vpop.xlane.xlu0 %700  ;;  %v4016_v32 = vpop.eup %4015 }
 0x34d   :  { %v1159_v42 = vadd.f32 %v4944_v12, %v1139_v16  ;;  %v1140_v37 = vmul.f32 %v4936_v38, %v1120_v7  ;;  %v1106_v16 = vsel %vm413_vm1, %v4014_v10, %v4012_v47 }
 0x34e   :  { %v3538_v8 = vpop.f32.mrb[20].mxu0 }
 0x34f   :  { %v3539_v62 = vpop.f32.mrb[21].mxu0  ;;  %v1160_v61 = vadd.f32 %v4944_v12, %v1140_v37  ;;  %v1175_v59 = vmax.f32 %v1159_v42, 0.0 }
 0x350   :  { %v3540_v53 = vadd.f32 %v3539_v62, %v3538_v8  ;;  %v3541_v46 = vpop.f32.mrb[22].mxu0  ;;  %v4959_v8 = vpop.xlane.xlu1 %702 }
 0x351   :  { %v3542_v36 = vpop.f32.mrb[23].mxu0  ;;  %v1176_v27 = vmax.f32 %v1160_v61, 0.0  ;;  %v4018_v61 = vpop.eup %4017 }
 0x352   :  { %v1121_v49 = vmul.f32 %v3540_v53, %v1105_v30  ;;  %v3543_v40 = vadd.f32 %v3542_v36, %v3541_v46  ;;  %v5946_v46 = vmov 0   ;;  %v4020_v54 = vpop.eup %4019  ;;  %v969_v36 = vpop.xlane.xlu0 %968  ;;  %v1107_v52 = vsel %vm413_vm1, %v4018_v61, %v4016_v32 }
 0x353   :  { %v1207_v9 = vpack.c.bf16 %v1176_v27, %v1175_v59  ;;  %v4022_v59 = vpop.eup %4021  ;;  %4039 = vrcp.f32 %v969_v36 }
 0x354   :  { %v1141_v7 = vmul.f32 %v4936_v38, %v1121_v49  ;;  %v1122_v37 = vmul.f32 %v3543_v40, %v1106_v16  ;;  %4041 = vrcp.f32 %v4954_v22 }
 0x355   :  { %1328 = vmatmul.mubr.bf16.vlgmr.msra.gmra.mrb[32].mxu1 %v1207_v9  ;;  %v971_v9 = vpop.xlane.xlu1 %970 }
 0x356   :  { %v1142_v42 = vmul.f32 %v4936_v38, %v1122_v37  ;;  %v3544_v50 = vpop.f32.mrb[24].mxu0  ;;  %v1161_v62 = vadd.f32 %v4944_v12, %v1141_v7  ;;  %1337 = vmatprep.mubr.bf16.mxu1 %v5946_v46  ;;  %v1108_v7 = vsel %vm413_vm1, %v4022_v59, %v4020_v54  ;;  %4043 = vrcp.f32 %v971_v9 }
 0x357   :  { %v3545_v53 = vpop.f32.mrb[25].mxu0  ;;  %4045 = vrcp.f32 %v4959_v8 }
 0x358   :  { %v3546_v47 = vadd.f32 %v3545_v53, %v3544_v50  ;;  %v3547_v30 = vpop.f32.mrb[26].mxu0  ;;  %v1162_v14 = vadd.f32 %v4944_v12, %v1142_v42  ;;  %v1177_v40 = vmax.f32 %v1161_v62, 0.0  ;;  %v4024_v42 = vpop.eup %4023 }
 0x359   :  { %v3548_v10 = vpop.f32.mrb[27].mxu0  ;;  %v4026_v53 = vpop.eup %4025 }
 0x35a   :  { %v1123_v27 = vmul.f32 %v3546_v47, %v1107_v52  ;;  %v3549_v49 = vadd.f32 %v3548_v10, %v3547_v30  ;;  %v1178_v16 = vmax.f32 %v1162_v14, 0.0  ;;  %v705_v47 = vpop.xlane.xlu0 %704  ;;  %v4028_v39 = vpop.eup %4027  ;;  %v1109_v26 = vsel %vm413_vm1, %v4026_v53, %v4024_v42 }
 0x35b   :  { %v707_v52 = vpop.xlane.xlu1 %706  ;;  %v4030_v59 = vpop.eup %4029 }
 0x35c   :  { %v1143_v4 = vmul.f32 %v4936_v38, %v1123_v27  ;;  %v1124_v37 = vmul.f32 %v3549_v49, %v1108_v7  ;;  %v1208_v50 = vpack.c.bf16 %v1178_v16, %v1177_v40  ;;  %v1110_v7 = vsel %vm413_vm1, %v4030_v59, %v4028_v39 }
 0x35e   :  { %v1144_v32 = vmul.f32 %v4936_v38, %v1124_v37  ;;  %v3550_v61 = vpop.f32.mrb[28].mxu0  ;;  %1338 = vmatmul.mubr.bf16.gmra.mrb[36].mxu1 %v1208_v50  ;;  %v1163_v62 = vadd.f32 %v4944_v12, %v1143_v4  ;;  %v973_v50 = vpop.xlane.xlu0 %972 }
 0x35f   :  { %v3551_v30 = vpop.f32.mrb[29].mxu0  ;;  %1347 = vmatprep.mubr.bf16.mxu1 %v5946_v46  ;;  %4047 = vrcp.f32 %v973_v50 }
 0x360   :  { %v3552_v54 = vadd.f32 %v3551_v30, %v3550_v61  ;;  %v3553_v14 = vpop.f32.mrb[30].mxu0  ;;  %v1164_v48 = vadd.f32 %v4944_v12, %v1144_v32  ;;  %v1179_v40 = vmax.f32 %v1163_v62, 0.0  ;;  %v4032_v32 = vpop.eup %4031  ;;  %4049 = vrcp.f32 %v705_v47 }
 0x361   :  { %v3554_v10 = vpop.f32.mrb[31].mxu0  ;;  %v4034_v53 = vpop.eup %4033 }
 0x362   :  { %v1125_v27 = vmul.f32 %v3552_v54, %v1109_v26  ;;  %v3555_v49 = vadd.f32 %v3554_v10, %v3553_v14  ;;  %v1180_v16 = vmax.f32 %v1164_v48, 0.0  ;;  %v975_v30 = vpop.xlane.xlu1 %974  ;;  %v4036_v36 = vpop.eup %4035  ;;  %v1111_v9 = vsel %vm413_vm1, %v4034_v53, %v4032_v32 }
 0x363   :  { %v4038_v26 = vpop.eup %4037  ;;  %4051 = vrcp.f32 %v975_v30 }
 0x364   :  { %v1145_v24 = vmul.f32 %v4936_v38, %v1125_v27  ;;  %v1126_v4 = vmul.f32 %v3555_v49, %v1110_v7  ;;  %v1209_v37 = vpack.c.bf16 %v1180_v16, %v1179_v40  ;;  %v709_v40 = vpop.xlane.xlu0 %708  ;;  %v1112_v16 = vsel %vm413_vm1, %v4038_v26, %v4036_v36 }
 0x365   :  { %4053 = vrcp.f32 %v707_v52 }
 0x366   :  { %v1146_v42 = vmul.f32 %v4936_v38, %v1126_v4  ;;  %v3556_v61 = vpop.f32.mrb[32].mxu0  ;;  %1348 = vmatmul.mubr.bf16.gmra.mrb[40].mxu1 %v1209_v37  ;;  %v1165_v62 = vadd.f32 %v4944_v12, %v1145_v24  ;;  %v711_v4 = vpop.xlane.xlu1 %710 }
 0x367   :  { %v3557_v54 = vpop.f32.mrb[33].mxu0  ;;  %1357 = vmatprep.mubr.bf16.mxu1 %v5946_v46  ;;  %v4040_v37 = vpop.eup %4039 }
 0x368   :  { %v3558_v39 = vadd.f32 %v3557_v54, %v3556_v61  ;;  %v3559_v14 = vpop.f32.mrb[34].mxu0  ;;  %v1166_v22 = vadd.f32 %v4944_v12, %v1146_v42  ;;  %v1181_v27 = vmax.f32 %v1165_v62, 0.0  ;;  %v4042_v62 = vpop.eup %4041 }
 0x369   :  { %v3560_v48 = vpop.f32.mrb[35].mxu0  ;;  %v4044_v54 = vpop.eup %4043  ;;  %v1113_v30 = vsel %vm413_vm1, %v4042_v62, %v4040_v37 }
 0x36a   :  { %v1127_v10 = vmul.f32 %v3558_v39, %v1111_v9  ;;  %v3561_v59 = vadd.f32 %v3560_v48, %v3559_v14  ;;  %v1182_v49 = vmax.f32 %v1166_v22, 0.0  ;;  %v977_v47 = vpop.xlane.xlu0 %976  ;;  %v4046_v22 = vpop.eup %4045 }
 0x36b   :  { %4055 = vrcp.f32 %v977_v47 }
 0x36c   :  { %v1147_v8 = vmul.f32 %v4936_v38, %v1127_v10  ;;  %v1128_v7 = vmul.f32 %v3561_v59, %v1112_v16  ;;  %v1210_v24 = vpack.c.bf16 %v1182_v49, %v1181_v27  ;;  %v979_v59 = vpop.xlane.xlu1 %978  ;;  %v1114_v27 = vsel %vm413_vm1, %v4046_v22, %v4044_v54 }
 0x36d   :  { %4057 = vrcp.f32 %v709_v40 }
 0x36e   :  { %v1148_v32 = vmul.f32 %v4936_v38, %v1128_v7  ;;  %v3562_v42 = vpop.f32.mrb[36].mxu0  ;;  %1358 = vmatmul.mubr.bf16.gmra.mrb[44].mxu1 %v1210_v24  ;;  %v1167_v61 = vadd.f32 %v4944_v12, %v1147_v8  ;;  %v4048_v8 = vpop.eup %4047  ;;  %4059 = vrcp.f32 %v979_v59 }
 0x36f   :  { %v3563_v53 = vpop.f32.mrb[37].mxu0  ;;  %1367 = vmatprep.mubr.bf16.mxu1 %v5946_v46  ;;  %4061 = vrcp.f32 %v711_v4 }
 0x370   :  { %v3564_v50 = vadd.f32 %v3563_v53, %v3562_v42  ;;  %v3565_v36 = vpop.f32.mrb[38].mxu0  ;;  %v1168_v39 = vadd.f32 %v4944_v12, %v1148_v32  ;;  %v1183_v26 = vmax.f32 %v1167_v61, 0.0  ;;  %v4050_v32 = vpop.eup %4049 }
 0x371   :  { %v3566_v14 = vpop.f32.mrb[39].mxu0  ;;  %v4052_v61 = vpop.eup %4051  ;;  %v1115_v40 = vsel %vm413_vm1, %v4050_v32, %v4048_v8 }
 0x372   :  { %v1129_v9 = vmul.f32 %v3564_v50, %v1113_v30  ;;  %v3567_v48 = vadd.f32 %v3566_v14, %v3565_v36  ;;  %v1184_v10 = vmax.f32 %v1168_v39, 0.0  ;;  %v4054_v36 = vpop.eup %4053 }
 0x373   :  { %v1116_v22 = vsel %vm413_vm1, %v4054_v36, %v4052_v61 }
 0x374   :  { %v1149_v52 = vmul.f32 %v4936_v38, %v1129_v9  ;;  %v1130_v49 = vmul.f32 %v3567_v48, %v1114_v27  ;;  %v1211_v16 = vpack.c.bf16 %v1184_v10, %v1183_v26 }
 0x375   :  { %v4056_v26 = vpop.eup %4055 }
 0x376   :  { %v1150_v7 = vmul.f32 %v4936_v38, %v1130_v49  ;;  %v3568_v24 = vpop.f32.mrb[40].mxu0  ;;  %1368 = vmatmul.mubr.bf16.gmra.mrb[48].mxu1 %v1211_v16  ;;  %v1169_v37 = vadd.f32 %v4944_v12, %v1149_v52 }
 0x377   :  { %v3569_v42 = vpop.f32.mrb[41].mxu0  ;;  %1377 = vmatprep.mubr.bf16.mxu1 %v5946_v46  ;;  %v4058_v52 = vpop.eup %4057 }
 0x378   :  { %v3570_v62 = vadd.f32 %v3569_v42, %v3568_v24  ;;  %v3571_v53 = vpop.f32.mrb[42].mxu0  ;;  %v1170_v54 = vadd.f32 %v4944_v12, %v1150_v7  ;;  %v1185_v30 = vmax.f32 %v1169_v37, 0.0  ;;  %v4060_v16 = vpop.eup %4059  ;;  %v1117_v37 = vsel %vm413_vm1, %v4058_v52, %v4056_v26 }
 0x379   :  { %v3572_v50 = vpop.f32.mrb[43].mxu0  ;;  %v4062_v42 = vpop.eup %4061 }
 0x37a   :  { %v1131_v39 = vmul.f32 %v3570_v62, %v1115_v40  ;;  %v3573_v47 = vadd.f32 %v3572_v50, %v3571_v53  ;;  %v1186_v14 = vmax.f32 %v1170_v54, 0.0  ;;  %v1118_v40 = vsel %vm413_vm1, %v4062_v42, %v4060_v16 }
 0x37c   :  { %v1151_v9 = vmul.f32 %v4936_v38, %v1131_v39  ;;  %v1132_v48 = vmul.f32 %v3573_v47, %v1116_v22  ;;  %v1212_v4 = vpack.c.bf16 %v1186_v14, %v1185_v30 }
 0x37e   :  { %v1152_v10 = vmul.f32 %v4936_v38, %v1132_v48  ;;  %v3574_v59 = vpop.f32.mrb[44].mxu0  ;;  %1378 = vmatmul.mubr.bf16.gmra.mrb[52].mxu1 %v1212_v4  ;;  %v1171_v27 = vadd.f32 %v4944_v12, %v1151_v9 }
 0x37f   :  { %v3575_v49 = vpop.f32.mrb[45].mxu0  ;;  %1387 = vmatprep.mubr.bf16.mxu1 %v5946_v46 }
 0x380   :  { %v3576_v8 = vadd.f32 %v3575_v49, %v3574_v59  ;;  %v3577_v7 = vpop.f32.mrb[46].mxu0  ;;  %v1172_v24 = vadd.f32 %v4944_v12, %v1152_v10  ;;  %v1187_v53 = vmax.f32 %v1171_v27, 0.0  ;;  %v5947_v27 = vmov 3  }
 0x381   :  { %v3578_v32 = vpop.f32.mrb[47].mxu0 }
 0x382   :  { %v1133_v61 = vmul.f32 %v3576_v8, %v1117_v37  ;;  %v3579_v62 = vadd.f32 %v3578_v32, %v3577_v7  ;;  %v1188_v54 = vmax.f32 %v1172_v24, 0.0  ;;  %v5948_v7 = vmov 2  }
 0x384   :  { %v1153_v50 = vmul.f32 %v4936_v38, %v1133_v61  ;;  %v1134_v36 = vmul.f32 %v3579_v62, %v1118_v40  ;;  %v1213_v39 = vpack.c.bf16 %v1188_v54, %v1187_v53 }
 0x386   :  { %v1154_v47 = vmul.f32 %v4936_v38, %v1134_v36  ;;  %1388 = vmatmul.mubr.bf16.gmra.mrb[56].mxu1 %v1213_v39  ;;  %v1173_v30 = vadd.f32 %v4944_v12, %v1153_v50 }
 0x387   :  { %1397 = vmatprep.mubr.bf16.mxu1 %v5946_v46 }
 0x388   :  { %v1174_v14 = vadd.f32 %v4944_v12, %v1154_v47  ;;  %v1189_v22 = vmax.f32 %v1173_v30, 0.0 }
 0x38a   :  { %v1190_v9 = vmax.f32 %v1174_v14, 0.0 }
 0x38c   :  { %v1214_v48 = vpack.c.bf16 %v1190_v9, %v1189_v22 }
 0x38e   :  { %1398 = vmatmul.mubr.bf16.gmra.mrb[60].mxu1 %v1214_v48 }
 0x38f   :  { %2337 = vmatprep.mubr.bf16.mxu1 %v5946_v46 }
 0x428   :  { %v1329_v4 = vpop.f32.mrb[32].mxu1 }
 0x429   :  { %v5025_v26 = vpop.f32.mrb[33].mxu1 }
 0x42a   :  { %1466 = vperm.xlu1 %3813, %v5025_v26   ;;  %1749 = vperm.xlu0 %3814, %v5025_v26   ;;  %v1333_v38 = vpop.f32.mrb[34].mxu1 }
 0x42b   :  { %v1440_v10 = vpack.c.bf16 %v1333_v38, %v1329_v4  ;;  %v5029_v59 = vpop.f32.mrb[35].mxu1 }
 0x42d   :  { %v1448_v12 = vsel %vm4482_vm5, %v1440_v10, 0  ;;  %3784 = vmatprep.subr.msk.bf16.mxu0 %vm4486_vm6, %v1440_v10 }
 0x42e   :  { %3815 = vset.pattern.permute.xlu1 %v5947_v27  ;;  %3581 = vmatpush3.bf16.msra.mxu0 %v1448_v12 }
 0x42f   :  { %1753 = vperm.xlu1 %3815, %v5029_v59  }
 0x431   :  { %v1339_v52 = vpop.f32.mrb[36].mxu1 }
 0x432   :  { %v5037_v49 = vpop.f32.mrb[37].mxu1 }
 0x433   :  { %v1343_v16 = vpop.f32.mrb[38].mxu1  ;;  %3816 = vset.pattern.permute.xlu1 %v5948_v7 }
 0x434   :  { %v1441_v8 = vpack.c.bf16 %v1343_v16, %v1339_v52  ;;  %v5040_v24 = vpop.f32.mrb[39].mxu1  ;;  %1471 = vperm.xlu1 %3816, %v5029_v59  }
 0x436   :  { %v1449_v37 = vsel %vm4482_vm5, %v1441_v8, 0  ;;  %3785 = vmatprep.subr.msk.bf16.mxu0 %vm4486_vm6, %v1441_v8 }
 0x437   :  { %3583 = vmatpush3.bf16.msra.mxu0 %v1449_v37 }
 0x438   :  { %3817 = vset.pattern.permute.xlu1 %v5947_v27 }
 0x439   :  { %v1349_v32 = vpop.f32.mrb[40].mxu1  ;;  %1757 = vperm.xlu1 %3817, %v5037_v49  }
 0x43a   :  { %v5049_v42 = vpop.f32.mrb[41].mxu1 }
 0x43b   :  { %v1353_v61 = vpop.f32.mrb[42].mxu1 }
 0x43c   :  { %v1442_v62 = vpack.c.bf16 %v1353_v61, %v1349_v32  ;;  %v5051_v53 = vpop.f32.mrb[43].mxu1 }
 0x43d   :  { %1769 = vperm.xlu0 %3814, %v5051_v53   ;;  %3818 = vset.pattern.permute.xlu1 %v5948_v7 }
 0x43e   :  { %v1450_v54 = vsel %vm4482_vm5, %v1442_v62, 0  ;;  %3786 = vmatprep.subr.msk.bf16.mxu0 %vm4486_vm6, %v1442_v62  ;;  %1476 = vperm.xlu1 %3818, %v5037_v49  }
 0x43f   :  { %3585 = vmatpush3.bf16.msra.mxu0 %v1450_v54 }
 0x441   :  { %3823 = vset.pattern.permute.xlu0 %v5948_v7  ;;  %v1359_v40 = vpop.f32.mrb[44].mxu1 }
 0x442   :  { %1491 = vperm.xlu0 %3823, %v5051_v53   ;;  %v5062_v50 = vpop.f32.mrb[45].mxu1  ;;  %3819 = vset.pattern.permute.xlu1 %v5947_v27 }
 0x443   :  { %v1363_v36 = vpop.f32.mrb[46].mxu1  ;;  %1761 = vperm.xlu1 %3819, %v5040_v24  }
 0x444   :  { %v1443_v39 = vpack.c.bf16 %v1363_v36, %v1359_v40  ;;  %v5066_v47 = vpop.f32.mrb[47].mxu1 }
 0x446   :  { %v1451_v30 = vsel %vm4482_vm5, %v1443_v39, 0  ;;  %1496 = vperm.xlu0 %3823, %v5062_v50   ;;  %3787 = vmatprep.subr.msk.bf16.mxu0 %vm4486_vm6, %v1443_v39 }
 0x447   :  { %3587 = vmatpush3.bf16.msra.mxu0 %v1451_v30  ;;  %3820 = vset.pattern.permute.xlu1 %v5948_v7 }
 0x448   :  { %1481 = vperm.xlu1 %3820, %v5040_v24  }
 0x449   :  { %v1369_v14 = vpop.f32.mrb[48].mxu1 }
 0x44a   :  { %v1371_v22 = vpop.f32.mrb[49].mxu1 }
 0x44b   :  { %v1373_v9 = vpop.f32.mrb[50].mxu1 }
 0x44c   :  { %v1444_v48 = vpack.c.bf16 %v1373_v9, %v1369_v14  ;;  %v1375_v4 = vpop.f32.mrb[51].mxu1  ;;  %3821 = vset.pattern.permute.xlu1 %v5947_v27 }
 0x44d   :  { %1765 = vperm.xlu1 %3821, %v5049_v42  }
 0x44e   :  { %v1452_v38 = vsel %vm4482_vm5, %v1444_v48, 0  ;;  %3788 = vmatprep.subr.msk.bf16.mxu0 %vm4486_vm6, %v1444_v48 }
 0x44f   :  { %3589 = vmatpush3.bf16.msra.mxu0 %v1452_v38 }
 0x451   :  { %v1379_v10 = vpop.f32.mrb[52].mxu1  ;;  %3822 = vset.pattern.permute.xlu1 %v5948_v7 }
 0x452   :  { %v1381_v12 = vpop.f32.mrb[53].mxu1  ;;  %1486 = vperm.xlu1 %3822, %v5049_v42  }
 0x453   :  { %v1383_v52 = vpop.f32.mrb[54].mxu1 }
 0x454   :  { %v1445_v16 = vpack.c.bf16 %v1383_v52, %v1379_v10  ;;  %v1385_v8 = vpop.f32.mrb[55].mxu1 }
 0x456   :  { %v1453_v37 = vsel %vm4482_vm5, %v1445_v16, 0  ;;  %3789 = vmatprep.subr.msk.bf16.mxu0 %vm4486_vm6, %v1445_v16  ;;  %3824 = vset.pattern.permute.xlu1 %v5947_v27 }
 0x457   :  { %3591 = vmatpush3.bf16.msra.mxu0 %v1453_v37  ;;  %1773 = vperm.xlu1 %3824, %v5062_v50  }
 0x459   :  { %v1389_v32 = vpop.f32.mrb[56].mxu1 }
 0x45a   :  { %v1391_v61 = vpop.f32.mrb[57].mxu1 }
 0x45b   :  { %v1393_v62 = vpop.f32.mrb[58].mxu1  ;;  %1777 = vperm.xlu1 %3824, %v5066_v47  }
 0x45c   :  { %v1446_v54 = vpack.c.bf16 %v1393_v62, %v1389_v32  ;;  %v1395_v40 = vpop.f32.mrb[59].mxu1 }
 0x45e   :  { %v1454_v36 = vsel %vm4482_vm5, %v1446_v54, 0  ;;  %3790 = vmatprep.subr.msk.bf16.mxu0 %vm4486_vm6, %v1446_v54 }
 0x45f   :  { %3593 = vmatpush3.bf16.msra.mxu0 %v1454_v36  ;;  %3825 = vset.pattern.permute.xlu1 %v5948_v7 }
 0x460   :  { %1501 = vperm.xlu1 %3825, %v5066_v47  }
 0x461   :  { %v1399_v39 = vpop.f32.mrb[60].mxu1 }
 0x462   :  { %v1401_v30 = vpop.f32.mrb[61].mxu1 }
 0x463   :  { %v1403_v14 = vpop.f32.mrb[62].mxu1 }
 0x464   :  { %v1447_v9 = vpack.c.bf16 %v1403_v14, %v1399_v39  ;;  %1408 = vxpose.xlu0.b32.start [1/16] (narrow) %v5025_v26, 8  ;;  %v1405_v48 = vpop.f32.mrb[63].mxu1  ;;  %3826 = vset.pattern.permute.xlu1 %v5947_v27 }
 0x465   :  { %1781 = vperm.xlu1 %3826, %v1371_v22  }
 0x466   :  { %v1455_v38 = vsel %vm4482_vm5, %v1447_v9, 0  ;;  %3791 = vmatprep.subr.msk.bf16.mxu0 %vm4486_vm6, %v1447_v9 }
 0x467   :  { %3595 = vmatpush3.bf16.msra.mxu0 %v1455_v38 }
 0x468   :  { %1409 = vxpose.xlu0.b32.cont [2/16] (narrow) %v5029_v59, 8 }
 0x469   :  { %3827 = vset.pattern.permute.xlu1 %v5948_v7 }
 0x46a   :  { %1506 = vperm.xlu1 %3827, %v1371_v22  }
 0x46c   :  { %1410 = vxpose.xlu0.b32.cont [3/16] (narrow) %v5037_v49, 8 }
 0x46e   :  { %3828 = vset.pattern.permute.xlu1 %v5947_v27 }
 0x46f   :  { %1785 = vperm.xlu1 %3828, %v1375_v4  }
 0x470   :  { %1411 = vxpose.xlu0.b32.cont [4/16] (narrow) %v5040_v24, 8 }
 0x473   :  { %3829 = vset.pattern.permute.xlu1 %v5948_v7 }
 0x474   :  { %1412 = vxpose.xlu0.b32.cont [5/16] (narrow) %v5049_v42, 8  ;;  %1511 = vperm.xlu1 %3829, %v1375_v4  }
 0x478   :  { %1413 = vxpose.xlu0.b32.cont [6/16] (narrow) %v5051_v53, 8  ;;  %3830 = vset.pattern.permute.xlu1 %v5947_v27 }
 0x479   :  { %1789 = vperm.xlu1 %3830, %v1381_v12  }
 0x47c   :  { %1414 = vxpose.xlu0.b32.cont [7/16] (narrow) %v5062_v50, 8 }
 0x47d   :  { %3831 = vset.pattern.permute.xlu1 %v5948_v7 }
 0x47e   :  { %1516 = vperm.xlu1 %3831, %v1381_v12  }
 0x480   :  { %1415 = vxpose.xlu0.b32.cont [8/16] (narrow) %v5066_v47, 8 }
 0x482   :  { %3832 = vset.pattern.permute.xlu1 %v5947_v27 }
 0x483   :  { %1793 = vperm.xlu1 %3832, %v1385_v8  }
 0x484   :  { %1416 = vxpose.xlu0.b32.cont [9/16] (narrow) %v1371_v22, 8 }
 0x487   :  { %3833 = vset.pattern.permute.xlu1 %v5948_v7 }
 0x488   :  { %1417 = vxpose.xlu0.b32.cont [10/16] (narrow) %v1375_v4, 8  ;;  %1521 = vperm.xlu1 %3833, %v1385_v8  }
 0x48c   :  { %1418 = vxpose.xlu0.b32.cont [11/16] (narrow) %v1381_v12, 8  ;;  %3834 = vset.pattern.permute.xlu1 %v5947_v27 }
 0x48d   :  { %1797 = vperm.xlu1 %3834, %v1391_v61  }
 0x490   :  { %1419 = vxpose.xlu0.b32.cont [12/16] (narrow) %v1385_v8, 8 }
 0x491   :  { %3835 = vset.pattern.permute.xlu1 %v5948_v7 }
 0x492   :  { %1526 = vperm.xlu1 %3835, %v1391_v61  }
 0x494   :  { %1420 = vxpose.xlu0.b32.cont [13/16] (narrow) %v1391_v61, 8 }
 0x496   :  { %3836 = vset.pattern.permute.xlu1 %v5947_v27 }
 0x497   :  { %1801 = vperm.xlu1 %3836, %v1395_v40  }
 0x498   :  { %1421 = vxpose.xlu0.b32.cont [14/16] (narrow) %v1395_v40, 8 }
 0x49b   :  { %3837 = vset.pattern.permute.xlu1 %v5948_v7 }
 0x49c   :  { %1422 = vxpose.xlu0.b32.cont [15/16] (narrow) %v1401_v30, 8  ;;  %1531 = vperm.xlu1 %3837, %v1395_v40  }
 0x4a0   :  { %1423 = vxpose.xlu0.b32.end [16/16] (narrow) %v1405_v48, 8  ;;  %3838 = vset.pattern.permute.xlu1 %v5947_v27 }
 0x4a1   :  { %1805 = vperm.xlu1 %3838, %v1401_v30  }
 0x4a5   :  { %3839 = vset.pattern.permute.xlu1 %v5948_v7 }
 0x4a6   :  { %1536 = vperm.xlu1 %3839, %v1401_v30  }
 0x4a9   :  { %v1467_v43 = vpop.permute.xlu1 %1466  ;;  %v1750_v50 = vpop.permute.xlu0 %1749 }
 0x4aa   :  { %3840 = vset.pattern.permute.xlu1 %v5947_v27 }
 0x4ab   :  { %1809 = vperm.xlu1 %3840, %v1405_v48  }
 0x4ae   :  { %v1754_v44 = vpop.permute.xlu1 %1753 }
 0x4af   :  { %3841 = vset.pattern.permute.xlu1 %v5948_v7 }
 0x4b0   :  { %1541 = vperm.xlu1 %3841, %v1405_v48  }
 0x4b3   :  { %v1472_v26 = vpop.permute.xlu1 %1471 }
 0x4b4   :  { %3842 = vset.pattern.permute.xlu1 %v5947_v27 }
 0x4b8   :  { %v1758_v59 = vpop.permute.xlu1 %1757 }
 0x4bc   :  { %v5130_v22 = vpop.permute.xlu0 %1769 }
 0x4bd   :  { %v1477_v49 = vpop.permute.xlu1 %1476 }
 0x4c1   :  { %v1492_v10 = vpop.permute.xlu0 %1491 }
 0x4c2   :  { %v1762_v24 = vpop.permute.xlu1 %1761 }
 0x4c5   :  { %v5134_v52 = vpop.permute.xlu0 %1496 }
 0x4c7   :  { %v1482_v42 = vpop.permute.xlu1 %1481 }
 0x4c9   :  { %3844 = vset.pattern.permute.xlu0 %v5947_v27 }
 0x4cc   :  { %v5126_v53 = vpop.permute.xlu1 %1765 }
 0x4d1   :  { %v5128_v47 = vpop.permute.xlu1 %1486 }
 0x4d6   :  { %v5132_v4 = vpop.permute.xlu1 %1773 }
 0x4da   :  { %v1778_v12 = vpop.permute.xlu1 %1777 }
 0x4df   :  { %v1502_v16 = vpop.permute.xlu1 %1501 }
 0x4e4   :  { %v1424_v8 = vpop.trf.xlu0  ;;  %v5142_v61 = vpop.permute.xlu1 %1781 }
 0x4e5   :  { %v5137_v37 = vrot.slane %v1424_v8, %v4473_v35  ;;  %v5140_v32 = vrot.slane %v1424_v8, %v4596_v58 }
 0x4e7   :  { %v1817_v62 = vadd.f32 %v5140_v32, %v1754_v44  ;;  %v1816_v54 = vadd.f32 %v5140_v32, %v1750_v50  ;;  %v1553_v40 = vadd.f32 %v5137_v37, %v1492_v10  ;;  %v1548_v36 = vadd.f32 %v5137_v37, %v1467_v43 }
 0x4e8   :  { %v1823_v39 = vadd.f32 %v5140_v32, %v1778_v12  ;;  %v1549_v30 = vadd.f32 %v5137_v37, %v1472_v26  ;;  %v1555_v50 = vadd.f32 %v5137_v37, %v1502_v16  ;;  %v1818_v10 = vadd.f32 %v5140_v32, %v1758_v59 }
 0x4e9   :  { %v1833_v14 = vmul.f32 0.2, %v1817_v62  ;;  %v1832_v9 = vmul.f32 0.2, %v1816_v54  ;;  %v5150_v48 = vpop.permute.xlu1 %1506  ;;  %v1569_v38 = vmul.f32 0.2, %v1553_v40  ;;  %v1550_v16 = vadd.f32 %v5137_v37, %v1477_v49 }
 0x4ea   :  { %v1564_v8 = vmul.f32 0.2, %v1548_v36  ;;  %v1839_v31 = vmul.f32 0.2, %v1823_v39  ;;  %v1565_v44 = vmul.f32 0.2, %v1549_v30 }
 0x4eb   :  { %v1849_v51 = vmax.f32 %v1817_v62, %v1833_v14  ;;  %v1848_v41 = vmax.f32 %v1816_v54, %v1832_v9  ;;  %v1585_v26 = vmax.f32 %v1553_v40, %v1569_v38  ;;  %v1571_v14 = vmul.f32 0.2, %v1555_v50 }
 0x4ec   :  { %v1580_v29 = vmax.f32 %v1548_v36, %v1564_v8  ;;  %v1855_v62 = vmax.f32 %v1823_v39, %v1839_v31  ;;  %v1581_v54 = vmax.f32 %v1549_v30, %v1565_v44  ;;  %v1834_v40 = vmul.f32 0.2, %v1818_v10 }
 0x4ed   :  { %v5155_v43 = vadd.f32 %v4615_v6, %v1849_v51  ;;  %v5158_v12 = vadd.f32 %v4622_v11, %v1848_v41  ;;  %v5165_v51 = vadd.f32 %v4650_v60, %v1585_v26  ;;  %v1587_v49 = vmax.f32 %v1555_v50, %v1571_v14 }
 0x4ee   :  { %v1786_v15 = vpop.permute.xlu1 %1785  ;;  %v5168_v41 = vadd.f32 %v4622_v11, %v1580_v29  ;;  %v5173_v31 = vadd.f32 %v4681_v20, %v1855_v62  ;;  %v5176_v39 = vadd.f32 %v4615_v6, %v1581_v54  ;;  %v1850_v38 = vmax.f32 %v1818_v10, %v1834_v40 }
 0x4ef   :  { %1882 = vmax.xlane.f32.xlu0 %v5155_v43  ;;  %1880 = vmax.xlane.f32.xlu1 %v5158_v12  ;;  %v1825_v59 = vadd.f32 %v5140_v32, %v1786_v15  ;;  %v1566_v15 = vmul.f32 0.2, %v1550_v16  ;;  %v1819_v29 = vadd.f32 %v5140_v32, %v1762_v24  ;;  %v5183_v8 = vadd.f32 %v4681_v20, %v1587_v49 }
 0x4f0   :  { %v1551_v26 = vadd.f32 %v5137_v37, %v1482_v42  ;;  %v5189_v14 = vadd.f32 %v4652_v63, %v1850_v38  ;;  %v1820_v40 = vadd.f32 %v5140_v32, %v5126_v53 }
 0x4f1   :  { %v1841_v30 = vmul.f32 0.2, %v1825_v59  ;;  %v1582_v44 = vmax.f32 %v1550_v16, %v1566_v15  ;;  %v1835_v10 = vmul.f32 0.2, %v1819_v29  ;;  %v1821_v15 = vadd.f32 %v5140_v32, %v5130_v22 }
 0x4f2   :  { %v1567_v24 = vmul.f32 0.2, %v1551_v26  ;;  %v1836_v38 = vmul.f32 0.2, %v1820_v40 }
 0x4f3   :  { %1622 = vmax.xlane.f32.xlu0 %v5165_v51  ;;  %1612 = vmax.xlane.f32.xlu1 %v5168_v41  ;;  %v1512_v36 = vpop.permute.xlu1 %1511  ;;  %v1857_v62 = vmax.f32 %v1825_v59, %v1841_v30  ;;  %v5199_v42 = vadd.f32 %v4652_v63, %v1582_v44  ;;  %v1851_v59 = vmax.f32 %v1819_v29, %v1835_v10  ;;  %v1837_v10 = vmul.f32 0.2, %v1821_v15 }
 0x4f4   :  { %v1557_v9 = vadd.f32 %v5137_v37, %v1512_v36  ;;  %v1552_v44 = vadd.f32 %v5137_v37, %v5128_v47  ;;  %v1822_v47 = vadd.f32 %v5140_v32, %v5132_v4 }
 0x4f5   :  { %v5196_v16 = vadd.f32 %v4722_v25, %v1857_v62  ;;  %v5209_v53 = vadd.f32 %v4624_v17, %v1851_v59 }
 0x4f6   :  { %v1573_v54 = vmul.f32 0.2, %v1557_v9  ;;  %v1568_v59 = vmul.f32 0.2, %v1552_v44 }
 0x4f7   :  { %1894 = vmax.xlane.f32.xlu0 %v5173_v31  ;;  %1614 = vmax.xlane.f32.xlu1 %v5176_v39 }
 0x4f8   :  { %v5186_v50 = vpop.permute.xlu1 %1789  ;;  %v1589_v36 = vmax.f32 %v1557_v9, %v1573_v54  ;;  %v1583_v9 = vmax.f32 %v1551_v26, %v1567_v24  ;;  %v1852_v54 = vmax.f32 %v1820_v40, %v1836_v38  ;;  %v1584_v38 = vmax.f32 %v1552_v44, %v1568_v59 }
 0x4fa   :  { %v5206_v30 = vadd.f32 %v4722_v25, %v1589_v36  ;;  %v5217_v22 = vadd.f32 %v4624_v17, %v1583_v9  ;;  %v5222_v28 = vadd.f32 %v4683_v21, %v1852_v54  ;;  %v1838_v54 = vmul.f32 0.2, %v1822_v47 }
 0x4fb   :  { %1626 = vmax.xlane.f32.xlu0 %v5183_v8  ;;  %1884 = vmax.xlane.f32.xlu1 %v5189_v14 }
 0x4fc   :  { %v1854_v44 = vmax.f32 %v1822_v47, %v1838_v54  ;;  %v1826_v47 = vadd.f32 %v5140_v32, %v5186_v50 }
 0x4fd   :  { %v1517_v49 = vpop.permute.xlu1 %1516 }
 0x4ff   :  { %1898 = vmax.xlane.f32.xlu0 %v5196_v16  ;;  %1616 = vmax.xlane.f32.xlu1 %v5199_v42 }
 0x502   :  { %v1794_v62 = vpop.permute.xlu1 %1793 }
 0x503   :  { %1630 = vmax.xlane.f32.xlu0 %v5206_v30  ;;  %1886 = vmax.xlane.f32.xlu1 %v5209_v53  ;;  %v1827_v29 = vadd.f32 %v5140_v32, %v1794_v62  ;;  %v1853_v62 = vmax.f32 %v1821_v15, %v1837_v10  ;;  %v1554_v15 = vadd.f32 %v5137_v37, %v5134_v52 }
 0x504   :  { %v1824_v10 = vadd.f32 %v5140_v32, %v5142_v61  ;;  %v1556_v52 = vadd.f32 %v5137_v37, %v5150_v48 }
 0x505   :  { %v1843_v36 = vmul.f32 0.2, %v1827_v29 }
 0x506   :  { %v1572_v61 = vmul.f32 0.2, %v1556_v52 }
 0x507   :  { %1618 = vmax.xlane.f32.xlu1 %v5217_v22  ;;  %v1859_v26 = vmax.f32 %v1827_v29, %v1843_v36  ;;  %v1522_v24 = vpop.permute.xlu1 %1521 }
 0x508   :  { %v1559_v45 = vadd.f32 %v5137_v37, %v1522_v24  ;;  %v5232_v24 = vadd.f32 %v4650_v60, %v1853_v62  ;;  %v1840_v62 = vmul.f32 0.2, %v1824_v10  ;;  %v1588_v48 = vmax.f32 %v1556_v52, %v1572_v61 }
 0x509   :  { %v5227_v9 = vadd.f32 %v4754_v1, %v1859_v26  ;;  %v1570_v26 = vmul.f32 0.2, %v1554_v15 }
 0x50a   :  { %v1575_v40 = vmul.f32 0.2, %v1559_v45  ;;  %v1856_v5 = vmax.f32 %v1824_v10, %v1840_v62 }
 0x50b   :  { %1888 = vmax.xlane.f32.xlu1 %v5222_v28  ;;  %1902 = vmax.xlane.f32.xlu0 %v5227_v9  ;;  %v1586_v13 = vmax.f32 %v1554_v15, %v1570_v26  ;;  %v1842_v15 = vmul.f32 0.2, %v1826_v47  ;;  %v1558_v26 = vadd.f32 %v5137_v37, %v1517_v49 }
 0x50c   :  { %v1591_v29 = vmax.f32 %v1559_v45, %v1575_v40  ;;  %v1798_v36 = vpop.permute.xlu1 %1797  ;;  %v5244_v45 = vadd.f32 %v4683_v21, %v1584_v38  ;;  %v5949_v40 = vld [vmem:[#allocation5_spill] sm:$0xff] }
 0x50d   :  { %v5257_v54 = vadd.f32 %v5949_v40, %v1586_v13  ;;  %v5271_v13 = vadd.f32 %v5950_v2, %v1588_v48  ;;  %v1574_v52 = vmul.f32 0.2, %v1558_v26  ;;  %v1828_v49 = vadd.f32 %v5140_v32, %v1798_v36 }
 0x50e   :  { %v5238_v4 = vadd.f32 %v4754_v1, %v1591_v29  ;;  %v5250_v29 = vadd.f32 %v5949_v40, %v1854_v44 }
 0x50f   :  { %1890 = vmax.xlane.f32.xlu1 %v5232_v24  ;;  %v1590_v61 = vmax.f32 %v1558_v26, %v1574_v52 }
 0x510   :  { %1634 = vmax.xlane.f32.xlu0 %v5238_v4 }
 0x511   :  { %v1527_v59 = vpop.permute.xlu1 %1526 }
 0x513   :  { %1620 = vmax.xlane.f32.xlu1 %v5244_v45 }
 0x516   :  { %v1802_v56 = vpop.permute.xlu1 %1801 }
 0x517   :  { %1892 = vmax.xlane.f32.xlu1 %v5250_v29  ;;  %v1829_v38 = vadd.f32 %v5140_v32, %v1802_v56  ;;  %v5263_v56 = vadd.f32 %v5950_v2, %v1856_v5 }
 0x519   :  { %v1845_v57 = vmul.f32 0.2, %v1829_v38 }
 0x51b   :  { %1624 = vmax.xlane.f32.xlu1 %v5257_v54  ;;  %v1861_v44 = vmax.f32 %v1829_v38, %v1845_v57  ;;  %v1532_v3 = vpop.permute.xlu1 %1531  ;;  %v1858_v57 = vmax.f32 %v1826_v47, %v1842_v15  ;;  %v1844_v38 = vmul.f32 0.2, %v1828_v49 }
 0x51c   :  { %v1561_v23 = vadd.f32 %v5137_v37, %v1532_v3 }
 0x51d   :  { %v5266_v10 = vadd.f32 %v4783_v55, %v1861_v44  ;;  %v1560_v44 = vadd.f32 %v5137_v37, %v1527_v59  ;;  %v5281_v48 = vadd.f32 %v4779_v0, %v1858_v57  ;;  %v1860_v36 = vmax.f32 %v1828_v49, %v1844_v38 }
 0x51e   :  { %v1577_v50 = vmul.f32 0.2, %v1561_v23 }
 0x51f   :  { %1896 = vmax.xlane.f32.xlu1 %v5263_v56  ;;  %1906 = vmax.xlane.f32.xlu0 %v5266_v10  ;;  %v5292_v18 = vadd.f32 %v5951_v19, %v1860_v36 }
 0x520   :  { %v1593_v62 = vmax.f32 %v1561_v23, %v1577_v50  ;;  %v1806_v3 = vpop.permute.xlu1 %1805  ;;  %v1576_v23 = vmul.f32 0.2, %v1560_v44  ;;  %v5286_v50 = vadd.f32 %v4779_v0, %v1590_v61 }
 0x521   :  { %v1830_v15 = vadd.f32 %v5140_v32, %v1806_v3 }
 0x522   :  { %v5276_v5 = vadd.f32 %v4783_v55, %v1593_v62  ;;  %v1592_v52 = vmax.f32 %v1560_v44, %v1576_v23 }
 0x523   :  { %1628 = vmax.xlane.f32.xlu1 %v5271_v13  ;;  %v1846_v62 = vmul.f32 0.2, %v1830_v15 }
 0x524   :  { %1638 = vmax.xlane.f32.xlu0 %v5276_v5  ;;  %v5297_v40 = vadd.f32 %v5951_v19, %v1592_v52 }
 0x525   :  { %v1537_v47 = vpop.permute.xlu1 %1536  ;;  %v1862_v38 = vmax.f32 %v1830_v15, %v1846_v62 }
 0x526   :  { %v1562_v57 = vadd.f32 %v5137_v37, %v1537_v47 }
 0x527   :  { %1900 = vmax.xlane.f32.xlu1 %v5281_v48 }
 0x528   :  { %v1578_v61 = vmul.f32 0.2, %v1562_v57 }
 0x52a   :  { %v1810_v26 = vpop.permute.xlu1 %1809  ;;  %v1594_v47 = vmax.f32 %v1562_v57, %v1578_v61 }
 0x52b   :  { %1632 = vmax.xlane.f32.xlu1 %v5286_v50  ;;  %v1831_v59 = vadd.f32 %v5140_v32, %v1810_v26  ;;  %v5952_v32 = vld [vmem:[#allocation9_spill] sm:$0xff]  ;;  %v5953_v26 = vld [vmem:[#allocation10_spill] sm:$0xff] }
 0x52c   :  { %v5313_v15 = vadd.f32 %v5953_v26, %v1594_v47 }
 0x52d   :  { %v1847_v2 = vmul.f32 0.2, %v1831_v59 }
 0x52f   :  { %1904 = vmax.xlane.f32.xlu1 %v5292_v18  ;;  %v1863_v49 = vmax.f32 %v1831_v59, %v1847_v2  ;;  %v1542_v3 = vpop.permute.xlu1 %1541  ;;  %v5305_v2 = vadd.f32 %v5953_v26, %v1862_v38 }
 0x530   :  { %v1563_v0 = vadd.f32 %v5137_v37, %v1542_v3 }
 0x531   :  { %v5300_v44 = vadd.f32 %v5952_v32, %v1863_v49 }
 0x532   :  { %v1579_v23 = vmul.f32 0.2, %v1563_v0 }
 0x533   :  { %1636 = vmax.xlane.f32.xlu1 %v5297_v40  ;;  %1910 = vmax.xlane.f32.xlu0 %v5300_v44 }
 0x534   :  { %v1595_v36 = vmax.f32 %v1563_v0, %v1579_v23 }
 0x536   :  { %v5309_v37 = vadd.f32 %v5952_v32, %v1595_v36 }
 0x537   :  { %1908 = vmax.xlane.f32.xlu1 %v5305_v2 }
 0x538   :  { %1642 = vmax.xlane.f32.xlu0 %v5309_v37 }
 0x53b   :  { %1640 = vmax.xlane.f32.xlu1 %v5313_v15 }
 0x57c   :  { %v1883_v59 = vpop.xlane.xlu0 %1882  ;;  %v1881_v52 = vpop.xlane.xlu1 %1880 }
 0x57d   :  { %v1913_v62 = vsub.f32 %v5155_v43, %v1883_v59  ;;  %v1912_v0 = vsub.f32 %v5158_v12, %v1881_v52 }
 0x57f   :  { %v1930_v57 = vmul.f32 1.442695, %v1913_v62  ;;  %v1928_v49 = vmul.f32 1.442695, %v1912_v0 }
 0x580   :  { %v1613_v3 = vpop.xlane.xlu1 %1612  ;;  %v1623_v19 = vpop.xlane.xlu0 %1622 }
 0x581   :  { %4063 = vpow2.f32 %v1930_v57  ;;  %v1644_v38 = vsub.f32 %v5168_v41, %v1613_v3 }
 0x582   :  { %4065 = vpow2.f32 %v1928_v49 }
 0x583   :  { %v1660_v61 = vmul.f32 1.442695, %v1644_v38 }
 0x584   :  { %v1615_v23 = vpop.xlane.xlu1 %1614  ;;  %v1895_v0 = vpop.xlane.xlu0 %1894 }
 0x585   :  { %v1645_v47 = vsub.f32 %v5176_v39, %v1615_v23  ;;  %4067 = vpow2.f32 %v1660_v61 }
 0x587   :  { %v1662_v36 = vmul.f32 1.442695, %v1645_v47 }
 0x588   :  { %v1885_v26 = vpop.xlane.xlu1 %1884  ;;  %v1627_v47 = vpop.xlane.xlu0 %1626 }
 0x589   :  { %4069 = vpow2.f32 %v1662_v36  ;;  %v1914_v12 = vsub.f32 %v5189_v14, %v1885_v26  ;;  %v1649_v26 = vsub.f32 %v5165_v51, %v1623_v19 }
 0x58b   :  { %v4064_v32 = vpop.eup %4063  ;;  %v1932_v3 = vmul.f32 1.442695, %v1914_v12  ;;  %v1670_v12 = vmul.f32 1.442695, %v1649_v26 }
 0x58c   :  { %v4066_v43 = vpop.eup %4065  ;;  %v1617_v59 = vpop.xlane.xlu1 %1616 }
 0x58d   :  { %v1646_v52 = vsub.f32 %v5199_v42, %v1617_v59  ;;  %v2008_v62 = vpack.c.bf16 %v4064_v32, %v4066_v43 }
 0x58f   :  { %v1664_v41 = vmul.f32 1.442695, %v1646_v52  ;;  %2048 = vmatprep.mubr.bf16.mxu0 %v2008_v62  ;;  %v4068_v57 = vpop.eup %4067  ;;  %v1899_v52 = vpop.xlane.xlu0 %1898 }
 0x590   :  { %v1887_v49 = vpop.xlane.xlu1 %1886  ;;  %1692 = vadd.xlane.f32.xlu1 %v4068_v57 }
 0x591   :  { %v1915_v39 = vsub.f32 %v5209_v53, %v1887_v49  ;;  %4071 = vpow2.f32 %v1664_v41 }
 0x592   :  { %4073 = vpow2.f32 %v1932_v3  ;;  %v1651_v3 = vsub.f32 %v5183_v8, %v1627_v47  ;;  %v1921_v47 = vsub.f32 %v5196_v16, %v1899_v52 }
 0x593   :  { %v1934_v38 = vmul.f32 1.442695, %v1915_v39  ;;  %v4070_v61 = vpop.eup %4069  ;;  %v1631_v39 = vpop.xlane.xlu0 %1630 }
 0x594   :  { %v1619_v23 = vpop.xlane.xlu1 %1618  ;;  %1960 = vadd.xlane.f32.xlu1 %v4066_v43  ;;  %1694 = vadd.xlane.f32.xlu0 %v4070_v61  ;;  %v1740_v42 = vpack.c.bf16 %v4070_v61, %v4068_v57  ;;  %v1919_v57 = vsub.f32 %v5173_v31, %v1895_v0 }
 0x595   :  { %v1647_v14 = vsub.f32 %v5217_v22, %v1619_v23  ;;  %4075 = vpow2.f32 %v1934_v38 }
 0x596   :  { %2049 = vmatmul.mubr.bf16.vlgmr.msra.gmra.mrb[48].mxu0 %v1740_v42  ;;  %v1942_v23 = vmul.f32 1.442695, %v1919_v57 }
 0x597   :  { %v1666_v36 = vmul.f32 1.442695, %v1647_v14 }
 0x598   :  { %v1889_v59 = vpop.xlane.xlu1 %1888  ;;  %1962 = vadd.xlane.f32.xlu0 %v4064_v32  ;;  %v1903_v0 = vpop.xlane.xlu0 %1902 }
 0x599   :  { %4077 = vpow2.f32 %v1666_v36  ;;  %v1916_v53 = vsub.f32 %v5222_v28, %v1889_v59  ;;  %v1923_v52 = vsub.f32 %v5227_v9, %v1903_v0 }
 0x59a   :  { %4079 = vpow2.f32 %v1670_v12 }
 0x59b   :  { %v4072_v62 = vpop.eup %4071  ;;  %v1936_v41 = vmul.f32 1.442695, %v1916_v53 }
 0x59c   :  { %v1891_v49 = vpop.xlane.xlu1 %1890  ;;  %1696 = vadd.xlane.f32.xlu1 %v4072_v62  ;;  %v4074_v22 = vpop.eup %4073 }
 0x59d   :  { %v1917_v43 = vsub.f32 %v5232_v24, %v1891_v49  ;;  %4081 = vpow2.f32 %v1936_v41  ;;  %v1674_v24 = vmul.f32 1.442695, %v1651_v3  ;;  %v1946_v41 = vmul.f32 1.442695, %v1921_v47  ;;  %v1635_v49 = vpop.xlane.xlu0 %1634 }
 0x59f   :  { %v1938_v19 = vmul.f32 1.442695, %v1917_v43  ;;  %v4076_v51 = vpop.eup %4075 }
 0x5a0   :  { %v1621_v32 = vpop.xlane.xlu1 %1620  ;;  %1964 = vadd.xlane.f32.xlu1 %v4074_v22  ;;  %v2009_v38 = vpack.c.bf16 %v4076_v51, %v4074_v22 }
 0x5a1   :  { %4083 = vpow2.f32 %v1938_v19  ;;  %v1648_v28 = vsub.f32 %v5244_v45, %v1621_v32  ;;  %v1653_v45 = vsub.f32 %v5206_v30, %v1631_v39 }
 0x5a2   :  { %2056 = vmatprep.mubr.bf16.mxu0 %v2009_v38 }
 0x5a3   :  { %v4078_v61 = vpop.eup %4077  ;;  %v1668_v14 = vmul.f32 1.442695, %v1648_v28 }
 0x5a4   :  { %1698 = vadd.xlane.f32.xlu0 %v4078_v61  ;;  %v1893_v42 = vpop.xlane.xlu1 %1892  ;;  %v1741_v31 = vpack.c.bf16 %v4078_v61, %v4072_v62  ;;  %v4080_v59 = vpop.eup %4079  ;;  %v1950_v61 = vmul.f32 1.442695, %v1923_v52 }
 0x5a5   :  { %4085 = vpow2.f32 %v1668_v14  ;;  %v1918_v8 = vsub.f32 %v5250_v29, %v1893_v42  ;;  %v1678_v29 = vmul.f32 1.442695, %v1653_v45 }
 0x5a6   :  { %2057 = vmatmul.mubr.bf16.gmra.mrb[52].mxu0 %v1741_v31  ;;  %4087 = vpow2.f32 %v1942_v23 }
 0x5a7   :  { %v1940_v26 = vmul.f32 1.442695, %v1918_v8  ;;  %4089 = vpow2.f32 %v1674_v24  ;;  %v4082_v12 = vpop.eup %4081 }
 0x5a8   :  { %1966 = vadd.xlane.f32.xlu0 %v4076_v51  ;;  %v1625_v36 = vpop.xlane.xlu1 %1624 }
 0x5a9   :  { %4091 = vpow2.f32 %v1940_v26  ;;  %v1650_v53 = vsub.f32 %v5257_v54, %v1625_v36  ;;  %v1655_v54 = vsub.f32 %v5238_v4, %v1635_v49 }
 0x5ab   :  { %v4084_v62 = vpop.eup %4083  ;;  %v1672_v43 = vmul.f32 1.442695, %v1650_v53  ;;  %v1682_v14 = vmul.f32 1.442695, %v1655_v54  ;;  %v3905_v54 = vld [vmem:[#allocation2 + $0xa4] ss:$8 sps:$4 sm:$0xff]  }
 0x5ac   :  { %1702 = vadd.xlane.f32.xlu0 %v4080_v59  ;;  %v1897_v22 = vpop.xlane.xlu1 %1896  ;;  %v2010_v57 = vpack.c.bf16 %v4084_v62, %v4082_v12  ;;  %v1907_v51 = vpop.xlane.xlu0 %1906  ;;  %2305 = vmatprep.subr.bf16.mxu1 %v3905_v54 }
 0x5ad   :  { %4093 = vpow2.f32 %v1672_v43  ;;  %v1920_v16 = vsub.f32 %v5263_v56, %v1897_v22  ;;  %v1925_v0 = vsub.f32 %v5266_v10, %v1907_v51  ;;  %v3903_v51 = vld [vmem:[#allocation2 + $0xa0] ss:$8 sps:$4 sm:$0xff]  }
 0x5ae   :  { %2064 = vmatprep.mubr.bf16.mxu0 %v2010_v57  ;;  %4095 = vpow2.f32 %v1946_v41  ;;  %2306 = vmatpush1.bf16.msra.mxu1 %v3903_v51 }
 0x5af   :  { %v4086_v30 = vpop.eup %4085  ;;  %v1944_v19 = vmul.f32 1.442695, %v1920_v16  ;;  %4097 = vpow2.f32 %v1678_v29  ;;  %v1954_v53 = vmul.f32 1.442695, %v1925_v0  ;;  %v3908_v0 = vld [vmem:[#allocation2 + $0xb4] ss:$8 sps:$4 sm:$0xff]  }
 0x5b0   :  { %1970 = vadd.xlane.f32.xlu0 %v4084_v62  ;;  %1700 = vadd.xlane.f32.xlu1 %v4086_v30  ;;  %v1629_v3 = vpop.xlane.xlu1 %1628  ;;  %v1742_v32 = vpack.c.bf16 %v4080_v59, %v4086_v30  ;;  %v4088_v39 = vpop.eup %4087 }
 0x5b1   :  { %4099 = vpow2.f32 %v1944_v19  ;;  %v1652_v28 = vsub.f32 %v5271_v13, %v1629_v3  ;;  %v4090_v38 = vpop.eup %4089  ;;  %v1639_v4 = vpop.xlane.xlu0 %1638  ;;  %2307 = vmatprep.subr.bf16.mxu1 %v3908_v0 }
 0x5b2   :  { %2065 = vmatmul.mubr.bf16.gmra.mrb[56].mxu0 %v1742_v32  ;;  %v1657_v8 = vsub.f32 %v5276_v5, %v1639_v4 }
 0x5b3   :  { %v4092_v56 = vpop.eup %4091  ;;  %v1676_v23 = vmul.f32 1.442695, %v1652_v28 }
 0x5b4   :  { %1706 = vadd.xlane.f32.xlu0 %v4090_v38  ;;  %1968 = vadd.xlane.f32.xlu1 %v4082_v12  ;;  %v1901_v9 = vpop.xlane.xlu1 %1900  ;;  %v2011_v24 = vpack.c.bf16 %v4088_v39, %v4092_v56  ;;  %v1686_v62 = vmul.f32 1.442695, %v1657_v8 }
 0x5b5   :  { %4101 = vpow2.f32 %v1676_v23  ;;  %v1922_v42 = vsub.f32 %v5281_v48, %v1901_v9 }
 0x5b6   :  { %2072 = vmatprep.mubr.bf16.mxu0 %v2011_v24  ;;  %4103 = vpow2.f32 %v1950_v61 }
 0x5b7   :  { %v4094_v31 = vpop.eup %4093  ;;  %v1948_v13 = vmul.f32 1.442695, %v1922_v42  ;;  %4105 = vpow2.f32 %v1682_v14 }
 0x5b8   :  { %1974 = vadd.xlane.f32.xlu0 %v4088_v39  ;;  %1704 = vadd.xlane.f32.xlu1 %v4094_v31  ;;  %v1633_v47 = vpop.xlane.xlu1 %1632  ;;  %v1743_v26 = vpack.c.bf16 %v4090_v38, %v4094_v31  ;;  %v4096_v45 = vpop.eup %4095  ;;  %v3906_v31 = vld [vmem:[#allocation2 + $0xb0] ss:$8 sps:$4 sm:$0xff]  }
 0x5b9   :  { %4107 = vpow2.f32 %v1948_v13  ;;  %v1654_v36 = vsub.f32 %v5286_v50, %v1633_v47  ;;  %v4098_v59 = vpop.eup %4097  ;;  %2308 = vmatpush1.bf16.msra.mxu1 %v3906_v31 }
 0x5ba   :  { %2073 = vmatmul.mubr.bf16.gmra.mrb[60].mxu0 %v1743_v26  ;;  %v3909_v26 = vld [vmem:[#allocation2 + $0xc0] ss:$8 sps:$4 sm:$0xff]  }
 0x5bb   :  { %v4100_v48 = vpop.eup %4099  ;;  %v1680_v12 = vmul.f32 1.442695, %v1654_v36 }
 0x5bc   :  { %1710 = vadd.xlane.f32.xlu0 %v4098_v59  ;;  %1972 = vadd.xlane.f32.xlu1 %v4092_v56  ;;  %v1905_v10 = vpop.xlane.xlu1 %1904  ;;  %v2012_v41 = vpack.c.bf16 %v4096_v45, %v4100_v48 }
 0x5bd   :  { %4109 = vpow2.f32 %v1680_v12  ;;  %v1924_v5 = vsub.f32 %v5292_v18, %v1905_v10  ;;  %v3912_v12 = vld [vmem:[#allocation2 + $0xd0] ss:$8 sps:$4 sm:$0xff]   ;;  %v3915_v10 = vld [vmem:[#allocation2 + $0xe0] ss:$8 sps:$4 sm:$0xff]  }
 0x5be   :  { %2080 = vmatprep.mubr.bf16.mxu0 %v2012_v41  ;;  %4111 = vpow2.f32 %v1954_v53  ;;  %v3917_v41 = vld [vmem:[#allocation2 + $0xe4] ss:$8 sps:$4 sm:$0xff]  }
 0x5bf   :  { %v4102_v49 = vpop.eup %4101  ;;  %v1952_v43 = vmul.f32 1.442695, %v1924_v5  ;;  %4113 = vpow2.f32 %v1686_v62  ;;  %v3914_v62 = vld [vmem:[#allocation2 + $0xd4] ss:$8 sps:$4 sm:$0xff]   ;;  %v3918_v5 = vld [vmem:[#allocation2 + $0xf0] ss:$8 sps:$4 sm:$0xff]  }
 0x5c0   :  { %1978 = vadd.xlane.f32.xlu0 %v4096_v45  ;;  %1708 = vadd.xlane.f32.xlu1 %v4102_v49  ;;  %v1637_v50 = vpop.xlane.xlu1 %1636  ;;  %v1744_v29 = vpack.c.bf16 %v4098_v59, %v4102_v49  ;;  %v4104_v22 = vpop.eup %4103  ;;  %v3911_v45 = vld [vmem:[#allocation2 + $0xc4] ss:$8 sps:$4 sm:$0xff]   ;;  %v3920_v49 = vld [vmem:[#allocation2 + $0xf4] ss:$8 sps:$4 sm:$0xff]  }
 0x5c1   :  { %4115 = vpow2.f32 %v1952_v43  ;;  %v1656_v57 = vsub.f32 %v5297_v40, %v1637_v50  ;;  %v1911_v16 = vpop.xlane.xlu0 %1910  ;;  %v4106_v30 = vpop.eup %4105  ;;  %2309 = vmatprep.subr.bf16.mxu1 %v3911_v45  ;;  %v3923_v43 = vld [vmem:[#allocation2 + $0x104] ss:$8 sps:$4 sm:$0xff]   ;;  %v3921_v50 = vld [vmem:[#allocation2 + $0x100] ss:$8 sps:$4 sm:$0xff]  }
 0x5c2   :  { %v1927_v52 = vsub.f32 %v5300_v44, %v1911_v16  ;;  %2081 = vmatmul.mubr.bf16.gmra.mrb[64].mxu0 %v1744_v29  ;;  %2310 = vmatpush1.bf16.msra.mxu1 %v3909_v26  ;;  %v3926_v29 = vld [vmem:[#allocation2 + $0x114] ss:$8 sps:$4 sm:$0xff]  }
 0x5c3   :  { %v4108_v19 = vpop.eup %4107  ;;  %v1684_v18 = vmul.f32 1.442695, %v1656_v57  ;;  %2311 = vmatprep.subr.bf16.mxu1 %v3914_v62 }
 0x5c4   :  { %v1958_v3 = vmul.f32 1.442695, %v1927_v52  ;;  %1714 = vadd.xlane.f32.xlu0 %v4106_v30  ;;  %1976 = vadd.xlane.f32.xlu1 %v4100_v48  ;;  %v1909_v32 = vpop.xlane.xlu1 %1908  ;;  %v2013_v39 = vpack.c.bf16 %v4104_v22, %v4108_v19 }
 0x5c5   :  { %4117 = vpow2.f32 %v1684_v18  ;;  %v1926_v28 = vsub.f32 %v5305_v2, %v1909_v32  ;;  %v1643_v38 = vpop.xlane.xlu0 %1642 }
 0x5c6   :  { %2088 = vmatprep.mubr.bf16.mxu0 %v2013_v39  ;;  %v1659_v44 = vsub.f32 %v5309_v37, %v1643_v38  ;;  %4119 = vpow2.f32 %v1958_v3  ;;  %2312 = vmatpush1.bf16.msra.mxu1 %v3912_v12 }
 0x5c7   :  { %v4110_v40 = vpop.eup %4109  ;;  %v1956_v56 = vmul.f32 1.442695, %v1926_v28  ;;  %2313 = vmatprep.subr.bf16.mxu1 %v3917_v41  ;;  %v2147_v28 = vsub.s32 2, %v4467_v34 }
 0x5c8   :  { %1982 = vadd.xlane.f32.xlu0 %v4104_v22  ;;  %1712 = vadd.xlane.f32.xlu1 %v4110_v40  ;;  %v1641_v61 = vpop.xlane.xlu1 %1640  ;;  %v1745_v23 = vpack.c.bf16 %v4106_v30, %v4110_v40  ;;  %v4112_v14 = vpop.eup %4111  ;;  %v1690_v9 = vmul.f32 1.442695, %v1659_v44  ;;  %v3924_v22 = vld [vmem:[#allocation2 + $0x110] ss:$8 sps:$4 sm:$0xff]  }
 0x5c9   :  { %4121 = vpow2.f32 %v1956_v56  ;;  %v1658_v24 = vsub.f32 %v5313_v15, %v1641_v61  ;;  %v4114_v4 = vpop.eup %4113  ;;  %v2167_v56 = vsub.s32 3, %v4467_v34 }
 0x5ca   :  { %2089 = vmatmul.mubr.bf16.gmra.mrb[68].mxu0 %v1745_v23  ;;  %4123 = vpow2.f32 %v1690_v9  ;;  %2314 = vmatpush1.bf16.msra.mxu1 %v3915_v10 }
 0x5cb   :  { %v4116_v2 = vpop.eup %4115  ;;  %v1688_v42 = vmul.f32 1.442695, %v1658_v24  ;;  %2315 = vmatprep.subr.bf16.mxu1 %v3920_v49  ;;  %v4319_v24 = vld [vmem:[%s5895_s3] sm:$0xff] }
 0x5cc   :  { %1718 = vadd.xlane.f32.xlu0 %v4114_v4  ;;  %1980 = vadd.xlane.f32.xlu1 %v4108_v19  ;;  %v2014_v37 = vpack.c.bf16 %v4112_v14, %v4116_v2 }
 0x5cd   :  { %4125 = vpow2.f32 %v1688_v42 }
 0x5ce   :  { %2096 = vmatprep.mubr.bf16.mxu0 %v2014_v37  ;;  %2316 = vmatpush1.bf16.msra.mxu1 %v3918_v5 }
 0x5cf   :  { %v4118_v13 = vpop.eup %4117  ;;  %2317 = vmatprep.subr.bf16.mxu1 %v3923_v43 }
 0x5d0   :  { %1986 = vadd.xlane.f32.xlu0 %v4112_v14  ;;  %1716 = vadd.xlane.f32.xlu1 %v4118_v13  ;;  %v1746_v8 = vpack.c.bf16 %v4114_v4, %v4118_v13  ;;  %v4120_v47 = vpop.eup %4119  ;;  %v5353_v4 = vrot.slane %v4319_v24, %v2147_v28  ;;  %v5357_v13 = vrot.slane %v4319_v24, %v2167_v56 }
 0x5d2   :  { %2097 = vmatmul.mubr.bf16.gmra.mrb[72].mxu0 %v1746_v8  ;;  %2318 = vmatpush1.bf16.msra.mxu1 %v3921_v50 }
 0x5d3   :  { %v4122_v15 = vpop.eup %4121  ;;  %2319 = vmatprep.subr.bf16.mxu1 %v3926_v29 }
 0x5d4   :  { %1984 = vadd.xlane.f32.xlu1 %v4116_v2  ;;  %v2015_v36 = vpack.c.bf16 %v4120_v47, %v4122_v15  ;;  %v4124_v59 = vpop.eup %4123 }
 0x5d5   :  { %1722 = vadd.xlane.f32.xlu0 %v4124_v59 }
 0x5d6   :  { %2104 = vmatprep.mubr.bf16.mxu0 %v2015_v36  ;;  %2320 = vmatpush1.bf16.msra.mxu1 %v3924_v22 }
 0x5d7   :  { %v4126_v48 = vpop.eup %4125 }
 0x5d8   :  { %1720 = vadd.xlane.f32.xlu1 %v4126_v48  ;;  %v1747_v53 = vpack.c.bf16 %v4124_v59, %v4126_v48 }
 0x5d9   :  { %1990 = vadd.xlane.f32.xlu0 %v4120_v47 }
 0x5da   :  { %2105 = vmatmul.mubr.bf16.gmra.mrb[76].mxu0 %v1747_v53 }
 0x5dc   :  { %1988 = vadd.xlane.f32.xlu1 %v4122_v15 }
 0x61d   :  { %v1693_v57 = vpop.xlane.xlu1 %1692 }
 0x621   :  { %v1695_v16 = vpop.xlane.xlu0 %1694  ;;  %v1961_v30 = vpop.xlane.xlu1 %1960 }
 0x622   :  { %4127 = vrcp.f32 %v1961_v30 }
 0x623   :  { %4129 = vrcp.f32 %v1693_v57 }
 0x625   :  { %v1963_v52 = vpop.xlane.xlu0 %1962 }
 0x626   :  { %4131 = vrcp.f32 %v1963_v52 }
 0x627   :  { %4133 = vrcp.f32 %v1695_v16 }
 0x629   :  { %v1697_v19 = vpop.xlane.xlu1 %1696 }
 0x62c   :  { %v4128_v40 = vpop.eup %4127 }
 0x62d   :  { %v1965_v51 = vpop.xlane.xlu1 %1964  ;;  %v4130_v23 = vpop.eup %4129 }
 0x62e   :  { %v2113_v31 = vsel %vm413_vm1, %v4130_v23, %v4128_v40  ;;  %4135 = vrcp.f32 %v1965_v51 }
 0x62f   :  { %4137 = vrcp.f32 %v1697_v19 }
 0x630   :  { %v4132_v9 = vpop.eup %4131 }
 0x631   :  { %v1699_v18 = vpop.xlane.xlu0 %1698  ;;  %v4134_v37 = vpop.eup %4133 }
 0x632   :  { %v2114_v26 = vsel %vm413_vm1, %v4134_v37, %v4132_v9 }
 0x635   :  { %v1967_v54 = vpop.xlane.xlu0 %1966 }
 0x636   :  { %4139 = vrcp.f32 %v1967_v54 }
 0x637   :  { %4141 = vrcp.f32 %v1699_v18 }
 0x638   :  { %v4136_v43 = vpop.eup %4135 }
 0x639   :  { %v1703_v32 = vpop.xlane.xlu0 %1702  ;;  %v4138_v29 = vpop.eup %4137 }
 0x63a   :  { %v2115_v18 = vsel %vm413_vm1, %v4138_v29, %v4136_v43 }
 0x63d   :  { %v1701_v3 = vpop.xlane.xlu1 %1700  ;;  %v1971_v38 = vpop.xlane.xlu0 %1970 }
 0x640   :  { %v4140_v16 = vpop.eup %4139 }
 0x641   :  { %v1969_v39 = vpop.xlane.xlu1 %1968  ;;  %v1707_v8 = vpop.xlane.xlu0 %1706 }
 0x642   :  { %4143 = vrcp.f32 %v1969_v39  ;;  %v4142_v54 = vpop.eup %4141 }
 0x643   :  { %4145 = vrcp.f32 %v1971_v38  ;;  %v2116_v56 = vsel %vm413_vm1, %v4142_v54, %v4140_v16 }
 0x644   :  { %4147 = vrcp.f32 %v1701_v3 }
 0x645   :  { %v1705_v44 = vpop.xlane.xlu1 %1704  ;;  %v1975_v12 = vpop.xlane.xlu0 %1974  ;;  %4149 = vrcp.f32 %v1703_v32 }
 0x649   :  { %v1973_v45 = vpop.xlane.xlu1 %1972  ;;  %v1711_v22 = vpop.xlane.xlu0 %1710 }
 0x64a   :  { %4151 = vrcp.f32 %v1973_v45 }
 0x64b   :  { %4153 = vrcp.f32 %v1975_v12 }
 0x64c   :  { %v4144_v3 = vpop.eup %4143  ;;  %4155 = vrcp.f32 %v1705_v44 }
 0x64d   :  { %v1709_v10 = vpop.xlane.xlu1 %1708  ;;  %v1979_v23 = vpop.xlane.xlu0 %1978  ;;  %4157 = vrcp.f32 %v1707_v8 }
 0x651   :  { %v1977_v19 = vpop.xlane.xlu1 %1976  ;;  %v1715_v32 = vpop.xlane.xlu0 %1714 }
 0x652   :  { %4159 = vrcp.f32 %v1977_v19 }
 0x653   :  { %4161 = vrcp.f32 %v1979_v23 }
 0x654   :  { %4163 = vrcp.f32 %v1709_v10 }
 0x655   :  { %v1713_v9 = vpop.xlane.xlu1 %1712  ;;  %4165 = vrcp.f32 %v1711_v22 }
 0x669   :  { %v3596_v61 = vpop.f32.mrb[48].mxu0 }
 0x66a   :  { %v3597_v14 = vpop.f32.mrb[49].mxu0 }
 0x66b   :  { %v3598_v2 = vadd.f32 %v3597_v14, %v3596_v61  ;;  %v3599_v42 = vpop.f32.mrb[50].mxu0 }
 0x66c   :  { %v3600_v0 = vpop.f32.mrb[51].mxu0 }
 0x66d   :  { %v2129_v47 = vmul.f32 %v3598_v2, %v2113_v31  ;;  %v3601_v15 = vadd.f32 %v3600_v0, %v3599_v42  ;;  %v4146_v0 = vpop.eup %4145 }
 0x66f   :  { %v2149_v36 = vmul.f32 %v5353_v4, %v2129_v47  ;;  %v2130_v59 = vmul.f32 %v3601_v15, %v2114_v26  ;;  %v4148_v47 = vpop.eup %4147 }
 0x670   :  { %v2117_v45 = vsel %vm413_vm1, %v4148_v47, %v4144_v3 }
 0x671   :  { %v2169_v48 = vadd.f32 %v5357_v13, %v2149_v36  ;;  %v2150_v53 = vmul.f32 %v5353_v4, %v2130_v59  ;;  %v1981_v59 = vpop.xlane.xlu1 %1980 }
 0x672   :  { %4167 = vrcp.f32 %v1981_v59 }
 0x673   :  { %v2170_v62 = vadd.f32 %v5357_v13, %v2150_v53  ;;  %v2185_v41 = vmax.f32 %v2169_v48, 0.0  ;;  %v4150_v53 = vpop.eup %4149 }
 0x674   :  { %v2118_v44 = vsel %vm413_vm1, %v4150_v53, %v4146_v0 }
 0x675   :  { %v2186_v5 = vmax.f32 %v2170_v62, 0.0  ;;  %v1717_v16 = vpop.xlane.xlu1 %1716 }
 0x677   :  { %v2217_v49 = vpack.c.bf16 %v2186_v5, %v2185_v41  ;;  %v1983_v5 = vpop.xlane.xlu0 %1982 }
 0x678   :  { %4169 = vrcp.f32 %v1983_v5 }
 0x679   :  { %v3602_v50 = vpop.f32.mrb[52].mxu0  ;;  %2338 = vmatmul.mubr.bf16.vlgmr.msra.gmra.mrb[64].mxu1 %v2217_v49  ;;  %v4152_v49 = vpop.eup %4151  ;;  %4171 = vrcp.f32 %v1713_v9 }
 0x67a   :  { %v3603_v57 = vpop.f32.mrb[53].mxu0  ;;  %2347 = vmatprep.mubr.bf16.mxu1 %v5946_v46  ;;  %v1985_v3 = vpop.xlane.xlu1 %1984  ;;  %4173 = vrcp.f32 %v1715_v32 }
 0x67b   :  { %v3604_v30 = vadd.f32 %v3603_v57, %v3602_v50  ;;  %v3605_v52 = vpop.f32.mrb[54].mxu0  ;;  %v4154_v57 = vpop.eup %4153  ;;  %4175 = vrcp.f32 %v1985_v3 }
 0x67c   :  { %v3606_v51 = vpop.f32.mrb[55].mxu0  ;;  %v1719_v23 = vpop.xlane.xlu0 %1718 }
 0x67d   :  { %v2131_v28 = vmul.f32 %v3604_v30, %v2115_v18  ;;  %v3607_v40 = vadd.f32 %v3606_v51, %v3605_v52  ;;  %v4156_v52 = vpop.eup %4155 }
 0x67e   :  { %v2119_v54 = vsel %vm413_vm1, %v4156_v52, %v4152_v49 }
 0x67f   :  { %v2151_v39 = vmul.f32 %v5353_v4, %v2131_v28  ;;  %v2132_v61 = vmul.f32 %v3607_v40, %v2116_v56  ;;  %v4158_v40 = vpop.eup %4157 }
 0x681   :  { %v2152_v14 = vmul.f32 %v5353_v4, %v2132_v61  ;;  %v2171_v38 = vadd.f32 %v5357_v13, %v2151_v39 }
 0x683   :  { %v2172_v24 = vadd.f32 %v5357_v13, %v2152_v14  ;;  %v2187_v42 = vmax.f32 %v2171_v38, 0.0  ;;  %v2120_v14 = vsel %vm413_vm1, %v4158_v40, %v4154_v57 }
 0x685   :  { %v3608_v2 = vpop.f32.mrb[56].mxu0  ;;  %v2188_v31 = vmax.f32 %v2172_v24, 0.0 }
 0x686   :  { %v3609_v37 = vpop.f32.mrb[57].mxu0 }
 0x687   :  { %v3610_v15 = vadd.f32 %v3609_v37, %v3608_v2  ;;  %v3611_v26 = vpop.f32.mrb[58].mxu0  ;;  %v2218_v36 = vpack.c.bf16 %v2188_v31, %v2187_v42  ;;  %v4160_v2 = vpop.eup %4159 }
 0x688   :  { %v3612_v48 = vpop.f32.mrb[59].mxu0  ;;  %v4162_v37 = vpop.eup %4161 }
 0x689   :  { %v2133_v12 = vmul.f32 %v3610_v15, %v2117_v45  ;;  %v3613_v62 = vadd.f32 %v3612_v48, %v3611_v26  ;;  %2348 = vmatmul.mubr.bf16.gmra.mrb[68].mxu1 %v2218_v36  ;;  %v4164_v15 = vpop.eup %4163  ;;  %v1987_v45 = vpop.xlane.xlu0 %1986 }
 0x68a   :  { %2357 = vmatprep.mubr.bf16.mxu1 %v5946_v46  ;;  %v2121_v9 = vsel %vm413_vm1, %v4164_v15, %v4160_v2  ;;  %v4166_v53 = vpop.eup %4165  ;;  %4177 = vrcp.f32 %v1987_v45 }
 0x68b   :  { %v2153_v8 = vmul.f32 %v5353_v4, %v2133_v12  ;;  %v2134_v41 = vmul.f32 %v3613_v62, %v2118_v44  ;;  %v2122_v5 = vsel %vm413_vm1, %v4166_v53, %v4162_v37  ;;  %4179 = vrcp.f32 %v1717_v16 }
 0x68c   :  { %4181 = vrcp.f32 %v1719_v23 }
 0x68d   :  { %v2154_v43 = vmul.f32 %v5353_v4, %v2134_v41  ;;  %v3614_v50 = vpop.f32.mrb[60].mxu0  ;;  %v2173_v29 = vadd.f32 %v5357_v13, %v2153_v8  ;;  %v1721_v41 = vpop.xlane.xlu1 %1720 }
 0x68e   :  { %v3615_v30 = vpop.f32.mrb[61].mxu0 }
 0x68f   :  { %v3616_v18 = vadd.f32 %v3615_v30, %v3614_v50  ;;  %v3617_v51 = vpop.f32.mrb[62].mxu0  ;;  %v2174_v19 = vadd.f32 %v5357_v13, %v2154_v43  ;;  %v2189_v39 = vmax.f32 %v2173_v29, 0.0  ;;  %v1723_v50 = vpop.xlane.xlu0 %1722 }
 0x690   :  { %v3618_v28 = vpop.f32.mrb[63].mxu0  ;;  %v4168_v29 = vpop.eup %4167 }
 0x691   :  { %v2135_v10 = vmul.f32 %v3616_v18, %v2119_v54  ;;  %v3619_v56 = vadd.f32 %v3618_v28, %v3617_v51  ;;  %v2190_v61 = vmax.f32 %v2174_v19, 0.0  ;;  %v4170_v18 = vpop.eup %4169 }
 0x692   :  { %v4172_v19 = vpop.eup %4171 }
 0x693   :  { %v2155_v22 = vmul.f32 %v5353_v4, %v2135_v10  ;;  %v2136_v38 = vmul.f32 %v3619_v56, %v2120_v14  ;;  %v2219_v24 = vpack.c.bf16 %v2190_v61, %v2189_v39  ;;  %v1989_v10 = vpop.xlane.xlu1 %1988  ;;  %v2123_v16 = vsel %vm413_vm1, %v4172_v19, %v4168_v29  ;;  %v4174_v39 = vpop.eup %4173 }
 0x694   :  { %v2124_v3 = vsel %vm413_vm1, %v4174_v39, %v4170_v18  ;;  %4183 = vrcp.f32 %v1989_v10 }
 0x695   :  { %v2156_v42 = vmul.f32 %v5353_v4, %v2136_v38  ;;  %v3620_v31 = vpop.f32.mrb[64].mxu0  ;;  %2358 = vmatmul.mubr.bf16.gmra.mrb[72].mxu1 %v2219_v24  ;;  %v2175_v0 = vadd.f32 %v5357_v13, %v2155_v22  ;;  %v1991_v24 = vpop.xlane.xlu0 %1990  ;;  %4185 = vrcp.f32 %v1721_v41 }
 0x696   :  { %v3621_v47 = vpop.f32.mrb[65].mxu0  ;;  %2367 = vmatprep.mubr.bf16.mxu1 %v5946_v46  ;;  %4187 = vrcp.f32 %v1991_v24 }
 0x697   :  { %v3622_v26 = vadd.f32 %v3621_v47, %v3620_v31  ;;  %v3623_v36 = vpop.f32.mrb[66].mxu0  ;;  %v2176_v59 = vadd.f32 %v5357_v13, %v2156_v42  ;;  %v2191_v44 = vmax.f32 %v2175_v0, 0.0  ;;  %v4176_v31 = vpop.eup %4175  ;;  %4189 = vrcp.f32 %v1723_v50 }
 0x698   :  { %v3624_v48 = vpop.f32.mrb[67].mxu0  ;;  %v4178_v15 = vpop.eup %4177 }
 0x699   :  { %v2137_v12 = vmul.f32 %v3622_v26, %v2121_v9  ;;  %v3625_v62 = vadd.f32 %v3624_v48, %v3623_v36  ;;  %v2192_v8 = vmax.f32 %v2176_v59, 0.0  ;;  %v4180_v36 = vpop.eup %4179 }
 0x69a   :  { %v2125_v48 = vsel %vm413_vm1, %v4180_v36, %v4176_v31 }
 0x69b   :  { %v2157_v32 = vmul.f32 %v5353_v4, %v2137_v12  ;;  %v2138_v49 = vmul.f32 %v3625_v62, %v2122_v5  ;;  %v2220_v43 = vpack.c.bf16 %v2192_v8, %v2191_v44  ;;  %v4182_v12 = vpop.eup %4181 }
 0x69c   :  { %v2126_v5 = vsel %vm413_vm1, %v4182_v12, %v4178_v15 }
 0x69d   :  { %v2158_v57 = vmul.f32 %v5353_v4, %v2138_v49  ;;  %v3626_v30 = vpop.f32.mrb[68].mxu0  ;;  %2368 = vmatmul.mubr.bf16.gmra.mrb[76].mxu1 %v2220_v43  ;;  %v2177_v52 = vadd.f32 %v5357_v13, %v2157_v32 }
 0x69e   :  { %v3627_v51 = vpop.f32.mrb[69].mxu0  ;;  %2377 = vmatprep.mubr.bf16.mxu1 %v5946_v46  ;;  %v4184_v50 = vpop.eup %4183 }
 0x69f   :  { %v3628_v54 = vadd.f32 %v3627_v51, %v3626_v30  ;;  %v3629_v28 = vpop.f32.mrb[70].mxu0  ;;  %v2178_v40 = vadd.f32 %v5357_v13, %v2158_v57  ;;  %v2193_v22 = vmax.f32 %v2177_v52, 0.0  ;;  %v4186_v52 = vpop.eup %4185 }
 0x6a0   :  { %v3630_v56 = vpop.f32.mrb[71].mxu0  ;;  %v4188_v51 = vpop.eup %4187 }
 0x6a1   :  { %v2139_v61 = vmul.f32 %v3628_v54, %v2123_v16  ;;  %v3631_v14 = vadd.f32 %v3630_v56, %v3629_v28  ;;  %v2194_v38 = vmax.f32 %v2178_v40, 0.0  ;;  %v2127_v40 = vsel %vm413_vm1, %v4186_v52, %v4184_v50  ;;  %v4190_v16 = vpop.eup %4189 }
 0x6a3   :  { %v2159_v23 = vmul.f32 %v5353_v4, %v2139_v61  ;;  %v2140_v2 = vmul.f32 %v3631_v14, %v2124_v3  ;;  %v2221_v42 = vpack.c.bf16 %v2194_v38, %v2193_v22  ;;  %v2128_v22 = vsel %vm413_vm1, %v4190_v16, %v4188_v51 }
 0x6a5   :  { %v2160_v0 = vmul.f32 %v5353_v4, %v2140_v2  ;;  %v3632_v37 = vpop.f32.mrb[72].mxu0  ;;  %2378 = vmatmul.mubr.bf16.gmra.mrb[80].mxu1 %v2221_v42  ;;  %v2179_v47 = vadd.f32 %v5357_v13, %v2159_v23 }
 0x6a6   :  { %v3633_v26 = vpop.f32.mrb[73].mxu0  ;;  %2387 = vmatprep.mubr.bf16.mxu1 %v5946_v46 }
 0x6a7   :  { %v3634_v59 = vadd.f32 %v3633_v26, %v3632_v37  ;;  %v3635_v45 = vpop.f32.mrb[74].mxu0  ;;  %v2180_v9 = vadd.f32 %v5357_v13, %v2160_v0  ;;  %v2195_v8 = vmax.f32 %v2179_v47, 0.0 }
 0x6a8   :  { %v3636_v53 = vpop.f32.mrb[75].mxu0 }
 0x6a9   :  { %v2141_v62 = vmul.f32 %v3634_v59, %v2125_v48  ;;  %v3637_v44 = vadd.f32 %v3636_v53, %v3635_v45  ;;  %v2196_v41 = vmax.f32 %v2180_v9, 0.0 }
 0x6ab   :  { %v2161_v32 = vmul.f32 %v5353_v4, %v2141_v62  ;;  %v2142_v49 = vmul.f32 %v3637_v44, %v2126_v5  ;;  %v2222_v43 = vpack.c.bf16 %v2196_v41, %v2195_v8 }
 0x6ad   :  { %v2162_v29 = vmul.f32 %v5353_v4, %v2142_v49  ;;  %v3638_v57 = vpop.f32.mrb[76].mxu0  ;;  %2388 = vmatmul.mubr.bf16.gmra.mrb[84].mxu1 %v2222_v43  ;;  %v2181_v30 = vadd.f32 %v5357_v13, %v2161_v32 }
 0x6ae   :  { %v3639_v18 = vpop.f32.mrb[77].mxu0  ;;  %2397 = vmatprep.mubr.bf16.mxu1 %v5946_v46 }
 0x6af   :  { %v3640_v19 = vadd.f32 %v3639_v18, %v3638_v57  ;;  %v3641_v54 = vpop.f32.mrb[78].mxu0  ;;  %v2182_v28 = vadd.f32 %v5357_v13, %v2162_v29  ;;  %v2197_v61 = vmax.f32 %v2181_v30, 0.0 }
 0x6b0   :  { %v3642_v10 = vpop.f32.mrb[79].mxu0 }
 0x6b1   :  { %v2143_v56 = vmul.f32 %v3640_v19, %v2127_v40  ;;  %v3643_v39 = vadd.f32 %v3642_v10, %v3641_v54  ;;  %v2198_v14 = vmax.f32 %v2182_v28, 0.0 }
 0x6b3   :  { %v2163_v38 = vmul.f32 %v5353_v4, %v2143_v56  ;;  %v2144_v24 = vmul.f32 %v3643_v39, %v2128_v22  ;;  %v2223_v3 = vpack.c.bf16 %v2198_v14, %v2197_v61 }
 0x6b5   :  { %v2164_v23 = vmul.f32 %v5353_v4, %v2144_v24  ;;  %2398 = vmatmul.mubr.bf16.gmra.mrb[88].mxu1 %v2223_v3  ;;  %v2183_v2 = vadd.f32 %v5357_v13, %v2163_v38  ;;  %v2463_v4 = vsel %vm2462_vm10, 65537, %v5946_v46 }
 0x6b6   :  { %2407 = vmatprep.mubr.bf16.mxu1 %v5946_v46  ;;  %v2467_v47 = vrot.slane %v2463_v4, %v4473_v35 }
 0x6b7   :  { %v2184_v42 = vadd.f32 %v5357_v13, %v2164_v23  ;;  %v2199_v31 = vmax.f32 %v2183_v2, 0.0  ;;  %v2482_v13 = vsel %vm2481_vm11, 65537, %v5946_v46 }
 0x6b8   :  { %v2486_v15 = vrot.slane %v2482_v13, %v4473_v35  ;;  %vm5442_vm12 = vcmp.ne.s16.totalorder %v2467_v47, 0 }
 0x6b9   :  { %v2200_v0 = vmax.f32 %v2184_v42, 0.0 }
 0x6ba   :  { %vm5446_vm13 = vcmp.ne.s16.totalorder %v2486_v15, 0 }
 0x6bb   :  { %v2224_v37 = vpack.c.bf16 %v2200_v0, %v2199_v31 }
 0x6bd   :  { %2408 = vmatmul.mubr.bf16.gmra.mrb[92].mxu1 %v2224_v37 }
 0x74c   :  { %v2339_v26 = vpop.f32.mrb[64].mxu1 }
 0x74d   :  { %v5439_v36 = vpop.f32.mrb[65].mxu1 }
 0x74e   :  { %2781 = vperm.xlu1 %3842, %v5439_v36   ;;  %v2343_v59 = vpop.f32.mrb[66].mxu1 }
 0x74f   :  { %v2450_v48 = vpack.c.bf16 %v2343_v59, %v2339_v26  ;;  %v5450_v46 = vpop.f32.mrb[67].mxu1 }
 0x750   :  { %2785 = vperm.xlu0 %3844, %v5450_v46  }
 0x751   :  { %v2469_v53 = vsel %vm5442_vm12, %v2450_v48, 0  ;;  %3792 = vmatprep.subr.msk.bf16.mxu0 %vm5446_vm13, %v2450_v48 }
 0x752   :  { %3843 = vset.pattern.permute.xlu1 %v5948_v7  ;;  %3645 = vmatpush3.bf16.msra.mxu0 %v2469_v53 }
 0x753   :  { %2498 = vperm.xlu1 %3843, %v5439_v36  }
 0x757   :  { %2503 = vperm.xlu1 %3843, %v5450_v46  }
 0x75b   :  { %3845 = vset.pattern.permute.xlu1 %v5947_v27 }
 0x75c   :  { %v2349_v12 = vpop.f32.mrb[68].mxu1 }
 0x75d   :  { %v5461_v62 = vpop.f32.mrb[69].mxu1 }
 0x75e   :  { %2789 = vperm.xlu1 %3845, %v5461_v62   ;;  %v2353_v44 = vpop.f32.mrb[70].mxu1 }
 0x75f   :  { %v2451_v8 = vpack.c.bf16 %v2353_v44, %v2349_v12  ;;  %v5464_v41 = vpop.f32.mrb[71].mxu1 }
 0x761   :  { %v2470_v5 = vsel %vm5442_vm12, %v2451_v8, 0  ;;  %3793 = vmatprep.subr.msk.bf16.mxu0 %vm5446_vm13, %v2451_v8 }
 0x762   :  { %3846 = vset.pattern.permute.xlu1 %v5948_v7  ;;  %3647 = vmatpush3.bf16.msra.mxu0 %v2470_v5 }
 0x763   :  { %2508 = vperm.xlu1 %3846, %v5461_v62  }
 0x767   :  { %3847 = vset.pattern.permute.xlu1 %v5947_v27 }
 0x768   :  { %2793 = vperm.xlu1 %3847, %v5464_v41   ;;  %v2359_v32 = vpop.f32.mrb[72].mxu1 }
 0x769   :  { %v5474_v49 = vpop.f32.mrb[73].mxu1 }
 0x76a   :  { %v2363_v43 = vpop.f32.mrb[74].mxu1 }
 0x76b   :  { %v2452_v50 = vpack.c.bf16 %v2363_v43, %v2359_v32  ;;  %v5476_v29 = vpop.f32.mrb[75].mxu1 }
 0x76c   :  { %3848 = vset.pattern.permute.xlu1 %v5948_v7  ;;  %2801 = vperm.xlu0 %3844, %v5476_v29  }
 0x76d   :  { %v2471_v57 = vsel %vm5442_vm12, %v2452_v50, 0  ;;  %2513 = vperm.xlu1 %3848, %v5464_v41   ;;  %3794 = vmatprep.subr.msk.bf16.mxu0 %vm5446_vm13, %v2452_v50 }
 0x76e   :  { %3649 = vmatpush3.bf16.msra.mxu0 %v2471_v57 }
 0x770   :  { %3851 = vset.pattern.permute.xlu0 %v5948_v7  ;;  %v2369_v30 = vpop.f32.mrb[76].mxu1 }
 0x771   :  { %3849 = vset.pattern.permute.xlu1 %v5947_v27  ;;  %2523 = vperm.xlu0 %3851, %v5476_v29   ;;  %v5488_v52 = vpop.f32.mrb[77].mxu1 }
 0x772   :  { %2797 = vperm.xlu1 %3849, %v5474_v49   ;;  %v2373_v18 = vpop.f32.mrb[78].mxu1 }
 0x773   :  { %v2453_v51 = vpack.c.bf16 %v2373_v18, %v2369_v30  ;;  %v5491_v19 = vpop.f32.mrb[79].mxu1 }
 0x775   :  { %v2472_v54 = vsel %vm5442_vm12, %v2453_v51, 0  ;;  %2528 = vperm.xlu0 %3851, %v5488_v52   ;;  %3795 = vmatprep.subr.msk.bf16.mxu0 %vm5446_vm13, %v2453_v51 }
 0x776   :  { %3850 = vset.pattern.permute.xlu1 %v5948_v7  ;;  %3651 = vmatpush3.bf16.msra.mxu0 %v2472_v54 }
 0x777   :  { %2518 = vperm.xlu1 %3850, %v5474_v49  }
 0x778   :  { %v2379_v28 = vpop.f32.mrb[80].mxu1 }
 0x779   :  { %v2381_v40 = vpop.f32.mrb[81].mxu1 }
 0x77a   :  { %v2383_v10 = vpop.f32.mrb[82].mxu1 }
 0x77b   :  { %v2454_v16 = vpack.c.bf16 %v2383_v10, %v2379_v28  ;;  %3852 = vset.pattern.permute.xlu1 %v5947_v27  ;;  %v2385_v56 = vpop.f32.mrb[83].mxu1 }
 0x77c   :  { %2805 = vperm.xlu1 %3852, %v5488_v52  }
 0x77d   :  { %v2473_v39 = vsel %vm5442_vm12, %v2454_v16, 0  ;;  %3796 = vmatprep.subr.msk.bf16.mxu0 %vm5446_vm13, %v2454_v16 }
 0x77e   :  { %3653 = vmatpush3.bf16.msra.mxu0 %v2473_v39 }
 0x780   :  { %2809 = vperm.xlu1 %3852, %v5491_v19   ;;  %v2389_v61 = vpop.f32.mrb[84].mxu1 }
 0x781   :  { %v2391_v14 = vpop.f32.mrb[85].mxu1 }
 0x782   :  { %v2393_v22 = vpop.f32.mrb[86].mxu1 }
 0x783   :  { %v2455_v38 = vpack.c.bf16 %v2393_v22, %v2389_v61  ;;  %v2395_v24 = vpop.f32.mrb[87].mxu1 }
 0x784   :  { %3853 = vset.pattern.permute.xlu1 %v5948_v7 }
 0x785   :  { %v2474_v3 = vsel %vm5442_vm12, %v2455_v38, 0  ;;  %2533 = vperm.xlu1 %3853, %v5491_v19   ;;  %3797 = vmatprep.subr.msk.bf16.mxu0 %vm5446_vm13, %v2455_v38 }
 0x786   :  { %3655 = vmatpush3.bf16.msra.mxu0 %v2474_v3 }
 0x788   :  { %v2399_v23 = vpop.f32.mrb[88].mxu1 }
 0x789   :  { %3854 = vset.pattern.permute.xlu1 %v5947_v27  ;;  %v2401_v2 = vpop.f32.mrb[89].mxu1 }
 0x78a   :  { %2813 = vperm.xlu1 %3854, %v2381_v40   ;;  %v2403_v42 = vpop.f32.mrb[90].mxu1 }
 0x78b   :  { %v2456_v31 = vpack.c.bf16 %v2403_v42, %v2399_v23  ;;  %v2405_v0 = vpop.f32.mrb[91].mxu1 }
 0x78d   :  { %v2475_v37 = vsel %vm5442_vm12, %v2456_v31, 0  ;;  %3798 = vmatprep.subr.msk.bf16.mxu0 %vm5446_vm13, %v2456_v31 }
 0x78e   :  { %3855 = vset.pattern.permute.xlu1 %v5948_v7  ;;  %3657 = vmatpush3.bf16.msra.mxu0 %v2475_v37 }
 0x78f   :  { %2538 = vperm.xlu1 %3855, %v2381_v40  }
 0x790   :  { %v2409_v4 = vpop.f32.mrb[92].mxu1 }
 0x791   :  { %v2411_v13 = vpop.f32.mrb[93].mxu1 }
 0x792   :  { %v2413_v47 = vpop.f32.mrb[94].mxu1 }
 0x793   :  { %v2457_v15 = vpack.c.bf16 %v2413_v47, %v2409_v4  ;;  %2418 = vxpose.xlu0.b32.start [1/16] (narrow) %v5439_v36, 8  ;;  %3856 = vset.pattern.permute.xlu1 %v5947_v27  ;;  %v2415_v26 = vpop.f32.mrb[95].mxu1 }
 0x794   :  { %2817 = vperm.xlu1 %3856, %v2385_v56  }
 0x795   :  { %v2476_v59 = vsel %vm5442_vm12, %v2457_v15, 0  ;;  %3799 = vmatprep.subr.msk.bf16.mxu0 %vm5446_vm13, %v2457_v15 }
 0x796   :  { %3659 = vmatpush3.bf16.msra.mxu0 %v2476_v59 }
 0x797   :  { %2419 = vxpose.xlu0.b32.cont [2/16] (narrow) %v5450_v46, 8 }
 0x798   :  { %3857 = vset.pattern.permute.xlu1 %v5948_v7 }
 0x799   :  { %2543 = vperm.xlu1 %3857, %v2385_v56  }
 0x79b   :  { %2420 = vxpose.xlu0.b32.cont [3/16] (narrow) %v5461_v62, 8 }
 0x79d   :  { %3858 = vset.pattern.permute.xlu1 %v5947_v27 }
 0x79e   :  { %2821 = vperm.xlu1 %3858, %v2391_v14  }
 0x79f   :  { %2421 = vxpose.xlu0.b32.cont [4/16] (narrow) %v5464_v41, 8 }
 0x7a2   :  { %3859 = vset.pattern.permute.xlu1 %v5948_v7 }
 0x7a3   :  { %2422 = vxpose.xlu0.b32.cont [5/16] (narrow) %v5474_v49, 8  ;;  %2548 = vperm.xlu1 %3859, %v2391_v14  }
 0x7a7   :  { %2423 = vxpose.xlu0.b32.cont [6/16] (narrow) %v5476_v29, 8  ;;  %3860 = vset.pattern.permute.xlu1 %v5947_v27 }
 0x7a8   :  { %2825 = vperm.xlu1 %3860, %v2395_v24  }
 0x7ab   :  { %2424 = vxpose.xlu0.b32.cont [7/16] (narrow) %v5488_v52, 8 }
 0x7ac   :  { %3861 = vset.pattern.permute.xlu1 %v5948_v7 }
 0x7ad   :  { %2553 = vperm.xlu1 %3861, %v2395_v24  }
 0x7af   :  { %2425 = vxpose.xlu0.b32.cont [8/16] (narrow) %v5491_v19, 8 }
 0x7b1   :  { %3862 = vset.pattern.permute.xlu1 %v5947_v27 }
 0x7b2   :  { %2829 = vperm.xlu1 %3862, %v2401_v2  }
 0x7b3   :  { %2426 = vxpose.xlu0.b32.cont [9/16] (narrow) %v2381_v40, 8 }
 0x7b6   :  { %3863 = vset.pattern.permute.xlu1 %v5948_v7 }
 0x7b7   :  { %2427 = vxpose.xlu0.b32.cont [10/16] (narrow) %v2385_v56, 8  ;;  %2558 = vperm.xlu1 %3863, %v2401_v2  }
 0x7bb   :  { %2428 = vxpose.xlu0.b32.cont [11/16] (narrow) %v2391_v14, 8  ;;  %3864 = vset.pattern.permute.xlu1 %v5947_v27 }
 0x7bc   :  { %2833 = vperm.xlu1 %3864, %v2405_v0  }
 0x7bf   :  { %2429 = vxpose.xlu0.b32.cont [12/16] (narrow) %v2395_v24, 8 }
 0x7c0   :  { %3865 = vset.pattern.permute.xlu1 %v5948_v7 }
 0x7c1   :  { %2563 = vperm.xlu1 %3865, %v2405_v0  }
 0x7c3   :  { %2430 = vxpose.xlu0.b32.cont [13/16] (narrow) %v2401_v2, 8 }
 0x7c5   :  { %3866 = vset.pattern.permute.xlu1 %v5947_v27 }
 0x7c6   :  { %2837 = vperm.xlu1 %3866, %v2411_v13  }
 0x7c7   :  { %2431 = vxpose.xlu0.b32.cont [14/16] (narrow) %v2405_v0, 8 }
 0x7ca   :  { %3867 = vset.pattern.permute.xlu1 %v5948_v7 }
 0x7cb   :  { %2432 = vxpose.xlu0.b32.cont [15/16] (narrow) %v2411_v13, 8  ;;  %2568 = vperm.xlu1 %3867, %v2411_v13  }
 0x7cd   :  { %v2782_v36 = vpop.permute.xlu1 %2781 }
 0x7cf   :  { %3868 = vset.pattern.permute.xlu1 %v5947_v27  ;;  %2433 = vxpose.xlu0.b32.end [16/16] (narrow) %v2415_v26, 8  ;;  %v2786_v41 = vpop.permute.xlu0 %2785 }
 0x7d0   :  { %2841 = vperm.xlu1 %3868, %v2415_v26  }
 0x7d2   :  { %v2499_v45 = vpop.permute.xlu1 %2498 }
 0x7d4   :  { %3869 = vset.pattern.permute.xlu1 %v5948_v7 }
 0x7d5   :  { %2573 = vperm.xlu1 %3869, %v2415_v26  }
 0x7d6   :  { %v2504_v9 = vpop.permute.xlu1 %2503 }
 0x7dd   :  { %v2790_v48 = vpop.permute.xlu1 %2789 }
 0x7e2   :  { %v2509_v46 = vpop.permute.xlu1 %2508 }
 0x7e7   :  { %v2794_v53 = vpop.permute.xlu1 %2793 }
 0x7eb   :  { %v5554_v32 = vpop.permute.xlu0 %2801 }
 0x7ec   :  { %v5545_v12 = vpop.permute.xlu1 %2513 }
 0x7f0   :  { %v2524_v49 = vpop.permute.xlu0 %2523 }
 0x7f1   :  { %v5547_v62 = vpop.permute.xlu1 %2797 }
 0x7f4   :  { %v5560_v29 = vpop.permute.xlu0 %2528 }
 0x7f6   :  { %v5549_v44 = vpop.permute.xlu1 %2518 }
 0x7f8   :  { %3870 = vset.pattern.permute.xlu0 %v5947_v27 }
 0x7fb   :  { %v5552_v8 = vpop.permute.xlu1 %2805 }
 0x7ff   :  { %v2810_v5 = vpop.permute.xlu1 %2809 }
 0x804   :  { %v2534_v7 = vpop.permute.xlu1 %2533 }
 0x809   :  { %v5556_v43 = vpop.permute.xlu1 %2813 }
 0x80e   :  { %v5558_v50 = vpop.permute.xlu1 %2538 }
 0x813   :  { %v2434_v57 = vpop.trf.xlu0  ;;  %v2818_v30 = vpop.permute.xlu1 %2817 }
 0x814   :  { %v5563_v52 = vrot.slane %v2434_v57, %v4473_v35  ;;  %v5566_v27 = vrot.slane %v2434_v57, %v4596_v58 }
 0x816   :  { %v2849_v18 = vadd.f32 %v5566_v27, %v2786_v41  ;;  %v2848_v51 = vadd.f32 %v5566_v27, %v2782_v36  ;;  %v2585_v19 = vadd.f32 %v5563_v52, %v2524_v49  ;;  %v2580_v54 = vadd.f32 %v5563_v52, %v2499_v45 }
 0x817   :  { %v2581_v28 = vadd.f32 %v5563_v52, %v2504_v9  ;;  %v2855_v40 = vadd.f32 %v5566_v27, %v2810_v5  ;;  %v2850_v38 = vadd.f32 %v5566_v27, %v2790_v48  ;;  %v2587_v24 = vadd.f32 %v5563_v52, %v2534_v7 }
 0x818   :  { %v2544_v10 = vpop.permute.xlu1 %2543  ;;  %v2865_v16 = vmul.f32 0.2, %v2849_v18  ;;  %v2864_v56 = vmul.f32 0.2, %v2848_v51  ;;  %v2601_v35 = vmul.f32 0.2, %v2585_v19  ;;  %v2857_v0 = vadd.f32 %v5566_v27, %v2818_v30 }
 0x819   :  { %v2596_v39 = vmul.f32 0.2, %v2580_v54  ;;  %v2597_v14 = vmul.f32 0.2, %v2581_v28  ;;  %v2871_v22 = vmul.f32 0.2, %v2855_v40  ;;  %v2582_v59 = vadd.f32 %v5563_v52, %v2509_v46 }
 0x81a   :  { %v2881_v61 = vmax.f32 %v2849_v18, %v2865_v16  ;;  %v2880_v58 = vmax.f32 %v2848_v51, %v2864_v56  ;;  %v2617_v2 = vmax.f32 %v2585_v19, %v2601_v35  ;;  %v2866_v13 = vmul.f32 0.2, %v2850_v38 }
 0x81b   :  { %v2612_v42 = vmax.f32 %v2580_v54, %v2596_v39  ;;  %v2613_v37 = vmax.f32 %v2581_v28, %v2597_v14  ;;  %v2887_v4 = vmax.f32 %v2855_v40, %v2871_v22  ;;  %v2603_v26 = vmul.f32 0.2, %v2587_v24 }
 0x81c   :  { %v5577_v3 = vadd.f32 %v4615_v6, %v2881_v61  ;;  %v5580_v23 = vadd.f32 %v4622_v11, %v2880_v58  ;;  %v5588_v47 = vadd.f32 %v4650_v60, %v2617_v2  ;;  %v2873_v45 = vmul.f32 0.2, %v2857_v0 }
 0x81d   :  { %v5582_v31 = vpop.permute.xlu1 %2821  ;;  %v5591_v15 = vadd.f32 %v4622_v11, %v2612_v42  ;;  %v2589_v9 = vadd.f32 %v5563_v52, %v2544_v10  ;;  %v5600_v48 = vadd.f32 %v4615_v6, %v2613_v37  ;;  %v2882_v41 = vmax.f32 %v2850_v38, %v2866_v13 }
 0x81e   :  { %2914 = vmax.xlane.f32.xlu0 %v5577_v3  ;;  %2912 = vmax.xlane.f32.xlu1 %v5580_v23  ;;  %v5603_v5 = vadd.f32 %v4681_v20, %v2887_v4  ;;  %v2619_v11 = vmax.f32 %v2587_v24, %v2603_v26  ;;  %v2598_v7 = vmul.f32 0.2, %v2582_v59  ;;  %v2851_v46 = vadd.f32 %v5566_v27, %v2794_v53 }
 0x81f   :  { %v2889_v49 = vmax.f32 %v2857_v0, %v2873_v45  ;;  %v2605_v57 = vmul.f32 0.2, %v2589_v9  ;;  %v5609_v18 = vadd.f32 %v4652_v63, %v2882_v41  ;;  %v2583_v6 = vadd.f32 %v5563_v52, %v5545_v12 }
 0x820   :  { %v5615_v19 = vadd.f32 %v4681_v20, %v2619_v11  ;;  %v2614_v54 = vmax.f32 %v2582_v59, %v2598_v7  ;;  %v2867_v53 = vmul.f32 0.2, %v2851_v46  ;;  %v2852_v10 = vadd.f32 %v5566_v27, %v5547_v62 }
 0x821   :  { %v2621_v28 = vmax.f32 %v2589_v9, %v2605_v57  ;;  %v5620_v40 = vadd.f32 %v4722_v25, %v2889_v49  ;;  %v2599_v35 = vmul.f32 0.2, %v2583_v6  ;;  %v2853_v62 = vadd.f32 %v5566_v27, %v5554_v32 }
 0x822   :  { %2654 = vmax.xlane.f32.xlu0 %v5588_v47  ;;  %2644 = vmax.xlane.f32.xlu1 %v5591_v15  ;;  %v5596_v36 = vpop.permute.xlu1 %2548  ;;  %v5625_v56 = vadd.f32 %v4652_v63, %v2614_v54  ;;  %v2883_v20 = vmax.f32 %v2851_v46, %v2867_v53  ;;  %v2868_v58 = vmul.f32 0.2, %v2852_v10  ;;  %v5958_v53 = vld [vmem:[#allocation5_spill] sm:$0xff] }
 0x823   :  { %v5631_v61 = vadd.f32 %v4722_v25, %v2621_v28  ;;  %v2615_v38 = vmax.f32 %v2583_v6, %v2599_v35  ;;  %v2869_v2 = vmul.f32 0.2, %v2853_v62  ;;  %v2584_v25 = vadd.f32 %v5563_v52, %v5549_v44 }
 0x824   :  { %v5636_v63 = vadd.f32 %v4624_v17, %v2883_v20  ;;  %v2884_v37 = vmax.f32 %v2852_v10, %v2868_v58  ;;  %v2858_v35 = vadd.f32 %v5566_v27, %v5582_v31 }
 0x825   :  { %v5643_v0 = vadd.f32 %v4624_v17, %v2615_v38  ;;  %v2600_v13 = vmul.f32 0.2, %v2584_v25  ;;  %v2885_v44 = vmax.f32 %v2853_v62, %v2869_v2  ;;  %v2854_v17 = vadd.f32 %v5566_v27, %v5552_v8  ;;  %v5959_v38 = vld [vmem:[#allocation6_spill] sm:$0xff] }
 0x826   :  { %2646 = vmax.xlane.f32.xlu1 %v5600_v48  ;;  %2926 = vmax.xlane.f32.xlu0 %v5603_v5  ;;  %v5651_v26 = vadd.f32 %v4683_v21, %v2884_v37  ;;  %v2856_v8 = vadd.f32 %v5566_v27, %v5556_v43 }
 0x827   :  { %v2826_v30 = vpop.permute.xlu1 %2825  ;;  %v2616_v9 = vmax.f32 %v2584_v25, %v2600_v13  ;;  %v5662_v11 = vadd.f32 %v4650_v60, %v2885_v44  ;;  %v2870_v7 = vmul.f32 0.2, %v2854_v17 }
 0x828   :  { %v2859_v51 = vadd.f32 %v5566_v27, %v2826_v30  ;;  %v2872_v10 = vmul.f32 0.2, %v2856_v8 }
 0x829   :  { %v5670_v30 = vadd.f32 %v4683_v21, %v2616_v9  ;;  %v2886_v6 = vmax.f32 %v2854_v17, %v2870_v7  ;;  %v2588_v21 = vadd.f32 %v5563_v52, %v5558_v50 }
 0x82a   :  { %2916 = vmax.xlane.f32.xlu1 %v5609_v18  ;;  %2658 = vmax.xlane.f32.xlu0 %v5615_v19  ;;  %v2875_v16 = vmul.f32 0.2, %v2859_v51  ;;  %v2888_v58 = vmax.f32 %v2856_v8, %v2872_v10 }
 0x82b   :  { %v5679_v28 = vadd.f32 %v5958_v53, %v2886_v6  ;;  %v2604_v62 = vmul.f32 0.2, %v2588_v21 }
 0x82c   :  { %v2554_v12 = vpop.permute.xlu1 %2553  ;;  %v2891_v14 = vmax.f32 %v2859_v51, %v2875_v16 }
 0x82d   :  { %v2591_v39 = vadd.f32 %v5563_v52, %v2554_v12  ;;  %v2620_v2 = vmax.f32 %v2588_v21, %v2604_v62 }
 0x82e   :  { %2648 = vmax.xlane.f32.xlu1 %v5625_v56  ;;  %2930 = vmax.xlane.f32.xlu0 %v5620_v40  ;;  %v5646_v32 = vadd.f32 %v4754_v1, %v2891_v14  ;;  %v2590_v14 = vadd.f32 %v5563_v52, %v5596_v36 }
 0x82f   :  { %v2607_v22 = vmul.f32 0.2, %v2591_v39  ;;  %v5703_v44 = vadd.f32 %v5959_v38, %v2620_v2 }
 0x830   :  { %v2606_v31 = vmul.f32 0.2, %v2590_v14 }
 0x831   :  { %v2830_v24 = vpop.permute.xlu1 %2829  ;;  %v2623_v42 = vmax.f32 %v2591_v39, %v2607_v22  ;;  %v2874_v22 = vmul.f32 0.2, %v2858_v35 }
 0x832   :  { %2918 = vmax.xlane.f32.xlu1 %v5636_v63  ;;  %2662 = vmax.xlane.f32.xlu0 %v5631_v61  ;;  %v2860_v37 = vadd.f32 %v5566_v27, %v2830_v24  ;;  %v2622_v36 = vmax.f32 %v2590_v14, %v2606_v31  ;;  %v5961_v24 = vld [vmem:[#allocation9_spill] sm:$0xff]  ;;  %v5963_v14 = vld [vmem:[#allocation10_spill] sm:$0xff] }
 0x833   :  { %v5654_v59 = vadd.f32 %v4754_v1, %v2623_v42  ;;  %v2586_v1 = vadd.f32 %v5563_v52, %v5560_v29  ;;  %v2890_v42 = vmax.f32 %v2858_v35, %v2874_v22 }
 0x835   :  { %v2602_v51 = vmul.f32 0.2, %v2586_v1 }
 0x836   :  { %2650 = vmax.xlane.f32.xlu1 %v5643_v0  ;;  %2934 = vmax.xlane.f32.xlu0 %v5646_v32  ;;  %v2559_v4 = vpop.permute.xlu1 %2558 }
 0x837   :  { %v2618_v43 = vmax.f32 %v2586_v1, %v2602_v51  ;;  %v2592_v9 = vadd.f32 %v5563_v52, %v2559_v4  ;;  %v5960_v1 = vld [vmem:[#allocation7_spill] sm:$0xff] }
 0x838   :  { %v5718_v4 = vadd.f32 %v5960_v1, %v2622_v36 }
 0x839   :  { %v5690_v39 = vadd.f32 %v5958_v53, %v2618_v43  ;;  %v2608_v51 = vmul.f32 0.2, %v2592_v9 }
 0x83a   :  { %2920 = vmax.xlane.f32.xlu1 %v5651_v26  ;;  %2666 = vmax.xlane.f32.xlu0 %v5654_v59 }
 0x83b   :  { %v2834_v45 = vpop.permute.xlu1 %2833  ;;  %v2624_v43 = vmax.f32 %v2592_v9, %v2608_v51 }
 0x83c   :  { %v2861_v41 = vadd.f32 %v5566_v27, %v2834_v45  ;;  %v2876_v45 = vmul.f32 0.2, %v2860_v37 }
 0x83e   :  { %v2877_v46 = vmul.f32 0.2, %v2861_v41  ;;  %2922 = vmax.xlane.f32.xlu1 %v5662_v11  ;;  %v2892_v6 = vmax.f32 %v2860_v37, %v2876_v45 }
 0x840   :  { %v2893_v49 = vmax.f32 %v2861_v41, %v2877_v46  ;;  %v2564_v57 = vpop.permute.xlu1 %2563  ;;  %v5708_v46 = vadd.f32 %v5960_v1, %v2890_v42 }
 0x841   :  { %v2593_v60 = vadd.f32 %v5563_v52, %v2564_v57 }
 0x842   :  { %2652 = vmax.xlane.f32.xlu1 %v5670_v30  ;;  %v5675_v54 = vadd.f32 %v4783_v55, %v2893_v49 }
 0x843   :  { %v2609_v29 = vmul.f32 0.2, %v2593_v60 }
 0x844   :  { %2938 = vmax.xlane.f32.xlu0 %v5675_v54 }
 0x845   :  { %v2625_v16 = vmax.f32 %v2593_v60, %v2609_v29  ;;  %v2838_v12 = vpop.permute.xlu1 %2837 }
 0x846   :  { %2924 = vmax.xlane.f32.xlu1 %v5679_v28  ;;  %v2862_v60 = vadd.f32 %v5566_v27, %v2838_v12 }
 0x847   :  { %v5685_v20 = vadd.f32 %v4783_v55, %v2625_v16  ;;  %v5697_v55 = vadd.f32 %v5959_v38, %v2888_v58  ;;  %v5962_v16 = vld [vmem:[#allocation8_spill] sm:$0xff] }
 0x848   :  { %v2878_v10 = vmul.f32 0.2, %v2862_v60  ;;  %v5726_v35 = vadd.f32 %v5962_v16, %v2892_v6  ;;  %v5731_v58 = vadd.f32 %v5962_v16, %v2624_v43 }
 0x849   :  { %2670 = vmax.xlane.f32.xlu0 %v5685_v20 }
 0x84a   :  { %2656 = vmax.xlane.f32.xlu1 %v5690_v39  ;;  %v2569_v50 = vpop.permute.xlu1 %2568 }
 0x84b   :  { %v2594_v21 = vadd.f32 %v5563_v52, %v2569_v50 }
 0x84d   :  { %v2610_v12 = vmul.f32 0.2, %v2594_v21 }
 0x84e   :  { %2928 = vmax.xlane.f32.xlu1 %v5697_v55 }
 0x84f   :  { %v2842_v25 = vpop.permute.xlu1 %2841  ;;  %v2626_v62 = vmax.f32 %v2594_v21, %v2610_v12 }
 0x850   :  { %v2863_v13 = vadd.f32 %v5566_v27, %v2842_v25  ;;  %v2894_v27 = vmax.f32 %v2862_v60, %v2878_v10 }
 0x852   :  { %v2879_v17 = vmul.f32 0.2, %v2863_v13  ;;  %2660 = vmax.xlane.f32.xlu1 %v5703_v44  ;;  %v5735_v22 = vadd.f32 %v5963_v14, %v2894_v27 }
 0x854   :  { %v2895_v41 = vmax.f32 %v2863_v13, %v2879_v17  ;;  %v2574_v7 = vpop.permute.xlu1 %2573 }
 0x855   :  { %v2595_v8 = vadd.f32 %v5563_v52, %v2574_v7  ;;  %v5739_v52 = vadd.f32 %v5963_v14, %v2626_v62 }
 0x856   :  { %2932 = vmax.xlane.f32.xlu1 %v5708_v46  ;;  %v5713_v49 = vadd.f32 %v5961_v24, %v2895_v41 }
 0x857   :  { %v2611_v57 = vmul.f32 0.2, %v2595_v8 }
 0x858   :  { %2942 = vmax.xlane.f32.xlu0 %v5713_v49 }
 0x859   :  { %v2627_v29 = vmax.f32 %v2595_v8, %v2611_v57 }
 0x85a   :  { %2664 = vmax.xlane.f32.xlu1 %v5718_v4 }
 0x85b   :  { %v5722_v53 = vadd.f32 %v5961_v24, %v2627_v29 }
 0x85d   :  { %2674 = vmax.xlane.f32.xlu0 %v5722_v53 }
 0x85e   :  { %2936 = vmax.xlane.f32.xlu1 %v5726_v35 }
 0x862   :  { %2668 = vmax.xlane.f32.xlu1 %v5731_v58 }
 0x866   :  { %2940 = vmax.xlane.f32.xlu1 %v5735_v22 }
 0x86a   :  { %2672 = vmax.xlane.f32.xlu1 %v5739_v52 }
 0x8ab   :  { %v2915_v50 = vpop.xlane.xlu0 %2914  ;;  %v2913_v38 = vpop.xlane.xlu1 %2912 }
 0x8ac   :  { %v2945_v2 = vsub.f32 %v5577_v3, %v2915_v50  ;;  %v2944_v31 = vsub.f32 %v5580_v23, %v2913_v38 }
 0x8ae   :  { %v2962_v25 = vmul.f32 1.442695, %v2945_v2  ;;  %v2960_v42 = vmul.f32 1.442695, %v2944_v31 }
 0x8af   :  { %v2645_v37 = vpop.xlane.xlu1 %2644  ;;  %v2655_v9 = vpop.xlane.xlu0 %2654 }
 0x8b0   :  { %4191 = vpow2.f32 %v2962_v25  ;;  %v2676_v13 = vsub.f32 %v5591_v15, %v2645_v37 }
 0x8b1   :  { %4193 = vpow2.f32 %v2960_v42 }
 0x8b2   :  { %v2692_v17 = vmul.f32 1.442695, %v2676_v13 }
 0x8b3   :  { %v2647_v36 = vpop.xlane.xlu1 %2646  ;;  %v2927_v23 = vpop.xlane.xlu0 %2926 }
 0x8b4   :  { %v2677_v45 = vsub.f32 %v5600_v48, %v2647_v36  ;;  %4195 = vpow2.f32 %v2692_v17  ;;  %v2951_v17 = vsub.f32 %v5603_v5, %v2927_v23 }
 0x8b6   :  { %v2694_v41 = vmul.f32 1.442695, %v2677_v45 }
 0x8b7   :  { %v2917_v7 = vpop.xlane.xlu1 %2916  ;;  %v2659_v43 = vpop.xlane.xlu0 %2658 }
 0x8b8   :  { %4197 = vpow2.f32 %v2694_v41  ;;  %v2946_v24 = vsub.f32 %v5609_v18, %v2917_v7  ;;  %v2683_v45 = vsub.f32 %v5615_v19, %v2659_v43  ;;  %v2974_v41 = vmul.f32 1.442695, %v2951_v17 }
 0x8ba   :  { %v4192_v1 = vpop.eup %4191  ;;  %v2964_v29 = vmul.f32 1.442695, %v2946_v24 }
 0x8bb   :  { %v4194_v3 = vpop.eup %4193  ;;  %v2649_v8 = vpop.xlane.xlu1 %2648 }
 0x8bc   :  { %v2678_v57 = vsub.f32 %v5625_v56, %v2649_v8  ;;  %v3040_v6 = vpack.c.bf16 %v4192_v1, %v4194_v3  ;;  %v2931_v62 = vpop.xlane.xlu0 %2930  ;;  %v2706_v8 = vmul.f32 1.442695, %v2683_v45 }
 0x8be   :  { %v2696_v15 = vmul.f32 1.442695, %v2678_v57  ;;  %3080 = vmatprep.mubr.bf16.mxu0 %v3040_v6  ;;  %v4196_v51 = vpop.eup %4195 }
 0x8bf   :  { %v2919_v60 = vpop.xlane.xlu1 %2918  ;;  %2724 = vadd.xlane.f32.xlu1 %v4196_v51 }
 0x8c0   :  { %v2947_v48 = vsub.f32 %v5636_v63, %v2919_v60  ;;  %4199 = vpow2.f32 %v2696_v15  ;;  %v2681_v63 = vsub.f32 %v5588_v47, %v2655_v9  ;;  %v2663_v42 = vpop.xlane.xlu0 %2662 }
 0x8c1   :  { %4201 = vpow2.f32 %v2964_v29  ;;  %v2685_v6 = vsub.f32 %v5631_v61, %v2663_v42 }
 0x8c2   :  { %v2966_v10 = vmul.f32 1.442695, %v2947_v48  ;;  %v4198_v21 = vpop.eup %4197  ;;  %v2702_v25 = vmul.f32 1.442695, %v2681_v63 }
 0x8c3   :  { %v2651_v16 = vpop.xlane.xlu1 %2650  ;;  %2992 = vadd.xlane.f32.xlu1 %v4194_v3  ;;  %2726 = vadd.xlane.f32.xlu0 %v4198_v21  ;;  %v2772_v56 = vpack.c.bf16 %v4198_v21, %v4196_v51 }
 0x8c4   :  { %v2679_v18 = vsub.f32 %v5643_v0, %v2651_v16  ;;  %4203 = vpow2.f32 %v2966_v10  ;;  %v2710_v10 = vmul.f32 1.442695, %v2685_v6 }
 0x8c5   :  { %3081 = vmatmul.mubr.bf16.vlgmr.msra.gmra.mrb[80].mxu0 %v2772_v56 }
 0x8c6   :  { %v2698_v27 = vmul.f32 1.442695, %v2679_v18 }
 0x8c7   :  { %v2921_v12 = vpop.xlane.xlu1 %2920  ;;  %2994 = vadd.xlane.f32.xlu0 %v4192_v1  ;;  %v2935_v1 = vpop.xlane.xlu0 %2934 }
 0x8c8   :  { %v2948_v14 = vsub.f32 %v5651_v26, %v2921_v12  ;;  %4205 = vpow2.f32 %v2698_v27  ;;  %v2955_v18 = vsub.f32 %v5646_v32, %v2935_v1 }
 0x8ca   :  { %v4200_v50 = vpop.eup %4199  ;;  %v2968_v38 = vmul.f32 1.442695, %v2948_v14 }
 0x8cb   :  { %v2923_v2 = vpop.xlane.xlu1 %2922  ;;  %2728 = vadd.xlane.f32.xlu1 %v4200_v50  ;;  %v4202_v0 = vpop.eup %4201 }
 0x8cc   :  { %v2949_v31 = vsub.f32 %v5662_v11, %v2923_v2  ;;  %4207 = vpow2.f32 %v2968_v38  ;;  %v2667_v51 = vpop.xlane.xlu0 %2666 }
 0x8ce   :  { %v2970_v37 = vmul.f32 1.442695, %v2949_v31  ;;  %v4204_v13 = vpop.eup %4203 }
 0x8cf   :  { %v2653_v36 = vpop.xlane.xlu1 %2652  ;;  %2996 = vadd.xlane.f32.xlu1 %v4202_v0  ;;  %v3041_v26 = vpack.c.bf16 %v4204_v13, %v4202_v0 }
 0x8d0   :  { %4209 = vpow2.f32 %v2970_v37  ;;  %v2680_v47 = vsub.f32 %v5670_v30, %v2653_v36  ;;  %v2953_v30 = vsub.f32 %v5620_v40, %v2931_v62  ;;  %v2687_v62 = vsub.f32 %v5654_v59, %v2667_v51 }
 0x8d1   :  { %4211 = vpow2.f32 %v2702_v25  ;;  %3088 = vmatprep.mubr.bf16.mxu0 %v3041_v26  ;;  %v2939_v16 = vpop.xlane.xlu0 %2938 }
 0x8d2   :  { %v2700_v9 = vmul.f32 1.442695, %v2680_v47  ;;  %v4206_v11 = vpop.eup %4205  ;;  %v2978_v29 = vmul.f32 1.442695, %v2953_v30  ;;  %v2714_v25 = vmul.f32 1.442695, %v2687_v62  ;;  %v2957_v59 = vsub.f32 %v5675_v54, %v2939_v16 }
 0x8d3   :  { %v2925_v7 = vpop.xlane.xlu1 %2924  ;;  %2730 = vadd.xlane.f32.xlu0 %v4206_v11  ;;  %v2773_v3 = vpack.c.bf16 %v4206_v11, %v4200_v50  ;;  %v2982_v50 = vmul.f32 1.442695, %v2955_v18  ;;  %v3927_v62 = vld [vmem:[#allocation2 + $0x120] ss:$8 sps:$4 sm:$0xff]  }
 0x8d4   :  { %4213 = vpow2.f32 %v2700_v9  ;;  %v2950_v5 = vsub.f32 %v5679_v28, %v2925_v7  ;;  %v2986_v9 = vmul.f32 1.442695, %v2957_v59  ;;  %3744 = vmatprep.subr.bf16.mxu1 %v3927_v62 }
 0x8d5   :  { %3089 = vmatmul.mubr.bf16.gmra.mrb[84].mxu0 %v2773_v3  ;;  %4215 = vpow2.f32 %v2974_v41  ;;  %3745 = vmatpush3.bf16.msra.mxu1 %v3927_v62 }
 0x8d6   :  { %v2972_v23 = vmul.f32 1.442695, %v2950_v5  ;;  %v4208_v57 = vpop.eup %4207  ;;  %v2671_v32 = vpop.xlane.xlu0 %2670 }
 0x8d7   :  { %v2657_v24 = vpop.xlane.xlu1 %2656  ;;  %2998 = vadd.xlane.f32.xlu0 %v4204_v13  ;;  %v2689_v47 = vsub.f32 %v5685_v20, %v2671_v32  ;;  %v3934_v32 = vld [vmem:[#allocation2 + $0x190] ss:$8 sps:$4 sm:$0xff]  }
 0x8d8   :  { %4217 = vpow2.f32 %v2972_v23  ;;  %v2682_v19 = vsub.f32 %v5690_v39, %v2657_v24 }
 0x8d9   :  { %4219 = vpow2.f32 %v2706_v8  ;;  %v2718_v7 = vmul.f32 1.442695, %v2689_v47 }
 0x8da   :  { %v4210_v15 = vpop.eup %4209  ;;  %v2704_v60 = vmul.f32 1.442695, %v2682_v19 }
 0x8db   :  { %v4212_v28 = vpop.eup %4211  ;;  %v2929_v48 = vpop.xlane.xlu1 %2928  ;;  %v3042_v43 = vpack.c.bf16 %v4210_v15, %v4208_v57 }
 0x8dc   :  { %4221 = vpow2.f32 %v2704_v60  ;;  %2734 = vadd.xlane.f32.xlu0 %v4212_v28  ;;  %v2952_v40 = vsub.f32 %v5697_v55, %v2929_v48 }
 0x8dd   :  { %3096 = vmatprep.mubr.bf16.mxu0 %v3042_v43  ;;  %4223 = vpow2.f32 %v2978_v29 }
 0x8de   :  { %v4214_v21 = vpop.eup %4213  ;;  %v2976_v39 = vmul.f32 1.442695, %v2952_v40 }
 0x8df   :  { %2732 = vadd.xlane.f32.xlu1 %v4214_v21  ;;  %v2661_v61 = vpop.xlane.xlu1 %2660  ;;  %v2774_v56 = vpack.c.bf16 %v4212_v28, %v4214_v21  ;;  %v4216_v12 = vpop.eup %4215 }
 0x8e0   :  { %4225 = vpow2.f32 %v2976_v39  ;;  %3002 = vadd.xlane.f32.xlu0 %v4210_v15  ;;  %v2684_v27 = vsub.f32 %v5703_v44, %v2661_v61 }
 0x8e1   :  { %4227 = vpow2.f32 %v2710_v10  ;;  %3097 = vmatmul.mubr.bf16.gmra.mrb[88].mxu0 %v2774_v56 }
 0x8e2   :  { %v4218_v55 = vpop.eup %4217  ;;  %v2708_v14 = vmul.f32 1.442695, %v2684_v27 }
 0x8e3   :  { %v4220_v63 = vpop.eup %4219  ;;  %3000 = vadd.xlane.f32.xlu1 %v4208_v57  ;;  %v2933_v38 = vpop.xlane.xlu1 %2932  ;;  %v3043_v2 = vpack.c.bf16 %v4216_v12, %v4218_v55 }
 0x8e4   :  { %4229 = vpow2.f32 %v2708_v14  ;;  %2738 = vadd.xlane.f32.xlu0 %v4220_v63  ;;  %v2954_v31 = vsub.f32 %v5708_v46, %v2933_v38  ;;  %v3929_v14 = vld [vmem:[#allocation2 + $0x140] ss:$8 sps:$4 sm:$0xff]   ;;  %v3932_v38 = vld [vmem:[#allocation2 + $0x170] ss:$8 sps:$4 sm:$0xff]  }
 0x8e5   :  { %3104 = vmatprep.mubr.bf16.mxu0 %v3043_v2  ;;  %4231 = vpow2.f32 %v2982_v50  ;;  %v2943_v13 = vpop.xlane.xlu0 %2942  ;;  %v3931_v50 = vld [vmem:[#allocation2 + $0x160] ss:$8 sps:$4 sm:$0xff]  }
 0x8e6   :  { %v4222_v44 = vpop.eup %4221  ;;  %v2980_v0 = vmul.f32 1.442695, %v2954_v31  ;;  %v2959_v20 = vsub.f32 %v5713_v49, %v2943_v13  ;;  %v3933_v2 = vld [vmem:[#allocation2 + $0x180] ss:$8 sps:$4 sm:$0xff]  }
 0x8e7   :  { %2736 = vadd.xlane.f32.xlu1 %v4222_v44  ;;  %v2665_v42 = vpop.xlane.xlu1 %2664  ;;  %v2775_v37 = vpack.c.bf16 %v4220_v63, %v4222_v44  ;;  %v4224_v36 = vpop.eup %4223  ;;  %v3930_v63 = vld [vmem:[#allocation2 + $0x150] ss:$8 sps:$4 sm:$0xff]  }
 0x8e8   :  { %4233 = vpow2.f32 %v2980_v0  ;;  %3006 = vadd.xlane.f32.xlu0 %v4216_v12  ;;  %v2686_v17 = vsub.f32 %v5718_v4, %v2665_v42  ;;  %v2990_v6 = vmul.f32 1.442695, %v2959_v20 }
 0x8e9   :  { %4235 = vpow2.f32 %v2714_v25  ;;  %3105 = vmatmul.mubr.bf16.gmra.mrb[92].mxu0 %v2775_v37 }
 0x8ea   :  { %v4226_v46 = vpop.eup %4225  ;;  %v2712_v26 = vmul.f32 1.442695, %v2686_v17  ;;  %v2675_v4 = vpop.xlane.xlu0 %2674 }
 0x8eb   :  { %v4228_v45 = vpop.eup %4227  ;;  %3004 = vadd.xlane.f32.xlu1 %v4218_v55  ;;  %v2937_v11 = vpop.xlane.xlu1 %2936  ;;  %v3044_v54 = vpack.c.bf16 %v4224_v36, %v4226_v46  ;;  %v2691_v24 = vsub.f32 %v5722_v53, %v2675_v4  ;;  %v3928_v55 = vld [vmem:[#allocation2 + $0x130] ss:$8 sps:$4 sm:$0xff]  }
 0x8ec   :  { %4237 = vpow2.f32 %v2712_v26  ;;  %2742 = vadd.xlane.f32.xlu0 %v4228_v45  ;;  %v2956_v41 = vsub.f32 %v5726_v35, %v2937_v11  ;;  %3746 = vmatprep.subr.bf16.mxu1 %v3928_v55 }
 0x8ed   :  { %3112 = vmatprep.mubr.bf16.mxu0 %v3044_v54  ;;  %4239 = vpow2.f32 %v2986_v9  ;;  %v2722_v60 = vmul.f32 1.442695, %v2691_v24  ;;  %3747 = vmatpush3.bf16.msra.mxu1 %v3928_v55 }
 0x8ee   :  { %v4230_v1 = vpop.eup %4229  ;;  %v2984_v5 = vmul.f32 1.442695, %v2956_v41  ;;  %3748 = vmatprep.subr.bf16.mxu1 %v3929_v14 }
 0x8ef   :  { %2740 = vadd.xlane.f32.xlu1 %v4230_v1  ;;  %v2669_v3 = vpop.xlane.xlu1 %2668  ;;  %v2776_v8 = vpack.c.bf16 %v4228_v45, %v4230_v1  ;;  %v4232_v30 = vpop.eup %4231 }
 0x8f0   :  { %4241 = vpow2.f32 %v2984_v5  ;;  %3010 = vadd.xlane.f32.xlu0 %v4224_v36  ;;  %v2688_v23 = vsub.f32 %v5731_v58, %v2669_v3 }
 0x8f1   :  { %4243 = vpow2.f32 %v2718_v7  ;;  %3113 = vmatmul.mubr.bf16.gmra.mrb[96].mxu0 %v2776_v8  ;;  %3749 = vmatpush3.bf16.msra.mxu1 %v3929_v14 }
 0x8f2   :  { %v4234_v35 = vpop.eup %4233  ;;  %v2716_v19 = vmul.f32 1.442695, %v2688_v23  ;;  %3750 = vmatprep.subr.bf16.mxu1 %v3930_v63 }
 0x8f3   :  { %v4236_v57 = vpop.eup %4235  ;;  %3008 = vadd.xlane.f32.xlu1 %v4226_v46  ;;  %v2941_v15 = vpop.xlane.xlu1 %2940  ;;  %v3045_v51 = vpack.c.bf16 %v4232_v30, %v4234_v35 }
 0x8f4   :  { %4245 = vpow2.f32 %v2716_v19  ;;  %2746 = vadd.xlane.f32.xlu0 %v4236_v57  ;;  %v2958_v49 = vsub.f32 %v5735_v22, %v2941_v15 }
 0x8f5   :  { %3120 = vmatprep.mubr.bf16.mxu0 %v3045_v51  ;;  %4247 = vpow2.f32 %v2990_v6  ;;  %3751 = vmatpush3.bf16.msra.mxu1 %v3930_v63 }
 0x8f6   :  { %v4238_v28 = vpop.eup %4237  ;;  %v2988_v58 = vmul.f32 1.442695, %v2958_v49  ;;  %3752 = vmatprep.subr.bf16.mxu1 %v3931_v50 }
 0x8f7   :  { %2744 = vadd.xlane.f32.xlu1 %v4238_v28  ;;  %v2673_v29 = vpop.xlane.xlu1 %2672  ;;  %v2777_v53 = vpack.c.bf16 %v4236_v57, %v4238_v28  ;;  %v4240_v43 = vpop.eup %4239 }
 0x8f8   :  { %4249 = vpow2.f32 %v2988_v58  ;;  %3014 = vadd.xlane.f32.xlu0 %v4232_v30  ;;  %v2690_v48 = vsub.f32 %v5739_v52, %v2673_v29 }
 0x8f9   :  { %4251 = vpow2.f32 %v2722_v60  ;;  %3121 = vmatmul.mubr.bf16.gmra.mrb[100].mxu0 %v2777_v53  ;;  %3753 = vmatpush3.bf16.msra.mxu1 %v3931_v50 }
 0x8fa   :  { %v4242_v40 = vpop.eup %4241  ;;  %v2720_v10 = vmul.f32 1.442695, %v2690_v48  ;;  %3754 = vmatprep.subr.bf16.mxu1 %v3932_v38 }
 0x8fb   :  { %v4244_v21 = vpop.eup %4243  ;;  %3012 = vadd.xlane.f32.xlu1 %v4234_v35  ;;  %v3046_v22 = vpack.c.bf16 %v4240_v43, %v4242_v40 }
 0x8fc   :  { %4253 = vpow2.f32 %v2720_v10  ;;  %2750 = vadd.xlane.f32.xlu0 %v4244_v21 }
 0x8fd   :  { %3128 = vmatprep.mubr.bf16.mxu0 %v3046_v22  ;;  %3755 = vmatpush3.bf16.msra.mxu1 %v3932_v38 }
 0x8fe   :  { %v4246_v16 = vpop.eup %4245  ;;  %3756 = vmatprep.subr.bf16.mxu1 %v3933_v2 }
 0x8ff   :  { %2748 = vadd.xlane.f32.xlu1 %v4246_v16  ;;  %v2778_v39 = vpack.c.bf16 %v4244_v21, %v4246_v16  ;;  %v4248_v18 = vpop.eup %4247 }
 0x900   :  { %3018 = vadd.xlane.f32.xlu0 %v4240_v43 }
 0x901   :  { %3129 = vmatmul.mubr.bf16.gmra.mrb[104].mxu0 %v2778_v39  ;;  %3757 = vmatpush3.bf16.msra.mxu1 %v3933_v2 }
 0x902   :  { %v4250_v61 = vpop.eup %4249  ;;  %3758 = vmatprep.subr.bf16.mxu1 %v3934_v32 }
 0x903   :  { %v4252_v56 = vpop.eup %4251  ;;  %3016 = vadd.xlane.f32.xlu1 %v4242_v40  ;;  %v3047_v52 = vpack.c.bf16 %v4248_v18, %v4250_v61 }
 0x904   :  { %2754 = vadd.xlane.f32.xlu0 %v4252_v56 }
 0x905   :  { %3136 = vmatprep.mubr.bf16.mxu0 %v3047_v52  ;;  %3759 = vmatpush3.bf16.msra.mxu1 %v3934_v32 }
 0x906   :  { %v4254_v27 = vpop.eup %4253 }
 0x907   :  { %2752 = vadd.xlane.f32.xlu1 %v4254_v27  ;;  %v2779_v12 = vpack.c.bf16 %v4252_v56, %v4254_v27 }
 0x908   :  { %3022 = vadd.xlane.f32.xlu0 %v4248_v18 }
 0x909   :  { %3137 = vmatmul.mubr.bf16.gmra.mrb[108].mxu0 %v2779_v12 }
 0x90b   :  { %3020 = vadd.xlane.f32.xlu1 %v4250_v61 }
 0x94c   :  { %v2725_v25 = vpop.xlane.xlu1 %2724 }
 0x950   :  { %v2727_v31 = vpop.xlane.xlu0 %2726  ;;  %v2993_v0 = vpop.xlane.xlu1 %2992 }
 0x951   :  { %4255 = vrcp.f32 %v2993_v0 }
 0x954   :  { %v2995_v44 = vpop.xlane.xlu0 %2994 }
 0x955   :  { %4257 = vrcp.f32 %v2995_v44 }
 0x956   :  { %4259 = vrcp.f32 %v2725_v25 }
 0x957   :  { %4261 = vrcp.f32 %v2727_v31 }
 0x958   :  { %v2729_v42 = vpop.xlane.xlu1 %2728 }
 0x95b   :  { %v4256_v45 = vpop.eup %4255 }
 0x95c   :  { %v2997_v13 = vpop.xlane.xlu1 %2996 }
 0x95d   :  { %4263 = vrcp.f32 %v2997_v13 }
 0x95f   :  { %v4258_v54 = vpop.eup %4257 }
 0x960   :  { %v2731_v59 = vpop.xlane.xlu0 %2730  ;;  %v4260_v4 = vpop.eup %4259 }
 0x961   :  { %v4262_v20 = vpop.eup %4261  ;;  %v3147_v8 = vsel %vm2458_vm8, %v4260_v4, %v4256_v45 }
 0x962   :  { %v3148_v23 = vsel %vm2458_vm8, %v4262_v20, %v4258_v54 }
 0x964   :  { %v2999_v37 = vpop.xlane.xlu0 %2998 }
 0x965   :  { %4265 = vrcp.f32 %v2999_v37 }
 0x966   :  { %4267 = vrcp.f32 %v2729_v42 }
 0x967   :  { %4269 = vrcp.f32 %v2731_v59  ;;  %v4264_v49 = vpop.eup %4263 }
 0x969   :  { %v2735_v17 = vpop.xlane.xlu0 %2734 }
 0x96c   :  { %v2733_v36 = vpop.xlane.xlu1 %2732 }
 0x96d   :  { %v3003_v47 = vpop.xlane.xlu0 %3002 }
 0x96e   :  { %4271 = vrcp.f32 %v3003_v47 }
 0x96f   :  { %v4266_v28 = vpop.eup %4265 }
 0x970   :  { %v3001_v46 = vpop.xlane.xlu1 %3000  ;;  %v4268_v53 = vpop.eup %4267 }
 0x971   :  { %v2739_v9 = vpop.xlane.xlu0 %2738  ;;  %4273 = vrcp.f32 %v3001_v46  ;;  %v4270_v40 = vpop.eup %4269  ;;  %v3149_v22 = vsel %vm2458_vm8, %v4268_v53, %v4264_v49 }
 0x972   :  { %4275 = vrcp.f32 %v2735_v17  ;;  %v3150_v16 = vsel %vm2458_vm8, %v4270_v40, %v4266_v28 }
 0x973   :  { %4277 = vrcp.f32 %v2733_v36 }
 0x974   :  { %v2737_v41 = vpop.xlane.xlu1 %2736 }
 0x975   :  { %v3007_v35 = vpop.xlane.xlu0 %3006 }
 0x976   :  { %4279 = vrcp.f32 %v3007_v35 }
 0x978   :  { %v3005_v19 = vpop.xlane.xlu1 %3004  ;;  %v4272_v12 = vpop.eup %4271 }
 0x979   :  { %v2743_v6 = vpop.xlane.xlu0 %2742  ;;  %4281 = vrcp.f32 %v3005_v19 }
 0x97a   :  { %4283 = vrcp.f32 %v2739_v9 }
 0x97b   :  { %v4274_v55 = vpop.eup %4273  ;;  %4285 = vrcp.f32 %v2737_v41 }
 0x97c   :  { %v2741_v15 = vpop.xlane.xlu1 %2740  ;;  %v4276_v50 = vpop.eup %4275 }
 0x97d   :  { %v3011_v48 = vpop.xlane.xlu0 %3010  ;;  %v4278_v2 = vpop.eup %4277  ;;  %v3152_v0 = vsel %vm2458_vm8, %v4276_v50, %v4272_v12 }
 0x97e   :  { %v3151_v44 = vsel %vm2458_vm8, %v4278_v2, %v4274_v55  ;;  %4287 = vrcp.f32 %v3011_v48 }
 0x980   :  { %v3009_v10 = vpop.xlane.xlu1 %3008  ;;  %v4280_v17 = vpop.eup %4279 }
 0x981   :  { %v2747_v56 = vpop.xlane.xlu0 %2746  ;;  %4289 = vrcp.f32 %v3009_v10 }
 0x982   :  { %4291 = vrcp.f32 %v2743_v6 }
 0x983   :  { %v4282_v47 = vpop.eup %4281  ;;  %4293 = vrcp.f32 %v2741_v15 }
 0x984   :  { %v2745_v52 = vpop.xlane.xlu1 %2744  ;;  %v4284_v9 = vpop.eup %4283 }
 0x985   :  { %v3015_v32 = vpop.xlane.xlu0 %3014  ;;  %v4286_v41 = vpop.eup %4285  ;;  %v3154_v4 = vsel %vm2458_vm8, %v4284_v9, %v4280_v17 }
 0x986   :  { %4295 = vrcp.f32 %v3015_v32 }
 0x988   :  { %v3013_v25 = vpop.xlane.xlu1 %3012 }
 0x989   :  { %v2751_v46 = vpop.xlane.xlu0 %2750  ;;  %4297 = vrcp.f32 %v3013_v25 }
 0x98a   :  { %4299 = vrcp.f32 %v2747_v56 }
 0x98b   :  { %4301 = vrcp.f32 %v2745_v52 }
 0x998   :  { %v3660_v26 = vpop.f32.mrb[80].mxu0 }
 0x999   :  { %v3661_v11 = vpop.f32.mrb[81].mxu0 }
 0x99a   :  { %v3662_v7 = vadd.f32 %v3661_v11, %v3660_v26  ;;  %v3663_v1 = vpop.f32.mrb[82].mxu0  ;;  %v2749_v11 = vpop.xlane.xlu1 %2748 }
 0x99b   :  { %v3664_v5 = vpop.f32.mrb[83].mxu0 }
 0x99c   :  { %v3665_v3 = vadd.f32 %v3664_v5, %v3663_v1  ;;  %v3163_v30 = vmul.f32 %v3662_v7, %v3147_v8  ;;  %v3153_v1 = vsel %vm2458_vm8, %v4286_v41, %v4282_v47 }
 0x99e   :  { %v3164_v24 = vmul.f32 %v3665_v3, %v3148_v23  ;;  %v3019_v3 = vpop.xlane.xlu0 %3018 }
 0x99f   :  { %4303 = vrcp.f32 %v3019_v3 }
 0x9a0   :  { %v3195_v57 = vpack.c.bf16 %v3164_v24, %v3163_v30  ;;  %v4288_v30 = vpop.eup %4287  ;;  %v3017_v24 = vpop.xlane.xlu1 %3016 }
 0x9a1   :  { %v4290_v19 = vpop.eup %4289  ;;  %4305 = vrcp.f32 %v3017_v24 }
 0x9a2   :  { %3760 = vmatprep.mubr.bf16.mxu1 %v3195_v57  ;;  %v4292_v15 = vpop.eup %4291  ;;  %4307 = vrcp.f32 %v2751_v46 }
 0x9a3   :  { %v4294_v49 = vpop.eup %4293  ;;  %4309 = vrcp.f32 %v2749_v11 }
 0x9a4   :  { %v3155_v28 = vsel %vm2458_vm8, %v4294_v49, %v4290_v19  ;;  %v4320_v19 = vld [vmem:[%s5895_s3] sm:$0xff] }
 0x9a8   :  { %v3666_v51 = vpop.f32.mrb[84].mxu0 }
 0x9a9   :  { %v3667_v60 = vpop.f32.mrb[85].mxu0 }
 0x9aa   :  { %v3668_v58 = vadd.f32 %v3667_v60, %v3666_v51  ;;  %v3669_v29 = vpop.f32.mrb[86].mxu0 }
 0x9ab   :  { %v3670_v43 = vpop.f32.mrb[87].mxu0 }
 0x9ac   :  { %v3671_v21 = vadd.f32 %v3670_v43, %v3669_v29  ;;  %v3165_v39 = vmul.f32 %v3668_v58, %v3149_v22  ;;  %v3156_v58 = vsel %vm2458_vm8, %v4292_v15, %v4288_v30  ;;  %v2755_v29 = vpop.xlane.xlu0 %2754  ;;  %v2753_v43 = vpop.xlane.xlu1 %2752 }
 0x9ae   :  { %v3166_v18 = vmul.f32 %v3671_v21, %v3150_v16  ;;  %v4296_v21 = vpop.eup %4295 }
 0x9af   :  { %v4298_v16 = vpop.eup %4297 }
 0x9b0   :  { %v3196_v61 = vpack.c.bf16 %v3166_v18, %v3165_v39 }
 0x9b2   :  { %3761 = vmatmul.mubr.bf16.vlgmr.msra.gmra.mrb[96].mxu1 %v3196_v61  ;;  %v4300_v61 = vpop.eup %4299 }
 0x9b3   :  { %v4302_v52 = vpop.eup %4301 }
 0x9b4   :  { %v3672_v27 = vpop.f32.mrb[88].mxu0  ;;  %v3157_v55 = vsel %vm2458_vm8, %v4302_v52, %v4298_v16  ;;  %v4304_v32 = vpop.eup %4303 }
 0x9b5   :  { %v3673_v62 = vpop.f32.mrb[89].mxu0  ;;  %v4306_v25 = vpop.eup %4305 }
 0x9b6   :  { %v3674_v14 = vadd.f32 %v3673_v62, %v3672_v27  ;;  %v3675_v63 = vpop.f32.mrb[90].mxu0  ;;  %v3023_v27 = vpop.xlane.xlu0 %3022 }
 0x9b7   :  { %v3676_v38 = vpop.f32.mrb[91].mxu0  ;;  %v3021_v62 = vpop.xlane.xlu1 %3020  ;;  %4311 = vrcp.f32 %v3023_v27 }
 0x9b8   :  { %v3677_v31 = vadd.f32 %v3676_v38, %v3675_v63  ;;  %v3167_v59 = vmul.f32 %v3674_v14, %v3151_v44  ;;  %v3158_v14 = vsel %vm2458_vm8, %v4300_v61, %v4296_v21  ;;  %4313 = vrcp.f32 %v3021_v62 }
 0x9b9   :  { %4315 = vrcp.f32 %v2755_v29 }
 0x9ba   :  { %v3168_v42 = vmul.f32 %v3677_v31, %v3152_v0  ;;  %4317 = vrcp.f32 %v2753_v43 }
 0x9bc   :  { %v3678_v37 = vpop.f32.mrb[92].mxu0  ;;  %v3197_v13 = vpack.c.bf16 %v3168_v42, %v3167_v59  ;;  %v4308_v59 = vpop.eup %4307 }
 0x9bd   :  { %v3679_v36 = vpop.f32.mrb[93].mxu0 }
 0x9be   :  { %v3680_v26 = vadd.f32 %v3679_v36, %v3678_v37  ;;  %v3681_v45 = vpop.f32.mrb[94].mxu0  ;;  %3764 = vmatprep.mubr.bf16.mxu1 %v3197_v13  ;;  %v4310_v37 = vpop.eup %4309  ;;  %v3160_v36 = vsel %vm2458_vm8, %v4308_v59, %v4304_v32 }
 0x9bf   :  { %v3682_v54 = vpop.f32.mrb[95].mxu0  ;;  %v3159_v17 = vsel %vm2458_vm8, %v4310_v37, %v4306_v25 }
 0x9c0   :  { %v3683_v7 = vadd.f32 %v3682_v54, %v3681_v45  ;;  %v3169_v5 = vmul.f32 %v3680_v26, %v3153_v1 }
 0x9c1   :  { %v4312_v9 = vpop.eup %4311 }
 0x9c2   :  { %v3170_v20 = vmul.f32 %v3683_v7, %v3154_v4  ;;  %v4314_v54 = vpop.eup %4313 }
 0x9c3   :  { %v4316_v1 = vpop.eup %4315 }
 0x9c4   :  { %v3684_v8 = vpop.f32.mrb[96].mxu0  ;;  %v3198_v23 = vpack.c.bf16 %v3170_v20, %v3169_v5  ;;  %v4318_v5 = vpop.eup %4317 }
 0x9c5   :  { %v3685_v35 = vpop.f32.mrb[97].mxu0  ;;  %v3161_v3 = vsel %vm2458_vm8, %v4318_v5, %v4314_v54 }
 0x9c6   :  { %v3686_v57 = vadd.f32 %v3685_v35, %v3684_v8  ;;  %v3687_v6 = vpop.f32.mrb[98].mxu0  ;;  %3765 = vmatmul.mubr.bf16.gmra.mrb[100].mxu1 %v3198_v23  ;;  %v3162_v8 = vsel %vm2458_vm8, %v4316_v1, %v4312_v9  ;;  %v3205_v35 = vsub.s32 4, %v4467_v34 }
 0x9c7   :  { %v3688_v51 = vpop.f32.mrb[99].mxu0 }
 0x9c8   :  { %v3689_v60 = vadd.f32 %v3688_v51, %v3687_v6  ;;  %v3171_v53 = vmul.f32 %v3686_v57, %v3155_v28  ;;  %v5810_v57 = vrot.slane %v4320_v19, %v3205_v35 }
 0x9ca   :  { %v3172_v48 = vmul.f32 %v3689_v60, %v3156_v58 }
 0x9cc   :  { %v3690_v40 = vpop.f32.mrb[100].mxu0  ;;  %v3199_v10 = vpack.c.bf16 %v3172_v48, %v3171_v53  ;;  %v5964_v53 = vld [vmem:[#allocation11_spill] sm:$0xff] }
 0x9cd   :  { %v3691_v22 = vpop.f32.mrb[101].mxu0 }
 0x9ce   :  { %v3692_v39 = vadd.f32 %v3691_v22, %v3690_v40  ;;  %v3693_v18 = vpop.f32.mrb[102].mxu0  ;;  %3768 = vmatprep.mubr.bf16.mxu1 %v3199_v10  ;;  %v5965_v40 = vld [vmem:[#allocation12_spill] sm:$0xff]  ;;  %v5966_v22 = vld [vmem:[#allocation13_spill] sm:$0xff] }
 0x9cf   :  { %v3694_v56 = vpop.f32.mrb[103].mxu0 }
 0x9d0   :  { %v3695_v12 = vadd.f32 %v3694_v56, %v3693_v18  ;;  %v3173_v63 = vmul.f32 %v3692_v39, %v3157_v55  ;;  %v5967_v39 = vld [vmem:[#allocation14_spill] sm:$0xff] }
 0x9d2   :  { %v3174_v50 = vmul.f32 %v3695_v12, %v3158_v14 }
 0x9d4   :  { %v3696_v38 = vpop.f32.mrb[104].mxu0  ;;  %v3200_v2 = vpack.c.bf16 %v3174_v50, %v3173_v63 }
 0x9d5   :  { %v3697_v31 = vpop.f32.mrb[105].mxu0 }
 0x9d6   :  { %v3698_v44 = vadd.f32 %v3697_v31, %v3696_v38  ;;  %v3699_v0 = vpop.f32.mrb[106].mxu0  ;;  %3769 = vmatmul.mubr.bf16.gmra.mrb[104].mxu1 %v3200_v2  ;;  %v5968_v38 = vld [vmem:[#allocation15_spill] sm:$0xff]  ;;  %v5969_v31 = vld [vmem:[#allocation16_spill] sm:$0xff] }
 0x9d7   :  { %v3700_v42 = vpop.f32.mrb[107].mxu0 }
 0x9d8   :  { %v3701_v13 = vadd.f32 %v3700_v42, %v3699_v0  ;;  %v3175_v47 = vmul.f32 %v3698_v44, %v3159_v17  ;;  %v5970_v0 = vld [vmem:[#allocation17_spill] sm:$0xff]  ;;  %v5971_v42 = vld [vmem:[#allocation18_spill] sm:$0xff] }
 0x9da   :  { %v3176_v46 = vmul.f32 %v3701_v13, %v3160_v36 }
 0x9dc   :  { %v3702_v26 = vpop.f32.mrb[108].mxu0  ;;  %v3201_v45 = vpack.c.bf16 %v3176_v46, %v3175_v47 }
 0x9dd   :  { %v3703_v11 = vpop.f32.mrb[109].mxu0 }
 0x9de   :  { %v3704_v41 = vadd.f32 %v3703_v11, %v3702_v26  ;;  %v3705_v7 = vpop.f32.mrb[110].mxu0  ;;  %3772 = vmatprep.mubr.bf16.mxu1 %v3201_v45 }
 0x9df   :  { %v3706_v4 = vpop.f32.mrb[111].mxu0 }
 0x9e0   :  { %v3707_v20 = vadd.f32 %v3706_v4, %v3705_v7  ;;  %v3177_v23 = vmul.f32 %v3704_v41, %v3161_v3  ;;  %v5972_v41 = vld [vmem:[#allocation19_spill] sm:$0xff]  ;;  %v5973_v4 = vld [vmem:[#allocation20_spill] sm:$0xff]  ;;  %v5974_v3 = vld [vmem:[#allocation21_spill] sm:$0xff] }
 0x9e2   :  { %v3178_v30 = vmul.f32 %v3707_v20, %v3162_v8 }
 0x9e4   :  { %v3202_v24 = vpack.c.bf16 %v3178_v30, %v3177_v23  ;;  %v5975_v23 = vld [vmem:[#allocation22_spill] sm:$0xff] }
 0x9e6   :  { %3773 = vmatmul.mubr.bf16.gmra.mrb[108].mxu1 %v3202_v24 }
 0xa85   :  { %v3762_v6 = vpop.f32.mrb[96].mxu1 }
 0xa86   :  { %v3298_v15 = vadd.f32 %v3762_v6, %v5810_v57  ;;  %v3289_v51 = vpop.f32.mrb[97].mxu1 }
 0xa87   :  { %v3290_v49 = vadd.f32 %v3289_v51, %v5810_v57  ;;  %v3763_v33 = vpop.f32.mrb[98].mxu1 }
 0xa88   :  { %v3354_v60 = vmax.f32 %v3298_v15, 0.0  ;;  %v3301_v28 = vadd.f32 %v3763_v33, %v5810_v57  ;;  %v3292_v58 = vpop.f32.mrb[99].mxu1 }
 0xa89   :  { %v3352_v29 = vmax.f32 %v3290_v49, 0.0  ;;  %v3293_v34 = vadd.f32 %v3292_v58, %v5810_v57  ;;  %v5976_v58 = vld [vmem:[#allocation23_spill] sm:$0xff] }
 0xa8a   :  { %v3370_v48 = vadd.f32 %v3354_v60, %v5964_v53  ;;  %v3355_v43 = vmax.f32 %v3301_v28, 0.0  ;;  %v5977_v53 = vld [vmem:[#allocation24_spill] sm:$0xff] }
 0xa8b   :  { %v3368_v10 = vadd.f32 %v3352_v29, %v5965_v40  ;;  %v3353_v21 = vmax.f32 %v3293_v34, 0.0  ;;  %v5978_v40 = vld [vmem:[#allocation25_spill] sm:$0xff] }
 0xa8c   :  { %3386 = vst [vmem:[%s5896_s4 + $0x10] sm:$0xff] %v3370_v48  ;;  %v3371_v16 = vadd.f32 %v3355_v43, %v5966_v22 }
 0xa8d   :  { %3384 = vst [vmem:[%s5896_s4] sm:$0xff] %v3368_v10  ;;  %v3369_v18 = vadd.f32 %v3353_v21, %v5967_v39  ;;  %v5979_v21 = vld [vmem:[#allocation26_spill] sm:$0xff] }
 0xa8e   :  { %3387 = vst [vmem:[%s5896_s4 + $0x18] sm:$0xff] %v3371_v16 }
 0xa8f   :  { %3385 = vst [vmem:[%s5896_s4 + $0x8] sm:$0xff] %v3369_v18 }
 0xa99   :  { %v3766_v61 = vpop.f32.mrb[100].mxu1 }
 0xa9a   :  { %v3314_v56 = vadd.f32 %v3766_v61, %v5810_v57  ;;  %v3305_v52 = vpop.f32.mrb[101].mxu1 }
 0xa9b   :  { %v3306_v27 = vadd.f32 %v3305_v52, %v5810_v57  ;;  %v3767_v12 = vpop.f32.mrb[102].mxu1 }
 0xa9c   :  { %v3358_v62 = vmax.f32 %v3314_v56, 0.0  ;;  %v3317_v55 = vadd.f32 %v3767_v12, %v5810_v57  ;;  %v3308_v14 = vpop.f32.mrb[103].mxu1 }
 0xa9d   :  { %v3356_v63 = vmax.f32 %v3306_v27, 0.0  ;;  %v3309_v50 = vadd.f32 %v3308_v14, %v5810_v57 }
 0xa9e   :  { %v3374_v2 = vadd.f32 %v3358_v62, %v5968_v38  ;;  %v3359_v32 = vmax.f32 %v3317_v55, 0.0 }
 0xa9f   :  { %v3372_v25 = vadd.f32 %v3356_v63, %v5969_v31  ;;  %v3357_v44 = vmax.f32 %v3309_v50, 0.0 }
 0xaa0   :  { %3390 = vst [vmem:[%s5896_s4 + $0x30] sm:$0xff] %v3374_v2  ;;  %v3375_v59 = vadd.f32 %v3359_v32, %v5970_v0 }
 0xaa1   :  { %3388 = vst [vmem:[%s5896_s4 + $0x20] sm:$0xff] %v3372_v25  ;;  %v3373_v37 = vadd.f32 %v3357_v44, %v5971_v42 }
 0xaa2   :  { %3391 = vst [vmem:[%s5896_s4 + $0x38] sm:$0xff] %v3375_v59 }
 0xaa3   :  { %3389 = vst [vmem:[%s5896_s4 + $0x28] sm:$0xff] %v3373_v37 }
 0xaa9   :  { %v3770_v13 = vpop.f32.mrb[104].mxu1 }
 0xaaa   :  { %v3330_v17 = vadd.f32 %v3770_v13, %v5810_v57  ;;  %v3321_v36 = vpop.f32.mrb[105].mxu1 }
 0xaab   :  { %v3322_v47 = vadd.f32 %v3321_v36, %v5810_v57  ;;  %v3771_v46 = vpop.f32.mrb[106].mxu1 }
 0xaac   :  { %v3362_v26 = vmax.f32 %v3330_v17, 0.0  ;;  %v3333_v45 = vadd.f32 %v3771_v46, %v5810_v57  ;;  %v3324_v9 = vpop.f32.mrb[107].mxu1 }
 0xaad   :  { %v3360_v11 = vmax.f32 %v3322_v47, 0.0  ;;  %v3325_v54 = vadd.f32 %v3324_v9, %v5810_v57 }
 0xaae   :  { %v3378_v7 = vadd.f32 %v3362_v26, %v5972_v41  ;;  %v3363_v1 = vmax.f32 %v3333_v45, 0.0 }
 0xaaf   :  { %v3376_v5 = vadd.f32 %v3360_v11, %v5973_v4  ;;  %v3361_v20 = vmax.f32 %v3325_v54, 0.0 }
 0xab0   :  { %3394 = vst [vmem:[%s5896_s4 + $0x50] sm:$0xff] %v3378_v7  ;;  %v3379_v8 = vadd.f32 %v3363_v1, %v5974_v3 }
 0xab1   :  { %3392 = vst [vmem:[%s5896_s4 + $0x40] sm:$0xff] %v3376_v5  ;;  %v3377_v30 = vadd.f32 %v3361_v20, %v5975_v23 }
 0xab2   :  { %3395 = vst [vmem:[%s5896_s4 + $0x58] sm:$0xff] %v3379_v8 }
 0xab3   :  { %3393 = vst [vmem:[%s5896_s4 + $0x48] sm:$0xff] %v3377_v30 }
 0xab9   :  { %v3774_v24 = vpop.f32.mrb[108].mxu1 }
 0xaba   :  { %v3346_v35 = vadd.f32 %v3774_v24, %v5810_v57  ;;  %v3337_v19 = vpop.f32.mrb[109].mxu1 }
 0xabb   :  { %v3338_v6 = vadd.f32 %v3337_v19, %v5810_v57  ;;  %v3775_v15 = vpop.f32.mrb[110].mxu1 }
 0xabc   :  { %v3366_v51 = vmax.f32 %v3346_v35, 0.0  ;;  %v3349_v49 = vadd.f32 %v3775_v15, %v5810_v57  ;;  %v3340_v33 = vpop.f32.mrb[111].mxu1 }
 0xabd   :  { %v3364_v60 = vmax.f32 %v3338_v6, 0.0  ;;  %v3341_v28 = vadd.f32 %v3340_v33, %v5810_v57 }
 0xabe   :  { %v3382_v29 = vadd.f32 %v3366_v51, %v5976_v58  ;;  %v3367_v34 = vmax.f32 %v3349_v49, 0.0 }
 0xabf   :  { %v3380_v48 = vadd.f32 %v3364_v60, %v5977_v53  ;;  %v3365_v43 = vmax.f32 %v3341_v28, 0.0 }
 0xac0   :  { %3398 = vst [vmem:[%s5896_s4 + $0x70] sm:$0xff] %v3382_v29  ;;  %v3383_v10 = vadd.f32 %v3367_v34, %v5978_v40 }
 0xac1   :  { %3396 = vst [vmem:[%s5896_s4 + $0x60] sm:$0xff] %v3380_v48  ;;  %v3381_v22 = vadd.f32 %v3365_v43, %v5979_v21 }
 0xac2   :  { %3399 = vst [vmem:[%s5896_s4 + $0x78] sm:$0xff] %v3383_v10 }
 0xac3   :  { %3397 = vst [vmem:[%s5896_s4 + $0x68] sm:$0xff] %v3381_v22 }
 0xac4   :  { %3404 = vsyncpa [#allocation3], 1 }

</bundles_post_ra>
